<compile_context>
chip_gen: v5e
topology: v5e:2x2
jax: 0.10.0
libtpu: 0.0.40
codegen_flags: <defaults>
</compile_context>

<pallas_src>
import functools

import jax
import jax.numpy as jnp
from jax.experimental import pallas as pl
from jax.experimental.pallas import tpu as pltpu


_COMPILER_PARAMS = pltpu.CompilerParams(
    dimension_semantics=("parallel",),          # megacore on v7x
    vmem_limit_bytes=32 * 1024 * 1024,
)


# --------------------------------------------------------------------------
# Fused (matmul + bias + activation [+ scale]) Pallas kernel, M-row tiled.
# --------------------------------------------------------------------------
def _matmul_bias_act_kernel(a_ref, w_ref, b_ref, *rest, act, cout):
    """One (TM, K) row tile:  o = act(a @ w + b) [* scale].

    a:(TM,K) bf16, w:(K,Nw) bf16, b:(1,Nw) f32, optional scale:(1,Nout) f32.
    act == "gru": Nw == 2*cout and the ConvGRU update with zero recurrent
    state is fused into the epilogue:
        o = (1 - sigmoid(acc[:, :cout])) * tanh(acc[:, cout:])
    """
    if len(rest) == 2:
        s_ref, o_ref = rest
    else:
        (o_ref,) = rest
        s_ref = None
    acc = jnp.dot(a_ref[...], w_ref[...], preferred_element_type=jnp.float32)
    acc = acc + b_ref[...]
    if act == "relu":
        out = jnp.maximum(acc, 0.0)
    elif act == "sigmoid":
        out = jax.nn.sigmoid(acc)
    elif act == "tanh":
        out = jnp.tanh(acc)
    elif act == "gru":
        z = jax.nn.sigmoid(acc[:, :cout])
        c = jnp.tanh(acc[:, cout:])
        out = (1.0 - z) * c
    else:
        out = acc
    if s_ref is not None:
        out = out * s_ref[...]
    o_ref[...] = out.astype(o_ref.dtype)


def _dec_head_kernel(a_ref, w1_ref, b1_ref, w2_ref, b2_ref, o_ref):
    """Fused decoder head for one (TM, K) row tile:

        h     = relu(a @ w1 + b1)          # dec0b 3x3 conv (im2col rows)
        alpha = clip(h @ w2 + b2, 0, 1)    # alpha-only 1x1 projection + clamp

    The intermediate h (TM, C1) never leaves VMEM.
    """
    h = jnp.dot(a_ref[...], w1_ref[...], preferred_element_type=jnp.float32)
    h = jnp.maximum(h + b1_ref[...], 0.0)
    alpha = jnp.dot(h.astype(jnp.bfloat16), w2_ref[...],
                    preferred_element_type=jnp.float32)
    alpha = alpha + b2_ref[...]
    o_ref[...] = jnp.clip(alpha, 0.0, 1.0).astype(o_ref.dtype)


def _round_up(x, m):
    return ((x + m - 1) // m) * m


def _choose_tile_m(m, k, n_out, max_tm=512, budget_bytes=8 << 20):
    """Rows per tile: 2x-buffered bf16 input tile + f32 output tile in budget.

    max_tm=512 keeps 2*(TM*K*2 + TM*N*4) + K*N*2 well under the 16/32 MiB
    default scoped VMEM and within v7x's 64 MiB physical VMEM per TensorCore.
    """
    per_row = 2 * (k * 2 + n_out * 4)
    tm = budget_bytes // max(per_row, 1)
    tm = max(8, min(max_tm, tm))
    tm = (tm // 8) * 8
    tm = min(tm, _round_up(m, 8))
    return tm


def matmul_bias_act(a, w, b, act="none", cout=None, scale=None,
                    out_dtype=jnp.bfloat16):
    """a:(M,K), w:(K,Nw), b:(Nw,).  Returns (M, Nout) in out_dtype.

    Nout = cout for act="gru" (where Nw == 2*cout), else Nout = Nw.
    scale (optional): (1, Nout) multiplied into the epilogue (LR-ASPP gate).
    """
    M, K = a.shape
    Kw, Nw = w.shape
    assert K == Kw, (K, Kw)
    n_out = cout if act == "gru" else Nw

    tm = _choose_tile_m(M, K, n_out)
    m_pad = _round_up(max(M, 1), tm)
    grid_m = m_pad // tm

    a = a.astype(jnp.bfloat16)
    if m_pad != M:
        a = jnp.pad(a, ((0, m_pad - M), (0, 0)))
    w = w.astype(jnp.bfloat16)
    b = b.reshape(1, Nw).astype(jnp.float32)

    in_specs = [
        pl.BlockSpec((tm, K), lambda i: (i, 0)),    # activation row tile
        pl.BlockSpec((K, Nw), lambda i: (0, 0)),    # weights (resident)
        pl.BlockSpec((1, Nw), lambda i: (0, 0)),    # bias (resident)
    ]
    args = [a, w, b]
    if scale is not None:
        scale = scale.reshape(1, n_out).astype(jnp.float32)
        in_specs.append(pl.BlockSpec((1, n_out), lambda i: (0, 0)))
        args.append(scale)

    transcendentals = m_pad * Nw if act in ("sigmoid", "tanh", "gru") else 0
    cost = pl.CostEstimate(
        flops=2 * m_pad * K * Nw,
        transcendentals=transcendentals,
        bytes_accessed=(m_pad * K * 2 + K * Nw * 2 + Nw * 4
                        + m_pad * n_out * jnp.dtype(out_dtype).itemsize),
    )

    out = pl.pallas_call(
        functools.partial(_matmul_bias_act_kernel, act=act, cout=n_out),
        out_shape=jax.ShapeDtypeStruct((m_pad, n_out), out_dtype),
        grid=(grid_m,),
        in_specs=in_specs,
        out_specs=pl.BlockSpec((tm, n_out), lambda i: (i, 0)),
        compiler_params=_COMPILER_PARAMS,
        cost_estimate=cost,
    )(*args)

    if m_pad != M:
        out = out[:M]
    return out


def dec_head_matmul(a, w1, b1, w2, b2):
    """Fused head: a:(M,K); h=relu(a@w1+b1); alpha=clip(h@w2+b2,0,1) -> (M,1) f32."""
    M, K = a.shape
    K1, C1 = w1.shape
    assert K == K1, (K, K1)

    tm = _choose_tile_m(M, K, C1)
    m_pad = _round_up(max(M, 1), tm)
    grid_m = m_pad // tm

    a = a.astype(jnp.bfloat16)
    if m_pad != M:
        a = jnp.pad(a, ((0, m_pad - M), (0, 0)))
    w1 = w1.astype(jnp.bfloat16)
    b1 = b1.reshape(1, C1).astype(jnp.float32)
    w2 = w2.reshape(C1, 1).astype(jnp.bfloat16)
    b2 = b2.reshape(1, 1).astype(jnp.float32)

    cost = pl.CostEstimate(
        flops=2 * m_pad * K * C1 + 2 * m_pad * C1,
        transcendentals=0,
        bytes_accessed=(m_pad * K * 2 + K * C1 * 2 + C1 * 4 + C1 * 2 + 4
                        + m_pad * 4),
    )

    out = pl.pallas_call(
        _dec_head_kernel,
        out_shape=jax.ShapeDtypeStruct((m_pad, 1), jnp.float32),
        grid=(grid_m,),
        in_specs=[
            pl.BlockSpec((tm, K), lambda i: (i, 0)),    # im2col row tile
            pl.BlockSpec((K, C1), lambda i: (0, 0)),    # dec0b weights
            pl.BlockSpec((1, C1), lambda i: (0, 0)),    # dec0b bias
            pl.BlockSpec((C1, 1), lambda i: (0, 0)),    # alpha projection
            pl.BlockSpec((1, 1), lambda i: (0, 0)),     # alpha bias
        ],
        out_specs=pl.BlockSpec((tm, 1), lambda i: (i, 0)),
        compiler_params=_COMPILER_PARAMS,
        cost_estimate=cost,
    )(a, w1, b1, w2, b2)

    if m_pad != M:
        out = out[:M]
    return out


# --------------------------------------------------------------------------
# Conv2d via im2col (glue) + Pallas fused matmul kernel (compute)
# --------------------------------------------------------------------------
# TODO(synk): move the 3x3 tap accumulation into the kernel (halo'd row-band
# input with manual DMA) to avoid materializing the kh*kw im2col tensor in
# HBM; currently the im2col stays in XLA glue (in bf16, halving its bytes).
def _im2col(x, kh, kw, stride, pad):
    """x: [N,H,W,C] -> patches [N,Ho,Wo,kh*kw*C] (ky, kx, cin ordering)."""
    N, H, W, C = x.shape
    if kh == 1 and kw == 1 and stride == 1 and pad == 0:
        return x, H, W
    xp = jnp.pad(x, ((0, 0), (pad, pad), (pad, pad), (0, 0)))
    Ho = (H + 2 * pad - kh) // stride + 1
    Wo = (W + 2 * pad - kw) // stride + 1
    cols = []
    for dy in range(kh):
        for dx in range(kw):
            sl = xp[:,
                    dy:dy + (Ho - 1) * stride + 1:stride,
                    dx:dx + (Wo - 1) * stride + 1:stride, :]
            cols.append(sl)
    return jnp.concatenate(cols, axis=-1), Ho, Wo


def conv2d(x, w, b, stride=1, act="none", cout=None, scale=None,
           out_dtype=jnp.bfloat16):
    """x: [N,H,W,Cin]; w: [kh,kw,Cin,Nw]; b: [Nw]."""
    kh, kw, cin, nw = w.shape
    pad = kh // 2
    patches, Ho, Wo = _im2col(x.astype(jnp.bfloat16), kh, kw, stride, pad)
    N = x.shape[0]
    a = patches.reshape(N * Ho * Wo, kh * kw * cin)
    wm = w.reshape(kh * kw * cin, nw)
    out = matmul_bias_act(a, wm, b, act=act, cout=cout, scale=scale,
                          out_dtype=out_dtype)
    return out.reshape(N, Ho, Wo, out.shape[-1])


def conv_head(x, w1, b1, w2, b2):
    """Fused final block: clip(conv1x1(relu(conv3x3(x, w1)+b1), w2)+b2, 0, 1)."""
    kh, kw, cin, c1 = w1.shape
    pad = kh // 2
    patches, Ho, Wo = _im2col(x.astype(jnp.bfloat16), kh, kw, 1, pad)
    N = x.shape[0]
    a = patches.reshape(N * Ho * Wo, kh * kw * cin)
    out = dec_head_matmul(a, w1.reshape(kh * kw * cin, c1), b1, w2, b2)
    return out.reshape(N, Ho, Wo, 1)


def upsample2(x):
    N, H, W, C = x.shape
    return jax.image.resize(x, (N, 2 * H, 2 * W, C), method="bilinear")


def conv_gru(x, p):
    """ConvGRU with zero initial recurrent state (exact for this wrapper: T=1,
    rec states default to None -> zeros).

    With h == 0:  r*h == 0 so the r-gate conv is dead, the h-half of the gate
    weights multiplies zeros, and h' = (1-z)*c + z*h reduces to (1-z)*c.
    z and c become a single fused conv over x alone; the combine runs inside
    the Pallas kernel epilogue (act="gru").
    """
    # TODO(synk): general streaming path with nonzero recurrent state (r gate,
    # h-half of the weights, z*h term) is not implemented.
    C = x.shape[-1]
    wz = p["z"]["w"][:, :, :C, :]          # x-half of the z-gate weights
    wc = p["c"]["w"][:, :, :C, :]          # x-half of the candidate weights
    w = jnp.concatenate([wz, wc], axis=-1)               # (3, 3, C, 2C)
    b = jnp.concatenate([p["z"]["b"], p["c"]["b"]], -1)  # (2C,)
    return conv2d(x, w, b, act="gru", cout=C)


# --------------------------------------------------------------------------
# Parameters (deterministic synthetic init — no checkpoint loading)
# --------------------------------------------------------------------------
C1, C2, C3, C4 = 8, 16, 24, 32


def init_params(key):
    idx = [0]

    def conv_init(kh, kw, cin, cout):
        k = jax.random.fold_in(key, idx[0])
        idx[0] += 1
        scale = 1.0 / float(kh * kw * cin) ** 0.5
        w = jax.random.normal(k, (kh, kw, cin, cout), jnp.float32) * scale
        return {"w": w, "b": jnp.zeros((cout,), jnp.float32)}

    def gru_init(c):
        return {"r": conv_init(3, 3, 2 * c, c),
                "z": conv_init(3, 3, 2 * c, c),
                "c": conv_init(3, 3, 2 * c, c)}

    return {
        # encoder backbone (strides 2, 4, 8, 16)
        "enc1": conv_init(3, 3, 3, C1),
        "enc2": conv_init(3, 3, C1, C2),
        "enc3": conv_init(3, 3, C2, C3),
        "enc4": conv_init(3, 3, C3, C4),
        # LR-ASPP
        "aspp1": conv_init(1, 1, C4, C4),
        "aspp2": conv_init(1, 1, C4, C4),
        # recurrent decoder
        "gru4": gru_init(C4),
        "dec3": conv_init(3, 3, C4 + C3, C3),
        "gru3": gru_init(C3),
        "dec2": conv_init(3, 3, C3 + C2, C2),
        "gru2": gru_init(C2),
        "dec1": conv_init(3, 3, C2 + C1, C1),
        "gru1": gru_init(C1),
        # output block + projection (3 fgr residual + 1 alpha)
        "dec0a": conv_init(3, 3, C1 + 3, C1),
        "dec0b": conv_init(3, 3, C1, C1),
        "proj": conv_init(1, 1, C1, 4),
    }


# --------------------------------------------------------------------------
# MattingNetwork forward (NHWC internally, bf16 activations, f32 output)
# --------------------------------------------------------------------------
def matting_network(params, src):
    """src: [N,H,W,3].  Returns pha: [N,H,W,1] f32 in [0,1].

    The fgr branch of MattingNetwork (fgr residual channels of the projection
    and the src+residual clamp) is dead code for this wrapper — it only
    returns pha — so it is skipped entirely.
    """
    p = params
    x = src.astype(jnp.bfloat16)
    # Encoder
    f1 = conv2d(x,  p["enc1"]["w"], p["enc1"]["b"], stride=2, act="relu")
    f2 = conv2d(f1, p["enc2"]["w"], p["enc2"]["b"], stride=2, act="relu")
    f3 = conv2d(f2, p["enc3"]["w"], p["enc3"]["b"], stride=2, act="relu")
    f4 = conv2d(f3, p["enc4"]["w"], p["enc4"]["b"], stride=2, act="relu")
    # LR-ASPP: x4 = relu(conv1x1(f4)) * sigmoid(conv1x1(avgpool(f4)))
    pooled = jnp.mean(f4.astype(jnp.float32), axis=(1, 2), keepdims=True)
    a2 = conv2d(pooled, p["aspp2"]["w"], p["aspp2"]["b"], act="sigmoid",
                out_dtype=jnp.float32)
    if f4.shape[0] == 1:
        # Batch 1 (this wrapper): fuse the channel-attention scale into the
        # aspp1 conv epilogue — no extra elementwise pass over f4-sized data.
        x4 = conv2d(f4, p["aspp1"]["w"], p["aspp1"]["b"], act="relu",
                    scale=a2.reshape(1, -1))
    else:
        a1 = conv2d(f4, p["aspp1"]["w"], p["aspp1"]["b"], act="relu")
        x4 = (a1.astype(jnp.float32) * a2).astype(jnp.bfloat16)
    # Recurrent decoder (zero initial recurrent states, T=1)
    d4 = conv_gru(x4, p["gru4"])
    d3 = conv2d(jnp.concatenate([upsample2(d4), f3], -1),
                p["dec3"]["w"], p["dec3"]["b"], act="relu")
    d3 = conv_gru(d3, p["gru3"])
    d2 = conv2d(jnp.concatenate([upsample2(d3), f2], -1),
                p["dec2"]["w"], p["dec2"]["b"], act="relu")
    d2 = conv_gru(d2, p["gru2"])
    d1 = conv2d(jnp.concatenate([upsample2(d2), f1], -1),
                p["dec1"]["w"], p["dec1"]["b"], act="relu")
    d1 = conv_gru(d1, p["gru1"])
    d0 = conv2d(jnp.concatenate([upsample2(d1), x], -1),
                p["dec0a"]["w"], p["dec0a"]["b"], act="relu")
    # Fused output head: dec0b 3x3 conv + ReLU + alpha-only 1x1 projection +
    # clamp, all in one kernel (the full-res dec0b activation never hits HBM).
    w_alpha = p["proj"]["w"].reshape(C1, 4)[:, 3:4]
    b_alpha = p["proj"]["b"][3:4]
    pha = conv_head(d0, p["dec0b"]["w"], p["dec0b"]["b"], w_alpha, b_alpha)
    return pha


# --------------------------------------------------------------------------
# RvmBaseModel.forward equivalent
# --------------------------------------------------------------------------
def rvm_base_model_forward(params, inp):
    """inp: [1, 3, H, W] (NCHW).  Returns pha[0]: [1, 1, H, W] (f32)."""
    # TODO(synk): downsample_ratio != 1.0 path (fast-guided-filter refinement)
    # not implemented; the wrapper default downsample_ratio=1.0 is used.
    src5 = inp[None]                                   # unsqueeze(0) -> [B=1,T=1,3,H,W]
    B, T, C, H, W = src5.shape
    x = src5.reshape(B * T, C, H, W).transpose(0, 2, 3, 1)   # NCHW -> NHWC
    pha = matting_network(params, x)                         # [B*T, H, W, 1]
    pha = pha.transpose(0, 3, 1, 2).reshape(B, T, 1, H, W)   # -> [B, T, 1, H, W]
    return pha[0]                                            # [T, 1, H, W]


if __name__ == "__main__":
    key = jax.random.PRNGKey(0)
    params = init_params(jax.random.fold_in(key, 1))
    x = jax.random.uniform(jax.random.fold_in(key, 2), (1, 3, 16, 16), jnp.float32)

    fwd = jax.jit(lambda inp: rvm_base_model_forward(params, inp))
    pha = fwd(x)
    jax.block_until_ready(pha)

    assert pha.shape == (1, 1, 16, 16), pha.shape
    assert pha.dtype == jnp.float32
    assert bool(jnp.all((pha >= 0.0) & (pha <= 1.0)))
    print("KERNEL_OK")
</pallas_src>

<mosaic_0001>
module attributes {stable_mosaic.version = 11 : i64} {
  func.func @_matmul_bias_act_kernel(%arg0: i32, %arg1: memref<64x27xbf16, #tpu.memory_space<vmem>>, %arg2: memref<27x8xbf16, #tpu.memory_space<vmem>>, %arg3: memref<1x8xf32, #tpu.memory_space<vmem>>, %arg4: memref<64x8xbf16, #tpu.memory_space<vmem>>) attributes {dimension_semantics = [#tpu.dimension_semantics<parallel>], iteration_bounds = array<i64: 1>, scalar_prefetch = 0 : i64, scratch_operands = 0 : i64, tpu.core_type = #tpu.core_type<tc>, window_params = [{transform_indices = @transform_0, window_bounds = array<i64: 64, 27>}, {pipeline_mode = #tpu.pipeline_mode<synchronous>, transform_indices = @transform_1, window_bounds = array<i64: 27, 8>}, {pipeline_mode = #tpu.pipeline_mode<synchronous>, transform_indices = @transform_2, window_bounds = array<i64: 1, 8>}, {transform_indices = @transform_3, window_bounds = array<i64: 64, 8>}]} {
    %c0 = arith.constant 0 : index
    %c0_0 = arith.constant 0 : index
    %0 = vector.load %arg1[%c0, %c0_0] : memref<64x27xbf16, #tpu.memory_space<vmem>>, vector<64x27xbf16>
    %c0_1 = arith.constant 0 : index
    %c0_2 = arith.constant 0 : index
    %1 = vector.load %arg2[%c0_1, %c0_2] : memref<27x8xbf16, #tpu.memory_space<vmem>>, vector<27x8xbf16>
    %cst = arith.constant dense<0.000000e+00> : vector<64x8xf32>
    %2 = tpu.matmul %0, %1, %cst {dimension_numbers = #tpu.dot_dimension_numbers<[1], [0], [0], [1], [0, 0, 1, 1], [], []>} : vector<64x27xbf16>, vector<27x8xbf16>, vector<64x8xf32> -> vector<64x8xf32>
    %c0_3 = arith.constant 0 : index
    %c0_4 = arith.constant 0 : index
    %3 = vector.load %arg3[%c0_3, %c0_4] : memref<1x8xf32, #tpu.memory_space<vmem>>, vector<1x8xf32>
    %4 = vector.broadcast %3 : vector<1x8xf32> to vector<64x8xf32>
    %5 = arith.addf %2, %4 : vector<64x8xf32>
    %cst_5 = arith.constant 0.000000e+00 : f32
    %6 = vector.broadcast %cst_5 : f32 to vector<64x8xf32>
    %7 = arith.maximumf %5, %6 : vector<64x8xf32>
    %8 = arith.truncf %7 : vector<64x8xf32> to vector<64x8xbf16>
    %c0_6 = arith.constant 0 : index
    %c0_7 = arith.constant 0 : index
    %9 = vector.load %arg4[%c0_6, %c0_7] : memref<64x8xbf16, #tpu.memory_space<vmem>>, vector<64x8xbf16>
    tpu.vector_store %arg4[%c0_6, %c0_7], %8 {strides = array<i32>} : memref<64x8xbf16, #tpu.memory_space<vmem>>, vector<64x8xbf16>,
    return
  }
  func.func @transform_0(%arg0: i32) -> (i32, i32) {
    %c0_i32 = arith.constant 0 : i32
    %c0_i32_0 = arith.constant 0 : i32
    return %arg0, %c0_i32 : i32, i32
  }
  func.func @transform_1(%arg0: i32) -> (i32, i32) {
    %c0_i32 = arith.constant 0 : i32
    %c0_i32_0 = arith.constant 0 : i32
    %c0_i32_1 = arith.constant 0 : i32
    return %c0_i32, %c0_i32_0 : i32, i32
  }
  func.func @transform_2(%arg0: i32) -> (i32, i32) {
    %c0_i32 = arith.constant 0 : i32
    %c0_i32_0 = arith.constant 0 : i32
    %c0_i32_1 = arith.constant 0 : i32
    return %c0_i32, %c0_i32_0 : i32, i32
  }
  func.func @transform_3(%arg0: i32) -> (i32, i32) {
    %c0_i32 = arith.constant 0 : i32
    %c0_i32_0 = arith.constant 0 : i32
    return %arg0, %c0_i32 : i32, i32
  }
}

module attributes {stable_mosaic.version = 11 : i64} {
  func.func @_matmul_bias_act_kernel(%arg0: i32, %arg1: memref<16x72xbf16, #tpu.memory_space<vmem>>, %arg2: memref<72x16xbf16, #tpu.memory_space<vmem>>, %arg3: memref<1x16xf32, #tpu.memory_space<vmem>>, %arg4: memref<16x16xbf16, #tpu.memory_space<vmem>>) attributes {dimension_semantics = [#tpu.dimension_semantics<parallel>], iteration_bounds = array<i64: 1>, scalar_prefetch = 0 : i64, scratch_operands = 0 : i64, tpu.core_type = #tpu.core_type<tc>, window_params = [{transform_indices = @transform_0, window_bounds = array<i64: 16, 72>}, {pipeline_mode = #tpu.pipeline_mode<synchronous>, transform_indices = @transform_1, window_bounds = array<i64: 72, 16>}, {pipeline_mode = #tpu.pipeline_mode<synchronous>, transform_indices = @transform_2, window_bounds = array<i64: 1, 16>}, {transform_indices = @transform_3, window_bounds = array<i64: 16, 16>}]} {
    %c0 = arith.constant 0 : index
    %c0_0 = arith.constant 0 : index
    %0 = vector.load %arg1[%c0, %c0_0] : memref<16x72xbf16, #tpu.memory_space<vmem>>, vector<16x72xbf16>
    %c0_1 = arith.constant 0 : index
    %c0_2 = arith.constant 0 : index
    %1 = vector.load %arg2[%c0_1, %c0_2] : memref<72x16xbf16, #tpu.memory_space<vmem>>, vector<72x16xbf16>
    %cst = arith.constant dense<0.000000e+00> : vector<16x16xf32>
    %2 = tpu.matmul %0, %1, %cst {dimension_numbers = #tpu.dot_dimension_numbers<[1], [0], [0], [1], [0, 0, 1, 1], [], []>} : vector<16x72xbf16>, vector<72x16xbf16>, vector<16x16xf32> -> vector<16x16xf32>
    %c0_3 = arith.constant 0 : index
    %c0_4 = arith.constant 0 : index
    %3 = vector.load %arg3[%c0_3, %c0_4] : memref<1x16xf32, #tpu.memory_space<vmem>>, vector<1x16xf32>
    %4 = vector.broadcast %3 : vector<1x16xf32> to vector<16x16xf32>
    %5 = arith.addf %2, %4 : vector<16x16xf32>
    %cst_5 = arith.constant 0.000000e+00 : f32
    %6 = vector.broadcast %cst_5 : f32 to vector<16x16xf32>
    %7 = arith.maximumf %5, %6 : vector<16x16xf32>
    %8 = arith.truncf %7 : vector<16x16xf32> to vector<16x16xbf16>
    %c0_6 = arith.constant 0 : index
    %c0_7 = arith.constant 0 : index
    %9 = vector.load %arg4[%c0_6, %c0_7] : memref<16x16xbf16, #tpu.memory_space<vmem>>, vector<16x16xbf16>
    tpu.vector_store %arg4[%c0_6, %c0_7], %8 {strides = array<i32>} : memref<16x16xbf16, #tpu.memory_space<vmem>>, vector<16x16xbf16>,
    return
  }
  func.func @transform_0(%arg0: i32) -> (i32, i32) {
    %c0_i32 = arith.constant 0 : i32
    %c0_i32_0 = arith.constant 0 : i32
    return %arg0, %c0_i32 : i32, i32
  }
  func.func @transform_1(%arg0: i32) -> (i32, i32) {
    %c0_i32 = arith.constant 0 : i32
    %c0_i32_0 = arith.constant 0 : i32
    %c0_i32_1 = arith.constant 0 : i32
    return %c0_i32, %c0_i32_0 : i32, i32
  }
  func.func @transform_2(%arg0: i32) -> (i32, i32) {
    %c0_i32 = arith.constant 0 : i32
    %c0_i32_0 = arith.constant 0 : i32
    %c0_i32_1 = arith.constant 0 : i32
    return %c0_i32, %c0_i32_0 : i32, i32
  }
  func.func @transform_3(%arg0: i32) -> (i32, i32) {
    %c0_i32 = arith.constant 0 : i32
    %c0_i32_0 = arith.constant 0 : i32
    return %arg0, %c0_i32 : i32, i32
  }
}

module attributes {stable_mosaic.version = 11 : i64} {
  func.func @_matmul_bias_act_kernel(%arg0: i32, %arg1: memref<8x144xbf16, #tpu.memory_space<vmem>>, %arg2: memref<144x24xbf16, #tpu.memory_space<vmem>>, %arg3: memref<1x24xf32, #tpu.memory_space<vmem>>, %arg4: memref<8x24xbf16, #tpu.memory_space<vmem>>) attributes {dimension_semantics = [#tpu.dimension_semantics<parallel>], iteration_bounds = array<i64: 1>, scalar_prefetch = 0 : i64, scratch_operands = 0 : i64, tpu.core_type = #tpu.core_type<tc>, window_params = [{transform_indices = @transform_0, window_bounds = array<i64: 8, 144>}, {pipeline_mode = #tpu.pipeline_mode<synchronous>, transform_indices = @transform_1, window_bounds = array<i64: 144, 24>}, {pipeline_mode = #tpu.pipeline_mode<synchronous>, transform_indices = @transform_2, window_bounds = array<i64: 1, 24>}, {transform_indices = @transform_3, window_bounds = array<i64: 8, 24>}]} {
    %c0 = arith.constant 0 : index
    %c0_0 = arith.constant 0 : index
    %0 = vector.load %arg1[%c0, %c0_0] : memref<8x144xbf16, #tpu.memory_space<vmem>>, vector<8x144xbf16>
    %c0_1 = arith.constant 0 : index
    %c0_2 = arith.constant 0 : index
    %1 = vector.load %arg2[%c0_1, %c0_2] : memref<144x24xbf16, #tpu.memory_space<vmem>>, vector<144x24xbf16>
    %cst = arith.constant dense<0.000000e+00> : vector<8x24xf32>
    %2 = tpu.matmul %0, %1, %cst {dimension_numbers = #tpu.dot_dimension_numbers<[1], [0], [0], [1], [0, 0, 1, 1], [], []>} : vector<8x144xbf16>, vector<144x24xbf16>, vector<8x24xf32> -> vector<8x24xf32>
    %c0_3 = arith.constant 0 : index
    %c0_4 = arith.constant 0 : index
    %3 = vector.load %arg3[%c0_3, %c0_4] : memref<1x24xf32, #tpu.memory_space<vmem>>, vector<1x24xf32>
    %4 = vector.broadcast %3 : vector<1x24xf32> to vector<8x24xf32>
    %5 = arith.addf %2, %4 : vector<8x24xf32>
    %cst_5 = arith.constant 0.000000e+00 : f32
    %6 = vector.broadcast %cst_5 : f32 to vector<8x24xf32>
    %7 = arith.maximumf %5, %6 : vector<8x24xf32>
    %8 = arith.truncf %7 : vector<8x24xf32> to vector<8x24xbf16>
    %c0_6 = arith.constant 0 : index
    %c0_7 = arith.constant 0 : index
    %9 = vector.load %arg4[%c0_6, %c0_7] : memref<8x24xbf16, #tpu.memory_space<vmem>>, vector<8x24xbf16>
    tpu.vector_store %arg4[%c0_6, %c0_7], %8 {strides = array<i32>} : memref<8x24xbf16, #tpu.memory_space<vmem>>, vector<8x24xbf16>,
    return
  }
  func.func @transform_0(%arg0: i32) -> (i32, i32) {
    %c0_i32 = arith.constant 0 : i32
    %c0_i32_0 = arith.constant 0 : i32
    return %arg0, %c0_i32 : i32, i32
  }
  func.func @transform_1(%arg0: i32) -> (i32, i32) {
    %c0_i32 = arith.constant 0 : i32
    %c0_i32_0 = arith.constant 0 : i32
    %c0_i32_1 = arith.constant 0 : i32
    return %c0_i32, %c0_i32_0 : i32, i32
  }
  func.func @transform_2(%arg0: i32) -> (i32, i32) {
    %c0_i32 = arith.constant 0 : i32
    %c0_i32_0 = arith.constant 0 : i32
    %c0_i32_1 = arith.constant 0 : i32
    return %c0_i32, %c0_i32_0 : i32, i32
  }
  func.func @transform_3(%arg0: i32) -> (i32, i32) {
    %c0_i32 = arith.constant 0 : i32
    %c0_i32_0 = arith.constant 0 : i32
    return %arg0, %c0_i32 : i32, i32
  }
}

module attributes {stable_mosaic.version = 11 : i64} {
  func.func @_matmul_bias_act_kernel(%arg0: i32, %arg1: memref<8x216xbf16, #tpu.memory_space<vmem>>, %arg2: memref<216x32xbf16, #tpu.memory_space<vmem>>, %arg3: memref<1x32xf32, #tpu.memory_space<vmem>>, %arg4: memref<8x32xbf16, #tpu.memory_space<vmem>>) attributes {dimension_semantics = [#tpu.dimension_semantics<parallel>], iteration_bounds = array<i64: 1>, scalar_prefetch = 0 : i64, scratch_operands = 0 : i64, tpu.core_type = #tpu.core_type<tc>, window_params = [{transform_indices = @transform_0, window_bounds = array<i64: 8, 216>}, {pipeline_mode = #tpu.pipeline_mode<synchronous>, transform_indices = @transform_1, window_bounds = array<i64: 216, 32>}, {pipeline_mode = #tpu.pipeline_mode<synchronous>, transform_indices = @transform_2, window_bounds = array<i64: 1, 32>}, {transform_indices = @transform_3, window_bounds = array<i64: 8, 32>}]} {
    %c0 = arith.constant 0 : index
    %c0_0 = arith.constant 0 : index
    %0 = vector.load %arg1[%c0, %c0_0] : memref<8x216xbf16, #tpu.memory_space<vmem>>, vector<8x216xbf16>
    %c0_1 = arith.constant 0 : index
    %c0_2 = arith.constant 0 : index
    %1 = vector.load %arg2[%c0_1, %c0_2] : memref<216x32xbf16, #tpu.memory_space<vmem>>, vector<216x32xbf16>
    %cst = arith.constant dense<0.000000e+00> : vector<8x32xf32>
    %2 = tpu.matmul %0, %1, %cst {dimension_numbers = #tpu.dot_dimension_numbers<[1], [0], [0], [1], [0, 0, 1, 1], [], []>} : vector<8x216xbf16>, vector<216x32xbf16>, vector<8x32xf32> -> vector<8x32xf32>
    %c0_3 = arith.constant 0 : index
    %c0_4 = arith.constant 0 : index
    %3 = vector.load %arg3[%c0_3, %c0_4] : memref<1x32xf32, #tpu.memory_space<vmem>>, vector<1x32xf32>
    %4 = vector.broadcast %3 : vector<1x32xf32> to vector<8x32xf32>
    %5 = arith.addf %2, %4 : vector<8x32xf32>
    %cst_5 = arith.constant 0.000000e+00 : f32
    %6 = vector.broadcast %cst_5 : f32 to vector<8x32xf32>
    %7 = arith.maximumf %5, %6 : vector<8x32xf32>
    %8 = arith.truncf %7 : vector<8x32xf32> to vector<8x32xbf16>
    %c0_6 = arith.constant 0 : index
    %c0_7 = arith.constant 0 : index
    %9 = vector.load %arg4[%c0_6, %c0_7] : memref<8x32xbf16, #tpu.memory_space<vmem>>, vector<8x32xbf16>
    tpu.vector_store %arg4[%c0_6, %c0_7], %8 {strides = array<i32>} : memref<8x32xbf16, #tpu.memory_space<vmem>>, vector<8x32xbf16>,
    return
  }
  func.func @transform_0(%arg0: i32) -> (i32, i32) {
    %c0_i32 = arith.constant 0 : i32
    %c0_i32_0 = arith.constant 0 : i32
    return %arg0, %c0_i32 : i32, i32
  }
  func.func @transform_1(%arg0: i32) -> (i32, i32) {
    %c0_i32 = arith.constant 0 : i32
    %c0_i32_0 = arith.constant 0 : i32
    %c0_i32_1 = arith.constant 0 : i32
    return %c0_i32, %c0_i32_0 : i32, i32
  }
  func.func @transform_2(%arg0: i32) -> (i32, i32) {
    %c0_i32 = arith.constant 0 : i32
    %c0_i32_0 = arith.constant 0 : i32
    %c0_i32_1 = arith.constant 0 : i32
    return %c0_i32, %c0_i32_0 : i32, i32
  }
  func.func @transform_3(%arg0: i32) -> (i32, i32) {
    %c0_i32 = arith.constant 0 : i32
    %c0_i32_0 = arith.constant 0 : i32
    return %arg0, %c0_i32 : i32, i32
  }
}

module attributes {stable_mosaic.version = 11 : i64} {
  func.func @_matmul_bias_act_kernel(%arg0: i32, %arg1: memref<8x32xbf16, #tpu.memory_space<vmem>>, %arg2: memref<32x32xbf16, #tpu.memory_space<vmem>>, %arg3: memref<1x32xf32, #tpu.memory_space<vmem>>, %arg4: memref<8x32xf32, #tpu.memory_space<vmem>>) attributes {dimension_semantics = [#tpu.dimension_semantics<parallel>], iteration_bounds = array<i64: 1>, scalar_prefetch = 0 : i64, scratch_operands = 0 : i64, tpu.core_type = #tpu.core_type<tc>, window_params = [{transform_indices = @transform_0, window_bounds = array<i64: 8, 32>}, {pipeline_mode = #tpu.pipeline_mode<synchronous>, transform_indices = @transform_1, window_bounds = array<i64: 32, 32>}, {pipeline_mode = #tpu.pipeline_mode<synchronous>, transform_indices = @transform_2, window_bounds = array<i64: 1, 32>}, {transform_indices = @transform_3, window_bounds = array<i64: 8, 32>}]} {
    %c0 = arith.constant 0 : index
    %c0_0 = arith.constant 0 : index
    %0 = vector.load %arg1[%c0, %c0_0] : memref<8x32xbf16, #tpu.memory_space<vmem>>, vector<8x32xbf16>
    %c0_1 = arith.constant 0 : index
    %c0_2 = arith.constant 0 : index
    %1 = vector.load %arg2[%c0_1, %c0_2] : memref<32x32xbf16, #tpu.memory_space<vmem>>, vector<32x32xbf16>
    %cst = arith.constant dense<0.000000e+00> : vector<8x32xf32>
    %2 = tpu.matmul %0, %1, %cst {dimension_numbers = #tpu.dot_dimension_numbers<[1], [0], [0], [1], [0, 0, 1, 1], [], []>} : vector<8x32xbf16>, vector<32x32xbf16>, vector<8x32xf32> -> vector<8x32xf32>
    %c0_3 = arith.constant 0 : index
    %c0_4 = arith.constant 0 : index
    %3 = vector.load %arg3[%c0_3, %c0_4] : memref<1x32xf32, #tpu.memory_space<vmem>>, vector<1x32xf32>
    %4 = vector.broadcast %3 : vector<1x32xf32> to vector<8x32xf32>
    %5 = arith.addf %2, %4 : vector<8x32xf32>
    %6 = arith.negf %5 : vector<8x32xf32>
    %7 = math.exp %6 : vector<8x32xf32>
    %cst_5 = arith.constant 1.000000e+00 : f32
    %8 = vector.broadcast %cst_5 : f32 to vector<8x32xf32>
    %9 = arith.addf %8, %7 : vector<8x32xf32>
    %10 = arith.divf %8, %9 : vector<8x32xf32>
    %c0_6 = arith.constant 0 : index
    %c0_7 = arith.constant 0 : index
    %11 = vector.load %arg4[%c0_6, %c0_7] : memref<8x32xf32, #tpu.memory_space<vmem>>, vector<8x32xf32>
    tpu.vector_store %arg4[%c0_6, %c0_7], %10 {strides = array<i32>} : memref<8x32xf32, #tpu.memory_space<vmem>>, vector<8x32xf32>,
    return
  }
  func.func @transform_0(%arg0: i32) -> (i32, i32) {
    %c0_i32 = arith.constant 0 : i32
    %c0_i32_0 = arith.constant 0 : i32
    return %arg0, %c0_i32 : i32, i32
  }
  func.func @transform_1(%arg0: i32) -> (i32, i32) {
    %c0_i32 = arith.constant 0 : i32
    %c0_i32_0 = arith.constant 0 : i32
    %c0_i32_1 = arith.constant 0 : i32
    return %c0_i32, %c0_i32_0 : i32, i32
  }
  func.func @transform_2(%arg0: i32) -> (i32, i32) {
    %c0_i32 = arith.constant 0 : i32
    %c0_i32_0 = arith.constant 0 : i32
    %c0_i32_1 = arith.constant 0 : i32
    return %c0_i32, %c0_i32_0 : i32, i32
  }
  func.func @transform_3(%arg0: i32) -> (i32, i32) {
    %c0_i32 = arith.constant 0 : i32
    %c0_i32_0 = arith.constant 0 : i32
    return %arg0, %c0_i32 : i32, i32
  }
}

module attributes {stable_mosaic.version = 11 : i64} {
  func.func @_matmul_bias_act_kernel(%arg0: i32, %arg1: memref<8x32xbf16, #tpu.memory_space<vmem>>, %arg2: memref<32x32xbf16, #tpu.memory_space<vmem>>, %arg3: memref<1x32xf32, #tpu.memory_space<vmem>>, %arg4: memref<1x32xf32, #tpu.memory_space<vmem>>, %arg5: memref<8x32xbf16, #tpu.memory_space<vmem>>) attributes {dimension_semantics = [#tpu.dimension_semantics<parallel>], iteration_bounds = array<i64: 1>, scalar_prefetch = 0 : i64, scratch_operands = 0 : i64, tpu.core_type = #tpu.core_type<tc>, window_params = [{transform_indices = @transform_0, window_bounds = array<i64: 8, 32>}, {pipeline_mode = #tpu.pipeline_mode<synchronous>, transform_indices = @transform_1, window_bounds = array<i64: 32, 32>}, {pipeline_mode = #tpu.pipeline_mode<synchronous>, transform_indices = @transform_2, window_bounds = array<i64: 1, 32>}, {pipeline_mode = #tpu.pipeline_mode<synchronous>, transform_indices = @transform_3, window_bounds = array<i64: 1, 32>}, {transform_indices = @transform_4, window_bounds = array<i64: 8, 32>}]} {
    %c0 = arith.constant 0 : index
    %c0_0 = arith.constant 0 : index
    %0 = vector.load %arg1[%c0, %c0_0] : memref<8x32xbf16, #tpu.memory_space<vmem>>, vector<8x32xbf16>
    %c0_1 = arith.constant 0 : index
    %c0_2 = arith.constant 0 : index
    %1 = vector.load %arg2[%c0_1, %c0_2] : memref<32x32xbf16, #tpu.memory_space<vmem>>, vector<32x32xbf16>
    %cst = arith.constant dense<0.000000e+00> : vector<8x32xf32>
    %2 = tpu.matmul %0, %1, %cst {dimension_numbers = #tpu.dot_dimension_numbers<[1], [0], [0], [1], [0, 0, 1, 1], [], []>} : vector<8x32xbf16>, vector<32x32xbf16>, vector<8x32xf32> -> vector<8x32xf32>
    %c0_3 = arith.constant 0 : index
    %c0_4 = arith.constant 0 : index
    %3 = vector.load %arg3[%c0_3, %c0_4] : memref<1x32xf32, #tpu.memory_space<vmem>>, vector<1x32xf32>
    %4 = vector.broadcast %3 : vector<1x32xf32> to vector<8x32xf32>
    %5 = arith.addf %2, %4 : vector<8x32xf32>
    %cst_5 = arith.constant 0.000000e+00 : f32
    %6 = vector.broadcast %cst_5 : f32 to vector<8x32xf32>
    %7 = arith.maximumf %5, %6 : vector<8x32xf32>
    %c0_6 = arith.constant 0 : index
    %c0_7 = arith.constant 0 : index
    %8 = vector.load %arg4[%c0_6, %c0_7] : memref<1x32xf32, #tpu.memory_space<vmem>>, vector<1x32xf32>
    %9 = vector.broadcast %8 : vector<1x32xf32> to vector<8x32xf32>
    %10 = arith.mulf %7, %9 : vector<8x32xf32>
    %11 = arith.truncf %10 : vector<8x32xf32> to vector<8x32xbf16>
    %c0_8 = arith.constant 0 : index
    %c0_9 = arith.constant 0 : index
    %12 = vector.load %arg5[%c0_8, %c0_9] : memref<8x32xbf16, #tpu.memory_space<vmem>>, vector<8x32xbf16>
    tpu.vector_store %arg5[%c0_8, %c0_9], %11 {strides = array<i32>} : memref<8x32xbf16, #tpu.memory_space<vmem>>, vector<8x32xbf16>,
    return
  }
  func.func @transform_0(%arg0: i32) -> (i32, i32) {
    %c0_i32 = arith.constant 0 : i32
    %c0_i32_0 = arith.constant 0 : i32
    return %arg0, %c0_i32 : i32, i32
  }
  func.func @transform_1(%arg0: i32) -> (i32, i32) {
    %c0_i32 = arith.constant 0 : i32
    %c0_i32_0 = arith.constant 0 : i32
    %c0_i32_1 = arith.constant 0 : i32
    return %c0_i32, %c0_i32_0 : i32, i32
  }
  func.func @transform_2(%arg0: i32) -> (i32, i32) {
    %c0_i32 = arith.constant 0 : i32
    %c0_i32_0 = arith.constant 0 : i32
    %c0_i32_1 = arith.constant 0 : i32
    return %c0_i32, %c0_i32_0 : i32, i32
  }
  func.func @transform_3(%arg0: i32) -> (i32, i32) {
    %c0_i32 = arith.constant 0 : i32
    %c0_i32_0 = arith.constant 0 : i32
    %c0_i32_1 = arith.constant 0 : i32
    return %c0_i32, %c0_i32_0 : i32, i32
  }
  func.func @transform_4(%arg0: i32) -> (i32, i32) {
    %c0_i32 = arith.constant 0 : i32
    %c0_i32_0 = arith.constant 0 : i32
    return %arg0, %c0_i32 : i32, i32
  }
}

module attributes {stable_mosaic.version = 11 : i64} {
  func.func @_matmul_bias_act_kernel(%arg0: i32, %arg1: memref<8x288xbf16, #tpu.memory_space<vmem>>, %arg2: memref<288x64xbf16, #tpu.memory_space<vmem>>, %arg3: memref<1x64xf32, #tpu.memory_space<vmem>>, %arg4: memref<8x32xbf16, #tpu.memory_space<vmem>>) attributes {dimension_semantics = [#tpu.dimension_semantics<parallel>], iteration_bounds = array<i64: 1>, scalar_prefetch = 0 : i64, scratch_operands = 0 : i64, tpu.core_type = #tpu.core_type<tc>, window_params = [{transform_indices = @transform_0, window_bounds = array<i64: 8, 288>}, {pipeline_mode = #tpu.pipeline_mode<synchronous>, transform_indices = @transform_1, window_bounds = array<i64: 288, 64>}, {pipeline_mode = #tpu.pipeline_mode<synchronous>, transform_indices = @transform_2, window_bounds = array<i64: 1, 64>}, {transform_indices = @transform_3, window_bounds = array<i64: 8, 32>}]} {
    %c0 = arith.constant 0 : index
    %c0_0 = arith.constant 0 : index
    %0 = vector.load %arg1[%c0, %c0_0] : memref<8x288xbf16, #tpu.memory_space<vmem>>, vector<8x288xbf16>
    %c0_1 = arith.constant 0 : index
    %c0_2 = arith.constant 0 : index
    %1 = vector.load %arg2[%c0_1, %c0_2] : memref<288x64xbf16, #tpu.memory_space<vmem>>, vector<288x64xbf16>
    %cst = arith.constant dense<0.000000e+00> : vector<8x64xf32>
    %2 = tpu.matmul %0, %1, %cst {dimension_numbers = #tpu.dot_dimension_numbers<[1], [0], [0], [1], [0, 0, 1, 1], [], []>} : vector<8x288xbf16>, vector<288x64xbf16>, vector<8x64xf32> -> vector<8x64xf32>
    %c0_3 = arith.constant 0 : index
    %c0_4 = arith.constant 0 : index
    %3 = vector.load %arg3[%c0_3, %c0_4] : memref<1x64xf32, #tpu.memory_space<vmem>>, vector<1x64xf32>
    %4 = vector.broadcast %3 : vector<1x64xf32> to vector<8x64xf32>
    %5 = arith.addf %2, %4 : vector<8x64xf32>
    %6 = vector.extract_strided_slice %5 {offsets = [0, 0], sizes = [8, 32], strides = [1, 1]} : vector<8x64xf32> to vector<8x32xf32>
    %7 = arith.negf %6 : vector<8x32xf32>
    %8 = math.exp %7 : vector<8x32xf32>
    %cst_5 = arith.constant 1.000000e+00 : f32
    %9 = vector.broadcast %cst_5 : f32 to vector<8x32xf32>
    %10 = arith.addf %9, %8 : vector<8x32xf32>
    %11 = arith.divf %9, %10 : vector<8x32xf32>
    %12 = vector.extract_strided_slice %5 {offsets = [0, 32], sizes = [8, 32], strides = [1, 1]} : vector<8x64xf32> to vector<8x32xf32>
    %13 = math.tanh %12 : vector<8x32xf32>
    %cst_6 = arith.constant 1.000000e+00 : f32
    %14 = vector.broadcast %cst_6 : f32 to vector<8x32xf32>
    %15 = arith.subf %14, %11 : vector<8x32xf32>
    %16 = arith.mulf %15, %13 : vector<8x32xf32>
    %17 = arith.truncf %16 : vector<8x32xf32> to vector<8x32xbf16>
    %c0_7 = arith.constant 0 : index
    %c0_8 = arith.constant 0 : index
    %18 = vector.load %arg4[%c0_7, %c0_8] : memref<8x32xbf16, #tpu.memory_space<vmem>>, vector<8x32xbf16>
    tpu.vector_store %arg4[%c0_7, %c0_8], %17 {strides = array<i32>} : memref<8x32xbf16, #tpu.memory_space<vmem>>, vector<8x32xbf16>,
    return
  }
  func.func @transform_0(%arg0: i32) -> (i32, i32) {
    %c0_i32 = arith.constant 0 : i32
    %c0_i32_0 = arith.constant 0 : i32
    return %arg0, %c0_i32 : i32, i32
  }
  func.func @transform_1(%arg0: i32) -> (i32, i32) {
    %c0_i32 = arith.constant 0 : i32
    %c0_i32_0 = arith.constant 0 : i32
    %c0_i32_1 = arith.constant 0 : i32
    return %c0_i32, %c0_i32_0 : i32, i32
  }
  func.func @transform_2(%arg0: i32) -> (i32, i32) {
    %c0_i32 = arith.constant 0 : i32
    %c0_i32_0 = arith.constant 0 : i32
    %c0_i32_1 = arith.constant 0 : i32
    return %c0_i32, %c0_i32_0 : i32, i32
  }
  func.func @transform_3(%arg0: i32) -> (i32, i32) {
    %c0_i32 = arith.constant 0 : i32
    %c0_i32_0 = arith.constant 0 : i32
    return %arg0, %c0_i32 : i32, i32
  }
}

module attributes {stable_mosaic.version = 11 : i64} {
  func.func @_matmul_bias_act_kernel(%arg0: i32, %arg1: memref<8x504xbf16, #tpu.memory_space<vmem>>, %arg2: memref<504x24xbf16, #tpu.memory_space<vmem>>, %arg3: memref<1x24xf32, #tpu.memory_space<vmem>>, %arg4: memref<8x24xbf16, #tpu.memory_space<vmem>>) attributes {dimension_semantics = [#tpu.dimension_semantics<parallel>], iteration_bounds = array<i64: 1>, scalar_prefetch = 0 : i64, scratch_operands = 0 : i64, tpu.core_type = #tpu.core_type<tc>, window_params = [{transform_indices = @transform_0, window_bounds = array<i64: 8, 504>}, {pipeline_mode = #tpu.pipeline_mode<synchronous>, transform_indices = @transform_1, window_bounds = array<i64: 504, 24>}, {pipeline_mode = #tpu.pipeline_mode<synchronous>, transform_indices = @transform_2, window_bounds = array<i64: 1, 24>}, {transform_indices = @transform_3, window_bounds = array<i64: 8, 24>}]} {
    %c0 = arith.constant 0 : index
    %c0_0 = arith.constant 0 : index
    %0 = vector.load %arg1[%c0, %c0_0] : memref<8x504xbf16, #tpu.memory_space<vmem>>, vector<8x504xbf16>
    %c0_1 = arith.constant 0 : index
    %c0_2 = arith.constant 0 : index
    %1 = vector.load %arg2[%c0_1, %c0_2] : memref<504x24xbf16, #tpu.memory_space<vmem>>, vector<504x24xbf16>
    %cst = arith.constant dense<0.000000e+00> : vector<8x24xf32>
    %2 = tpu.matmul %0, %1, %cst {dimension_numbers = #tpu.dot_dimension_numbers<[1], [0], [0], [1], [0, 0, 1, 1], [], []>} : vector<8x504xbf16>, vector<504x24xbf16>, vector<8x24xf32> -> vector<8x24xf32>
    %c0_3 = arith.constant 0 : index
    %c0_4 = arith.constant 0 : index
    %3 = vector.load %arg3[%c0_3, %c0_4] : memref<1x24xf32, #tpu.memory_space<vmem>>, vector<1x24xf32>
    %4 = vector.broadcast %3 : vector<1x24xf32> to vector<8x24xf32>
    %5 = arith.addf %2, %4 : vector<8x24xf32>
    %cst_5 = arith.constant 0.000000e+00 : f32
    %6 = vector.broadcast %cst_5 : f32 to vector<8x24xf32>
    %7 = arith.maximumf %5, %6 : vector<8x24xf32>
    %8 = arith.truncf %7 : vector<8x24xf32> to vector<8x24xbf16>
    %c0_6 = arith.constant 0 : index
    %c0_7 = arith.constant 0 : index
    %9 = vector.load %arg4[%c0_6, %c0_7] : memref<8x24xbf16, #tpu.memory_space<vmem>>, vector<8x24xbf16>
    tpu.vector_store %arg4[%c0_6, %c0_7], %8 {strides = array<i32>} : memref<8x24xbf16, #tpu.memory_space<vmem>>, vector<8x24xbf16>,
    return
  }
  func.func @transform_0(%arg0: i32) -> (i32, i32) {
    %c0_i32 = arith.constant 0 : i32
    %c0_i32_0 = arith.constant 0 : i32
    return %arg0, %c0_i32 : i32, i32
  }
  func.func @transform_1(%arg0: i32) -> (i32, i32) {
    %c0_i32 = arith.constant 0 : i32
    %c0_i32_0 = arith.constant 0 : i32
    %c0_i32_1 = arith.constant 0 : i32
    return %c0_i32, %c0_i32_0 : i32, i32
  }
  func.func @transform_2(%arg0: i32) -> (i32, i32) {
    %c0_i32 = arith.constant 0 : i32
    %c0_i32_0 = arith.constant 0 : i32
    %c0_i32_1 = arith.constant 0 : i32
    return %c0_i32, %c0_i32_0 : i32, i32
  }
  func.func @transform_3(%arg0: i32) -> (i32, i32) {
    %c0_i32 = arith.constant 0 : i32
    %c0_i32_0 = arith.constant 0 : i32
    return %arg0, %c0_i32 : i32, i32
  }
}

module attributes {stable_mosaic.version = 11 : i64} {
  func.func @_matmul_bias_act_kernel(%arg0: i32, %arg1: memref<8x216xbf16, #tpu.memory_space<vmem>>, %arg2: memref<216x48xbf16, #tpu.memory_space<vmem>>, %arg3: memref<1x48xf32, #tpu.memory_space<vmem>>, %arg4: memref<8x24xbf16, #tpu.memory_space<vmem>>) attributes {dimension_semantics = [#tpu.dimension_semantics<parallel>], iteration_bounds = array<i64: 1>, scalar_prefetch = 0 : i64, scratch_operands = 0 : i64, tpu.core_type = #tpu.core_type<tc>, window_params = [{transform_indices = @transform_0, window_bounds = array<i64: 8, 216>}, {pipeline_mode = #tpu.pipeline_mode<synchronous>, transform_indices = @transform_1, window_bounds = array<i64: 216, 48>}, {pipeline_mode = #tpu.pipeline_mode<synchronous>, transform_indices = @transform_2, window_bounds = array<i64: 1, 48>}, {transform_indices = @transform_3, window_bounds = array<i64: 8, 24>}]} {
    %c0 = arith.constant 0 : index
    %c0_0 = arith.constant 0 : index
    %0 = vector.load %arg1[%c0, %c0_0] : memref<8x216xbf16, #tpu.memory_space<vmem>>, vector<8x216xbf16>
    %c0_1 = arith.constant 0 : index
    %c0_2 = arith.constant 0 : index
    %1 = vector.load %arg2[%c0_1, %c0_2] : memref<216x48xbf16, #tpu.memory_space<vmem>>, vector<216x48xbf16>
    %cst = arith.constant dense<0.000000e+00> : vector<8x48xf32>
    %2 = tpu.matmul %0, %1, %cst {dimension_numbers = #tpu.dot_dimension_numbers<[1], [0], [0], [1], [0, 0, 1, 1], [], []>} : vector<8x216xbf16>, vector<216x48xbf16>, vector<8x48xf32> -> vector<8x48xf32>
    %c0_3 = arith.constant 0 : index
    %c0_4 = arith.constant 0 : index
    %3 = vector.load %arg3[%c0_3, %c0_4] : memref<1x48xf32, #tpu.memory_space<vmem>>, vector<1x48xf32>
    %4 = vector.broadcast %3 : vector<1x48xf32> to vector<8x48xf32>
    %5 = arith.addf %2, %4 : vector<8x48xf32>
    %6 = vector.extract_strided_slice %5 {offsets = [0, 0], sizes = [8, 24], strides = [1, 1]} : vector<8x48xf32> to vector<8x24xf32>
    %7 = arith.negf %6 : vector<8x24xf32>
    %8 = math.exp %7 : vector<8x24xf32>
    %cst_5 = arith.constant 1.000000e+00 : f32
    %9 = vector.broadcast %cst_5 : f32 to vector<8x24xf32>
    %10 = arith.addf %9, %8 : vector<8x24xf32>
    %11 = arith.divf %9, %10 : vector<8x24xf32>
    %12 = vector.extract_strided_slice %5 {offsets = [0, 24], sizes = [8, 24], strides = [1, 1]} : vector<8x48xf32> to vector<8x24xf32>
    %13 = math.tanh %12 : vector<8x24xf32>
    %cst_6 = arith.constant 1.000000e+00 : f32
    %14 = vector.broadcast %cst_6 : f32 to vector<8x24xf32>
    %15 = arith.subf %14, %11 : vector<8x24xf32>
    %16 = arith.mulf %15, %13 : vector<8x24xf32>
    %17 = arith.truncf %16 : vector<8x24xf32> to vector<8x24xbf16>
    %c0_7 = arith.constant 0 : index
    %c0_8 = arith.constant 0 : index
    %18 = vector.load %arg4[%c0_7, %c0_8] : memref<8x24xbf16, #tpu.memory_space<vmem>>, vector<8x24xbf16>
    tpu.vector_store %arg4[%c0_7, %c0_8], %17 {strides = array<i32>} : memref<8x24xbf16, #tpu.memory_space<vmem>>, vector<8x24xbf16>,
    return
  }
  func.func @transform_0(%arg0: i32) -> (i32, i32) {
    %c0_i32 = arith.constant 0 : i32
    %c0_i32_0 = arith.constant 0 : i32
    return %arg0, %c0_i32 : i32, i32
  }
  func.func @transform_1(%arg0: i32) -> (i32, i32) {
    %c0_i32 = arith.constant 0 : i32
    %c0_i32_0 = arith.constant 0 : i32
    %c0_i32_1 = arith.constant 0 : i32
    return %c0_i32, %c0_i32_0 : i32, i32
  }
  func.func @transform_2(%arg0: i32) -> (i32, i32) {
    %c0_i32 = arith.constant 0 : i32
    %c0_i32_0 = arith.constant 0 : i32
    %c0_i32_1 = arith.constant 0 : i32
    return %c0_i32, %c0_i32_0 : i32, i32
  }
  func.func @transform_3(%arg0: i32) -> (i32, i32) {
    %c0_i32 = arith.constant 0 : i32
    %c0_i32_0 = arith.constant 0 : i32
    return %arg0, %c0_i32 : i32, i32
  }
}

module attributes {stable_mosaic.version = 11 : i64} {
  func.func @_matmul_bias_act_kernel(%arg0: i32, %arg1: memref<16x360xbf16, #tpu.memory_space<vmem>>, %arg2: memref<360x16xbf16, #tpu.memory_space<vmem>>, %arg3: memref<1x16xf32, #tpu.memory_space<vmem>>, %arg4: memref<16x16xbf16, #tpu.memory_space<vmem>>) attributes {dimension_semantics = [#tpu.dimension_semantics<parallel>], iteration_bounds = array<i64: 1>, scalar_prefetch = 0 : i64, scratch_operands = 0 : i64, tpu.core_type = #tpu.core_type<tc>, window_params = [{transform_indices = @transform_0, window_bounds = array<i64: 16, 360>}, {pipeline_mode = #tpu.pipeline_mode<synchronous>, transform_indices = @transform_1, window_bounds = array<i64: 360, 16>}, {pipeline_mode = #tpu.pipeline_mode<synchronous>, transform_indices = @transform_2, window_bounds = array<i64: 1, 16>}, {transform_indices = @transform_3, window_bounds = array<i64: 16, 16>}]} {
    %c0 = arith.constant 0 : index
    %c0_0 = arith.constant 0 : index
    %0 = vector.load %arg1[%c0, %c0_0] : memref<16x360xbf16, #tpu.memory_space<vmem>>, vector<16x360xbf16>
    %c0_1 = arith.constant 0 : index
    %c0_2 = arith.constant 0 : index
    %1 = vector.load %arg2[%c0_1, %c0_2] : memref<360x16xbf16, #tpu.memory_space<vmem>>, vector<360x16xbf16>
    %cst = arith.constant dense<0.000000e+00> : vector<16x16xf32>
    %2 = tpu.matmul %0, %1, %cst {dimension_numbers = #tpu.dot_dimension_numbers<[1], [0], [0], [1], [0, 0, 1, 1], [], []>} : vector<16x360xbf16>, vector<360x16xbf16>, vector<16x16xf32> -> vector<16x16xf32>
    %c0_3 = arith.constant 0 : index
    %c0_4 = arith.constant 0 : index
    %3 = vector.load %arg3[%c0_3, %c0_4] : memref<1x16xf32, #tpu.memory_space<vmem>>, vector<1x16xf32>
    %4 = vector.broadcast %3 : vector<1x16xf32> to vector<16x16xf32>
    %5 = arith.addf %2, %4 : vector<16x16xf32>
    %cst_5 = arith.constant 0.000000e+00 : f32
    %6 = vector.broadcast %cst_5 : f32 to vector<16x16xf32>
    %7 = arith.maximumf %5, %6 : vector<16x16xf32>
    %8 = arith.truncf %7 : vector<16x16xf32> to vector<16x16xbf16>
    %c0_6 = arith.constant 0 : index
    %c0_7 = arith.constant 0 : index
    %9 = vector.load %arg4[%c0_6, %c0_7] : memref<16x16xbf16, #tpu.memory_space<vmem>>, vector<16x16xbf16>
    tpu.vector_store %arg4[%c0_6, %c0_7], %8 {strides = array<i32>} : memref<16x16xbf16, #tpu.memory_space<vmem>>, vector<16x16xbf16>,
    return
  }
  func.func @transform_0(%arg0: i32) -> (i32, i32) {
    %c0_i32 = arith.constant 0 : i32
    %c0_i32_0 = arith.constant 0 : i32
    return %arg0, %c0_i32 : i32, i32
  }
  func.func @transform_1(%arg0: i32) -> (i32, i32) {
    %c0_i32 = arith.constant 0 : i32
    %c0_i32_0 = arith.constant 0 : i32
    %c0_i32_1 = arith.constant 0 : i32
    return %c0_i32, %c0_i32_0 : i32, i32
  }
  func.func @transform_2(%arg0: i32) -> (i32, i32) {
    %c0_i32 = arith.constant 0 : i32
    %c0_i32_0 = arith.constant 0 : i32
    %c0_i32_1 = arith.constant 0 : i32
    return %c0_i32, %c0_i32_0 : i32, i32
  }
  func.func @transform_3(%arg0: i32) -> (i32, i32) {
    %c0_i32 = arith.constant 0 : i32
    %c0_i32_0 = arith.constant 0 : i32
    return %arg0, %c0_i32 : i32, i32
  }
}

module attributes {stable_mosaic.version = 11 : i64} {
  func.func @_matmul_bias_act_kernel(%arg0: i32, %arg1: memref<16x144xbf16, #tpu.memory_space<vmem>>, %arg2: memref<144x32xbf16, #tpu.memory_space<vmem>>, %arg3: memref<1x32xf32, #tpu.memory_space<vmem>>, %arg4: memref<16x16xbf16, #tpu.memory_space<vmem>>) attributes {dimension_semantics = [#tpu.dimension_semantics<parallel>], iteration_bounds = array<i64: 1>, scalar_prefetch = 0 : i64, scratch_operands = 0 : i64, tpu.core_type = #tpu.core_type<tc>, window_params = [{transform_indices = @transform_0, window_bounds = array<i64: 16, 144>}, {pipeline_mode = #tpu.pipeline_mode<synchronous>, transform_indices = @transform_1, window_bounds = array<i64: 144, 32>}, {pipeline_mode = #tpu.pipeline_mode<synchronous>, transform_indices = @transform_2, window_bounds = array<i64: 1, 32>}, {transform_indices = @transform_3, window_bounds = array<i64: 16, 16>}]} {
    %c0 = arith.constant 0 : index
    %c0_0 = arith.constant 0 : index
    %0 = vector.load %arg1[%c0, %c0_0] : memref<16x144xbf16, #tpu.memory_space<vmem>>, vector<16x144xbf16>
    %c0_1 = arith.constant 0 : index
    %c0_2 = arith.constant 0 : index
    %1 = vector.load %arg2[%c0_1, %c0_2] : memref<144x32xbf16, #tpu.memory_space<vmem>>, vector<144x32xbf16>
    %cst = arith.constant dense<0.000000e+00> : vector<16x32xf32>
    %2 = tpu.matmul %0, %1, %cst {dimension_numbers = #tpu.dot_dimension_numbers<[1], [0], [0], [1], [0, 0, 1, 1], [], []>} : vector<16x144xbf16>, vector<144x32xbf16>, vector<16x32xf32> -> vector<16x32xf32>
    %c0_3 = arith.constant 0 : index
    %c0_4 = arith.constant 0 : index
    %3 = vector.load %arg3[%c0_3, %c0_4] : memref<1x32xf32, #tpu.memory_space<vmem>>, vector<1x32xf32>
    %4 = vector.broadcast %3 : vector<1x32xf32> to vector<16x32xf32>
    %5 = arith.addf %2, %4 : vector<16x32xf32>
    %6 = vector.extract_strided_slice %5 {offsets = [0, 0], sizes = [16, 16], strides = [1, 1]} : vector<16x32xf32> to vector<16x16xf32>
    %7 = arith.negf %6 : vector<16x16xf32>
    %8 = math.exp %7 : vector<16x16xf32>
    %cst_5 = arith.constant 1.000000e+00 : f32
    %9 = vector.broadcast %cst_5 : f32 to vector<16x16xf32>
    %10 = arith.addf %9, %8 : vector<16x16xf32>
    %11 = arith.divf %9, %10 : vector<16x16xf32>
    %12 = vector.extract_strided_slice %5 {offsets = [0, 16], sizes = [16, 16], strides = [1, 1]} : vector<16x32xf32> to vector<16x16xf32>
    %13 = math.tanh %12 : vector<16x16xf32>
    %cst_6 = arith.constant 1.000000e+00 : f32
    %14 = vector.broadcast %cst_6 : f32 to vector<16x16xf32>
    %15 = arith.subf %14, %11 : vector<16x16xf32>
    %16 = arith.mulf %15, %13 : vector<16x16xf32>
    %17 = arith.truncf %16 : vector<16x16xf32> to vector<16x16xbf16>
    %c0_7 = arith.constant 0 : index
    %c0_8 = arith.constant 0 : index
    %18 = vector.load %arg4[%c0_7, %c0_8] : memref<16x16xbf16, #tpu.memory_space<vmem>>, vector<16x16xbf16>
    tpu.vector_store %arg4[%c0_7, %c0_8], %17 {strides = array<i32>} : memref<16x16xbf16, #tpu.memory_space<vmem>>, vector<16x16xbf16>,
    return
  }
  func.func @transform_0(%arg0: i32) -> (i32, i32) {
    %c0_i32 = arith.constant 0 : i32
    %c0_i32_0 = arith.constant 0 : i32
    return %arg0, %c0_i32 : i32, i32
  }
  func.func @transform_1(%arg0: i32) -> (i32, i32) {
    %c0_i32 = arith.constant 0 : i32
    %c0_i32_0 = arith.constant 0 : i32
    %c0_i32_1 = arith.constant 0 : i32
    return %c0_i32, %c0_i32_0 : i32, i32
  }
  func.func @transform_2(%arg0: i32) -> (i32, i32) {
    %c0_i32 = arith.constant 0 : i32
    %c0_i32_0 = arith.constant 0 : i32
    %c0_i32_1 = arith.constant 0 : i32
    return %c0_i32, %c0_i32_0 : i32, i32
  }
  func.func @transform_3(%arg0: i32) -> (i32, i32) {
    %c0_i32 = arith.constant 0 : i32
    %c0_i32_0 = arith.constant 0 : i32
    return %arg0, %c0_i32 : i32, i32
  }
}

module attributes {stable_mosaic.version = 11 : i64} {
  func.func @_matmul_bias_act_kernel(%arg0: i32, %arg1: memref<64x216xbf16, #tpu.memory_space<vmem>>, %arg2: memref<216x8xbf16, #tpu.memory_space<vmem>>, %arg3: memref<1x8xf32, #tpu.memory_space<vmem>>, %arg4: memref<64x8xbf16, #tpu.memory_space<vmem>>) attributes {dimension_semantics = [#tpu.dimension_semantics<parallel>], iteration_bounds = array<i64: 1>, scalar_prefetch = 0 : i64, scratch_operands = 0 : i64, tpu.core_type = #tpu.core_type<tc>, window_params = [{transform_indices = @transform_0, window_bounds = array<i64: 64, 216>}, {pipeline_mode = #tpu.pipeline_mode<synchronous>, transform_indices = @transform_1, window_bounds = array<i64: 216, 8>}, {pipeline_mode = #tpu.pipeline_mode<synchronous>, transform_indices = @transform_2, window_bounds = array<i64: 1, 8>}, {transform_indices = @transform_3, window_bounds = array<i64: 64, 8>}]} {
    %c0 = arith.constant 0 : index
    %c0_0 = arith.constant 0 : index
    %0 = vector.load %arg1[%c0, %c0_0] : memref<64x216xbf16, #tpu.memory_space<vmem>>, vector<64x216xbf16>
    %c0_1 = arith.constant 0 : index
    %c0_2 = arith.constant 0 : index
    %1 = vector.load %arg2[%c0_1, %c0_2] : memref<216x8xbf16, #tpu.memory_space<vmem>>, vector<216x8xbf16>
    %cst = arith.constant dense<0.000000e+00> : vector<64x8xf32>
    %2 = tpu.matmul %0, %1, %cst {dimension_numbers = #tpu.dot_dimension_numbers<[1], [0], [0], [1], [0, 0, 1, 1], [], []>} : vector<64x216xbf16>, vector<216x8xbf16>, vector<64x8xf32> -> vector<64x8xf32>
    %c0_3 = arith.constant 0 : index
    %c0_4 = arith.constant 0 : index
    %3 = vector.load %arg3[%c0_3, %c0_4] : memref<1x8xf32, #tpu.memory_space<vmem>>, vector<1x8xf32>
    %4 = vector.broadcast %3 : vector<1x8xf32> to vector<64x8xf32>
    %5 = arith.addf %2, %4 : vector<64x8xf32>
    %cst_5 = arith.constant 0.000000e+00 : f32
    %6 = vector.broadcast %cst_5 : f32 to vector<64x8xf32>
    %7 = arith.maximumf %5, %6 : vector<64x8xf32>
    %8 = arith.truncf %7 : vector<64x8xf32> to vector<64x8xbf16>
    %c0_6 = arith.constant 0 : index
    %c0_7 = arith.constant 0 : index
    %9 = vector.load %arg4[%c0_6, %c0_7] : memref<64x8xbf16, #tpu.memory_space<vmem>>, vector<64x8xbf16>
    tpu.vector_store %arg4[%c0_6, %c0_7], %8 {strides = array<i32>} : memref<64x8xbf16, #tpu.memory_space<vmem>>, vector<64x8xbf16>,
    return
  }
  func.func @transform_0(%arg0: i32) -> (i32, i32) {
    %c0_i32 = arith.constant 0 : i32
    %c0_i32_0 = arith.constant 0 : i32
    return %arg0, %c0_i32 : i32, i32
  }
  func.func @transform_1(%arg0: i32) -> (i32, i32) {
    %c0_i32 = arith.constant 0 : i32
    %c0_i32_0 = arith.constant 0 : i32
    %c0_i32_1 = arith.constant 0 : i32
    return %c0_i32, %c0_i32_0 : i32, i32
  }
  func.func @transform_2(%arg0: i32) -> (i32, i32) {
    %c0_i32 = arith.constant 0 : i32
    %c0_i32_0 = arith.constant 0 : i32
    %c0_i32_1 = arith.constant 0 : i32
    return %c0_i32, %c0_i32_0 : i32, i32
  }
  func.func @transform_3(%arg0: i32) -> (i32, i32) {
    %c0_i32 = arith.constant 0 : i32
    %c0_i32_0 = arith.constant 0 : i32
    return %arg0, %c0_i32 : i32, i32
  }
}

module attributes {stable_mosaic.version = 11 : i64} {
  func.func @_matmul_bias_act_kernel(%arg0: i32, %arg1: memref<64x72xbf16, #tpu.memory_space<vmem>>, %arg2: memref<72x16xbf16, #tpu.memory_space<vmem>>, %arg3: memref<1x16xf32, #tpu.memory_space<vmem>>, %arg4: memref<64x8xbf16, #tpu.memory_space<vmem>>) attributes {dimension_semantics = [#tpu.dimension_semantics<parallel>], iteration_bounds = array<i64: 1>, scalar_prefetch = 0 : i64, scratch_operands = 0 : i64, tpu.core_type = #tpu.core_type<tc>, window_params = [{transform_indices = @transform_0, window_bounds = array<i64: 64, 72>}, {pipeline_mode = #tpu.pipeline_mode<synchronous>, transform_indices = @transform_1, window_bounds = array<i64: 72, 16>}, {pipeline_mode = #tpu.pipeline_mode<synchronous>, transform_indices = @transform_2, window_bounds = array<i64: 1, 16>}, {transform_indices = @transform_3, window_bounds = array<i64: 64, 8>}]} {
    %c0 = arith.constant 0 : index
    %c0_0 = arith.constant 0 : index
    %0 = vector.load %arg1[%c0, %c0_0] : memref<64x72xbf16, #tpu.memory_space<vmem>>, vector<64x72xbf16>
    %c0_1 = arith.constant 0 : index
    %c0_2 = arith.constant 0 : index
    %1 = vector.load %arg2[%c0_1, %c0_2] : memref<72x16xbf16, #tpu.memory_space<vmem>>, vector<72x16xbf16>
    %cst = arith.constant dense<0.000000e+00> : vector<64x16xf32>
    %2 = tpu.matmul %0, %1, %cst {dimension_numbers = #tpu.dot_dimension_numbers<[1], [0], [0], [1], [0, 0, 1, 1], [], []>} : vector<64x72xbf16>, vector<72x16xbf16>, vector<64x16xf32> -> vector<64x16xf32>
    %c0_3 = arith.constant 0 : index
    %c0_4 = arith.constant 0 : index
    %3 = vector.load %arg3[%c0_3, %c0_4] : memref<1x16xf32, #tpu.memory_space<vmem>>, vector<1x16xf32>
    %4 = vector.broadcast %3 : vector<1x16xf32> to vector<64x16xf32>
    %5 = arith.addf %2, %4 : vector<64x16xf32>
    %6 = vector.extract_strided_slice %5 {offsets = [0, 0], sizes = [64, 8], strides = [1, 1]} : vector<64x16xf32> to vector<64x8xf32>
    %7 = arith.negf %6 : vector<64x8xf32>
    %8 = math.exp %7 : vector<64x8xf32>
    %cst_5 = arith.constant 1.000000e+00 : f32
    %9 = vector.broadcast %cst_5 : f32 to vector<64x8xf32>
    %10 = arith.addf %9, %8 : vector<64x8xf32>
    %11 = arith.divf %9, %10 : vector<64x8xf32>
    %12 = vector.extract_strided_slice %5 {offsets = [0, 8], sizes = [64, 8], strides = [1, 1]} : vector<64x16xf32> to vector<64x8xf32>
    %13 = math.tanh %12 : vector<64x8xf32>
    %cst_6 = arith.constant 1.000000e+00 : f32
    %14 = vector.broadcast %cst_6 : f32 to vector<64x8xf32>
    %15 = arith.subf %14, %11 : vector<64x8xf32>
    %16 = arith.mulf %15, %13 : vector<64x8xf32>
    %17 = arith.truncf %16 : vector<64x8xf32> to vector<64x8xbf16>
    %c0_7 = arith.constant 0 : index
    %c0_8 = arith.constant 0 : index
    %18 = vector.load %arg4[%c0_7, %c0_8] : memref<64x8xbf16, #tpu.memory_space<vmem>>, vector<64x8xbf16>
    tpu.vector_store %arg4[%c0_7, %c0_8], %17 {strides = array<i32>} : memref<64x8xbf16, #tpu.memory_space<vmem>>, vector<64x8xbf16>,
    return
  }
  func.func @transform_0(%arg0: i32) -> (i32, i32) {
    %c0_i32 = arith.constant 0 : i32
    %c0_i32_0 = arith.constant 0 : i32
    return %arg0, %c0_i32 : i32, i32
  }
  func.func @transform_1(%arg0: i32) -> (i32, i32) {
    %c0_i32 = arith.constant 0 : i32
    %c0_i32_0 = arith.constant 0 : i32
    %c0_i32_1 = arith.constant 0 : i32
    return %c0_i32, %c0_i32_0 : i32, i32
  }
  func.func @transform_2(%arg0: i32) -> (i32, i32) {
    %c0_i32 = arith.constant 0 : i32
    %c0_i32_0 = arith.constant 0 : i32
    %c0_i32_1 = arith.constant 0 : i32
    return %c0_i32, %c0_i32_0 : i32, i32
  }
  func.func @transform_3(%arg0: i32) -> (i32, i32) {
    %c0_i32 = arith.constant 0 : i32
    %c0_i32_0 = arith.constant 0 : i32
    return %arg0, %c0_i32 : i32, i32
  }
}

module attributes {stable_mosaic.version = 11 : i64} {
  func.func @_matmul_bias_act_kernel(%arg0: i32, %arg1: memref<256x99xbf16, #tpu.memory_space<vmem>>, %arg2: memref<99x8xbf16, #tpu.memory_space<vmem>>, %arg3: memref<1x8xf32, #tpu.memory_space<vmem>>, %arg4: memref<256x8xbf16, #tpu.memory_space<vmem>>) attributes {dimension_semantics = [#tpu.dimension_semantics<parallel>], iteration_bounds = array<i64: 1>, scalar_prefetch = 0 : i64, scratch_operands = 0 : i64, tpu.core_type = #tpu.core_type<tc>, window_params = [{transform_indices = @transform_0, window_bounds = array<i64: 256, 99>}, {pipeline_mode = #tpu.pipeline_mode<synchronous>, transform_indices = @transform_1, window_bounds = array<i64: 99, 8>}, {pipeline_mode = #tpu.pipeline_mode<synchronous>, transform_indices = @transform_2, window_bounds = array<i64: 1, 8>}, {transform_indices = @transform_3, window_bounds = array<i64: 256, 8>}]} {
    %c0 = arith.constant 0 : index
    %c0_0 = arith.constant 0 : index
    %0 = vector.load %arg1[%c0, %c0_0] : memref<256x99xbf16, #tpu.memory_space<vmem>>, vector<256x99xbf16>
    %c0_1 = arith.constant 0 : index
    %c0_2 = arith.constant 0 : index
    %1 = vector.load %arg2[%c0_1, %c0_2] : memref<99x8xbf16, #tpu.memory_space<vmem>>, vector<99x8xbf16>
    %cst = arith.constant dense<0.000000e+00> : vector<256x8xf32>
    %2 = tpu.matmul %0, %1, %cst {dimension_numbers = #tpu.dot_dimension_numbers<[1], [0], [0], [1], [0, 0, 1, 1], [], []>} : vector<256x99xbf16>, vector<99x8xbf16>, vector<256x8xf32> -> vector<256x8xf32>
    %c0_3 = arith.constant 0 : index
    %c0_4 = arith.constant 0 : index
    %3 = vector.load %arg3[%c0_3, %c0_4] : memref<1x8xf32, #tpu.memory_space<vmem>>, vector<1x8xf32>
    %4 = vector.broadcast %3 : vector<1x8xf32> to vector<256x8xf32>
    %5 = arith.addf %2, %4 : vector<256x8xf32>
    %cst_5 = arith.constant 0.000000e+00 : f32
    %6 = vector.broadcast %cst_5 : f32 to vector<256x8xf32>
    %7 = arith.maximumf %5, %6 : vector<256x8xf32>
    %8 = arith.truncf %7 : vector<256x8xf32> to vector<256x8xbf16>
    %c0_6 = arith.constant 0 : index
    %c0_7 = arith.constant 0 : index
    %9 = vector.load %arg4[%c0_6, %c0_7] : memref<256x8xbf16, #tpu.memory_space<vmem>>, vector<256x8xbf16>
    tpu.vector_store %arg4[%c0_6, %c0_7], %8 {strides = array<i32>} : memref<256x8xbf16, #tpu.memory_space<vmem>>, vector<256x8xbf16>,
    return
  }
  func.func @transform_0(%arg0: i32) -> (i32, i32) {
    %c0_i32 = arith.constant 0 : i32
    %c0_i32_0 = arith.constant 0 : i32
    return %arg0, %c0_i32 : i32, i32
  }
  func.func @transform_1(%arg0: i32) -> (i32, i32) {
    %c0_i32 = arith.constant 0 : i32
    %c0_i32_0 = arith.constant 0 : i32
    %c0_i32_1 = arith.constant 0 : i32
    return %c0_i32, %c0_i32_0 : i32, i32
  }
  func.func @transform_2(%arg0: i32) -> (i32, i32) {
    %c0_i32 = arith.constant 0 : i32
    %c0_i32_0 = arith.constant 0 : i32
    %c0_i32_1 = arith.constant 0 : i32
    return %c0_i32, %c0_i32_0 : i32, i32
  }
  func.func @transform_3(%arg0: i32) -> (i32, i32) {
    %c0_i32 = arith.constant 0 : i32
    %c0_i32_0 = arith.constant 0 : i32
    return %arg0, %c0_i32 : i32, i32
  }
}

module attributes {stable_mosaic.version = 11 : i64} {
  func.func @_dec_head_kernel(%arg0: i32, %arg1: memref<256x72xbf16, #tpu.memory_space<vmem>>, %arg2: memref<72x8xbf16, #tpu.memory_space<vmem>>, %arg3: memref<1x8xf32, #tpu.memory_space<vmem>>, %arg4: memref<8x1xbf16, #tpu.memory_space<vmem>>, %arg5: memref<1x1xf32, #tpu.memory_space<vmem>>, %arg6: memref<256x1xf32, #tpu.memory_space<vmem>>) attributes {dimension_semantics = [#tpu.dimension_semantics<parallel>], iteration_bounds = array<i64: 1>, scalar_prefetch = 0 : i64, scratch_operands = 0 : i64, tpu.core_type = #tpu.core_type<tc>, window_params = [{transform_indices = @transform_0, window_bounds = array<i64: 256, 72>}, {pipeline_mode = #tpu.pipeline_mode<synchronous>, transform_indices = @transform_1, window_bounds = array<i64: 72, 8>}, {pipeline_mode = #tpu.pipeline_mode<synchronous>, transform_indices = @transform_2, window_bounds = array<i64: 1, 8>}, {pipeline_mode = #tpu.pipeline_mode<synchronous>, transform_indices = @transform_3, window_bounds = array<i64: 8, 1>}, {pipeline_mode = #tpu.pipeline_mode<synchronous>, transform_indices = @transform_4, window_bounds = array<i64: 1, 1>}, {transform_indices = @transform_5, window_bounds = array<i64: 256, 1>}]} {
    %c0 = arith.constant 0 : index
    %c0_0 = arith.constant 0 : index
    %0 = vector.load %arg1[%c0, %c0_0] : memref<256x72xbf16, #tpu.memory_space<vmem>>, vector<256x72xbf16>
    %c0_1 = arith.constant 0 : index
    %c0_2 = arith.constant 0 : index
    %1 = vector.load %arg2[%c0_1, %c0_2] : memref<72x8xbf16, #tpu.memory_space<vmem>>, vector<72x8xbf16>
    %cst = arith.constant dense<0.000000e+00> : vector<256x8xf32>
    %2 = tpu.matmul %0, %1, %cst {dimension_numbers = #tpu.dot_dimension_numbers<[1], [0], [0], [1], [0, 0, 1, 1], [], []>} : vector<256x72xbf16>, vector<72x8xbf16>, vector<256x8xf32> -> vector<256x8xf32>
    %c0_3 = arith.constant 0 : index
    %c0_4 = arith.constant 0 : index
    %3 = vector.load %arg3[%c0_3, %c0_4] : memref<1x8xf32, #tpu.memory_space<vmem>>, vector<1x8xf32>
    %4 = vector.broadcast %3 : vector<1x8xf32> to vector<256x8xf32>
    %5 = arith.addf %2, %4 : vector<256x8xf32>
    %cst_5 = arith.constant 0.000000e+00 : f32
    %6 = vector.broadcast %cst_5 : f32 to vector<256x8xf32>
    %7 = arith.maximumf %5, %6 : vector<256x8xf32>
    %8 = arith.truncf %7 : vector<256x8xf32> to vector<256x8xbf16>
    %c0_6 = arith.constant 0 : index
    %c0_7 = arith.constant 0 : index
    %9 = vector.load %arg4[%c0_6, %c0_7] : memref<8x1xbf16, #tpu.memory_space<vmem>>, vector<8x1xbf16>
    %cst_8 = arith.constant dense<0.000000e+00> : vector<256x1xf32>
    %10 = tpu.matmul %8, %9, %cst_8 {dimension_numbers = #tpu.dot_dimension_numbers<[1], [0], [0], [1], [0, 0, 1, 1], [], []>} : vector<256x8xbf16>, vector<8x1xbf16>, vector<256x1xf32> -> vector<256x1xf32>
    %c0_9 = arith.constant 0 : index
    %c0_10 = arith.constant 0 : index
    %11 = vector.load %arg5[%c0_9, %c0_10] : memref<1x1xf32, #tpu.memory_space<vmem>>, vector<1x1xf32>
    %12 = vector.broadcast %11 : vector<1x1xf32> to vector<256x1xf32>
    %13 = arith.addf %10, %12 : vector<256x1xf32>
    %cst_11 = arith.constant 0.000000e+00 : f32
    %cst_12 = arith.constant 1.000000e+00 : f32
    %14 = vector.broadcast %cst_11 : f32 to vector<256x1xf32>
    %15 = arith.maximumf %14, %13 : vector<256x1xf32>
    %16 = vector.broadcast %cst_12 : f32 to vector<256x1xf32>
    %17 = arith.minimumf %16, %15 : vector<256x1xf32>
    %c0_13 = arith.constant 0 : index
    %c0_14 = arith.constant 0 : index
    %18 = vector.load %arg6[%c0_13, %c0_14] : memref<256x1xf32, #tpu.memory_space<vmem>>, vector<256x1xf32>
    tpu.vector_store %arg6[%c0_13, %c0_14], %17 {strides = array<i32>} : memref<256x1xf32, #tpu.memory_space<vmem>>, vector<256x1xf32>,
    return
  }
  func.func @transform_0(%arg0: i32) -> (i32, i32) {
    %c0_i32 = arith.constant 0 : i32
    %c0_i32_0 = arith.constant 0 : i32
    return %arg0, %c0_i32 : i32, i32
  }
  func.func @transform_1(%arg0: i32) -> (i32, i32) {
    %c0_i32 = arith.constant 0 : i32
    %c0_i32_0 = arith.constant 0 : i32
    %c0_i32_1 = arith.constant 0 : i32
    return %c0_i32, %c0_i32_0 : i32, i32
  }
  func.func @transform_2(%arg0: i32) -> (i32, i32) {
    %c0_i32 = arith.constant 0 : i32
    %c0_i32_0 = arith.constant 0 : i32
    %c0_i32_1 = arith.constant 0 : i32
    return %c0_i32, %c0_i32_0 : i32, i32
  }
  func.func @transform_3(%arg0: i32) -> (i32, i32) {
    %c0_i32 = arith.constant 0 : i32
    %c0_i32_0 = arith.constant 0 : i32
    %c0_i32_1 = arith.constant 0 : i32
    return %c0_i32, %c0_i32_0 : i32, i32
  }
  func.func @transform_4(%arg0: i32) -> (i32, i32) {
    %c0_i32 = arith.constant 0 : i32
    %c0_i32_0 = arith.constant 0 : i32
    %c0_i32_1 = arith.constant 0 : i32
    return %c0_i32, %c0_i32_0 : i32, i32
  }
  func.func @transform_5(%arg0: i32) -> (i32, i32) {
    %c0_i32 = arith.constant 0 : i32
    %c0_i32_0 = arith.constant 0 : i32
    return %arg0, %c0_i32 : i32, i32
  }
}

</mosaic_0001>

<bundles_post_ra>
// kernel: _lambda_.15
= control target key start
LH: loop header
LB: loop body
LE: loop exit
PB: predicated region body
PF: predicated region fallthrough
CT: control target
= control target key end

     0   :  { %vm75_vm0 = vcmask 1044480   ;;  %vm76_vm1 = vcmask 1045504   ;;  %v182_v2 = vmov 65535   ;;  %vm62_vm2 = vcmask 220160   ;;  %s259_s1 = inlined_call_operand.vmem [shape: bf16[27,8], index: 1, kind: input, shape index: {}]   ;;  %s260_s2 = inlined_call_operand.vmem [shape: f32[1,8], index: 2, kind: input, shape index: {}]   ;;  %s261_s0 = inlined_call_operand.vmem [shape: bf16[64,27], index: 0, kind: input, shape index: {}]   ;;  %s262_s3 = inlined_call_operand.vmem [shape: bf16[64,8], index: 3, kind: output, shape index: {}]  }
   0x1   :  { %v162_v0 = vld [vmem:[%s259_s1 + $0x8] sm:$0xf]  ;;  %v173_v1 = vld [vmem:[%s259_s1 + $0x8] sm:$0x30]  ;;  %v77_v3 = vsel %vm75_vm0, 4294967295, %v182_v2  ;;  %v172_v7 = vld [vmem:[%s259_s1] sm:$0xff] }
   0x2   :  { %v163_v4 = vor.u32 %v173_v1, %v162_v0  ;;  %v78_v5 = vsel %vm76_vm1, %v77_v3, 0  ;;  %v168_v8 = vld [vmem:[%s261_s0] sm:$0xff]  ;;  %v169_v9 = vld [vmem:[%s261_s0 + $0x8] sm:$0xff]  ;;  %v170_v10 = vld [vmem:[%s261_s0 + $0x10] sm:$0xff]  ;;  %vm127_vm3 = vcmask 60416  }
   0x3   :  { %v171_v11 = vld [vmem:[%s261_s0 + $0x18] sm:$0xff]  ;;  %v181_v12 = vld [vmem:[%s260_s2] ss:$0 sm:$0xff] }
   0x4   :  { %v80_v6 = vand.u32 %v163_v4, %v78_v5 }
   0x6   :  { %88 = vmatpush.bf16.msra.mxu0 %v80_v6  ;;  %174 = vmatpush.bf16.msra.mxu1 %v80_v6 }
   0x7   :  { %175 = vmatpush.bf16.msra.mxu2 %v80_v6  ;;  %176 = vmatpush.bf16.msra.mxu3 %v80_v6 }
   0xa   :  { %89 = vmatpush.bf16.msra.mxu0 %v172_v7  ;;  %177 = vmatpush.bf16.msra.mxu1 %v172_v7 }
   0xb   :  { %178 = vmatpush.bf16.msra.mxu2 %v172_v7  ;;  %179 = vmatpush.bf16.msra.mxu3 %v172_v7 }
   0xd   :  { %164 = vmatmul.msk.bf16.vlgmr.msra.gmra.mxu0 %vm62_vm2, %v168_v8  ;;  %165 = vmatmul.msk.bf16.vlgmr.msra.gmra.mxu1 %vm62_vm2, %v169_v9 }
   0xe   :  { %166 = vmatmul.msk.bf16.vlgmr.msra.gmra.mxu2 %vm62_vm2, %v170_v10  ;;  %167 = vmatmul.msk.bf16.vlgmr.msra.gmra.mxu3 %vm62_vm2, %v171_v11 }
  0x8a   :  { %v91_v13 = vpop.f32.mrf.mxu0  ;;  %v96_v14 = vpop.f32.mrf.mxu1 }
  0x8b   :  { %v92_v15 = vadd.f32 %v181_v12, %v91_v13  ;;  %v97_v16 = vadd.f32 %v181_v12, %v96_v14 }
  0x8d   :  { %v111_v17 = vmax.f32 %v92_v15, 0.0  ;;  %v113_v18 = vmax.f32 %v97_v16, 0.0 }
  0x8f   :  { %v119_v19 = vpack.c.bf16 %v111_v17, %v111_v17  ;;  %v121_v20 = vpack.c.bf16 %v113_v18, %v113_v18 }
  0x91   :  { %128 = vst.msk [vmem:[%s262_s3] sm:$0xf] %vm127_vm3, %v119_v19  ;;  %v101_v21 = vpop.f32.mrf.mxu2  ;;  %v106_v22 = vpop.f32.mrf.mxu3 }
  0x92   :  { %130 = vst.msk [vmem:[%s262_s3 + $0x8] sm:$0xf] %vm127_vm3, %v121_v20  ;;  %v102_v23 = vadd.f32 %v181_v12, %v101_v21  ;;  %v107_v24 = vadd.f32 %v181_v12, %v106_v22  ;;  %v93_v25 = vpop.f32.mrf.mxu0  ;;  %v98_v26 = vpop.f32.mrf.mxu1 }
  0x93   :  { %v94_v27 = vadd.f32 %v181_v12, %v93_v25  ;;  %v99_v28 = vadd.f32 %v181_v12, %v98_v26 }
  0x94   :  { %v115_v29 = vmax.f32 %v102_v23, 0.0  ;;  %v117_v30 = vmax.f32 %v107_v24, 0.0 }
  0x95   :  { %v112_v31 = vmax.f32 %v94_v27, 0.0  ;;  %v114_v32 = vmax.f32 %v99_v28, 0.0 }
  0x96   :  { %v123_v33 = vpack.c.bf16 %v115_v29, %v115_v29  ;;  %v125_v34 = vpack.c.bf16 %v117_v30, %v117_v30 }
  0x97   :  { %v120_v35 = vpack.c.bf16 %v112_v31, %v112_v31  ;;  %v122_v36 = vpack.c.bf16 %v114_v32, %v114_v32 }
  0x98   :  { %132 = vst.msk [vmem:[%s262_s3 + $0x10] sm:$0xf] %vm127_vm3, %v123_v33 }
  0x99   :  { %134 = vst.msk [vmem:[%s262_s3 + $0x18] sm:$0xf] %vm127_vm3, %v125_v34  ;;  %v103_v37 = vpop.f32.mrf.mxu2  ;;  %v108_v38 = vpop.f32.mrf.mxu3 }
  0x9a   :  { %129 = vst.msk [vmem:[%s262_s3 + $0x4] sm:$0xf] %vm127_vm3, %v120_v35  ;;  %v104_v39 = vadd.f32 %v181_v12, %v103_v37  ;;  %v109_v40 = vadd.f32 %v181_v12, %v108_v38 }
  0x9b   :  { %131 = vst.msk [vmem:[%s262_s3 + $0xc] sm:$0xf] %vm127_vm3, %v122_v36 }
  0x9c   :  { %v116_v41 = vmax.f32 %v104_v39, 0.0  ;;  %v118_v42 = vmax.f32 %v109_v40, 0.0 }
  0x9e   :  { %v124_v43 = vpack.c.bf16 %v116_v41, %v116_v41  ;;  %v126_v44 = vpack.c.bf16 %v118_v42, %v118_v42 }
  0xa0   :  { %133 = vst.msk [vmem:[%s262_s3 + $0x14] sm:$0xf] %vm127_vm3, %v124_v43 }
  0xa1   :  { %135 = vst.msk [vmem:[%s262_s3 + $0x1c] sm:$0xf] %vm127_vm3, %v126_v44 }

// kernel: _lambda_.16
= control target key start
LH: loop header
LB: loop body
LE: loop exit
PB: predicated region body
PF: predicated region fallthrough
CT: control target
= control target key end

     0   :  { %vm66_vm0 = vcmask 1043456   ;;  %vm62_vm1 = vcmask 588800   ;;  %vm88_vm2 = vcmask 125952   ;;  %s169_s1 = inlined_call_operand.vmem [shape: bf16[72,16], index: 1, kind: input, shape index: {}]   ;;  %s170_s2 = inlined_call_operand.vmem [shape: f32[1,16], index: 2, kind: input, shape index: {}]   ;;  %s171_s0 = inlined_call_operand.vmem [shape: bf16[16,72], index: 0, kind: input, shape index: {}]   ;;  %s172_s3 = inlined_call_operand.vmem [shape: bf16[16,16], index: 3, kind: output, shape index: {}]  }
   0x1   :  { %v25_v0 = vld [vmem:[%s169_s1 + $0x20] sm:$0xf]  ;;  %v120_v4 = vld [vmem:[%s169_s1 + $0x18] sm:$0xff]  ;;  %v119_v5 = vld [vmem:[%s169_s1 + $0x10] sm:$0xff] }
   0x2   :  { %v52_v1 = vunpack.c.l.b16 %v25_v0  ;;  %v118_v6 = vld [vmem:[%s169_s1 + $0x8] sm:$0xff]  ;;  %v117_v7 = vld [vmem:[%s169_s1] sm:$0xff] }
   0x3   :  { %v116_v8 = vld [vmem:[%s171_s0] sm:$0xff] }
   0x4   :  { %v57_v2 = vpack.c.b16 %v52_v1, %v52_v1  ;;  %v121_v9 = vld [vmem:[%s170_s2] ss:$0 sm:$0xff] }
   0x6   :  { %v68_v3 = vsel %vm66_vm0, %v57_v2, 0 }
   0x7   :  { %73 = vmatpush.bf16.msra.mxu0 %v68_v3 }
   0xb   :  { %74 = vmatpush.bf16.msra.mxu0 %v120_v4 }
   0xf   :  { %75 = vmatpush.bf16.msra.mxu0 %v119_v5 }
  0x13   :  { %76 = vmatpush.bf16.msra.mxu0 %v118_v6 }
  0x17   :  { %77 = vmatpush.bf16.msra.mxu0 %v117_v7 }
  0x1a   :  { %115 = vmatmul.msk.bf16.vlgmr.msra.gmra.mxu0 %vm62_vm1, %v116_v8 }
  0x97   :  { %v79_v10 = vpop.f32.mrf.mxu0 }
  0x98   :  { %v80_v11 = vadd.f32 %v121_v9, %v79_v10 }
  0x9a   :  { %v84_v12 = vmax.f32 %v80_v11, 0.0 }
  0x9c   :  { %v86_v13 = vpack.c.bf16 %v84_v12, %v84_v12 }
  0x9e   :  { %89 = vst.msk [vmem:[%s172_s3] sm:$0xf] %vm88_vm2, %v86_v13 }
  0x9f   :  { %v81_v14 = vpop.f32.mrf.mxu0 }
  0xa0   :  { %v82_v15 = vadd.f32 %v121_v9, %v81_v14 }
  0xa2   :  { %v85_v16 = vmax.f32 %v82_v15, 0.0 }
  0xa4   :  { %v87_v17 = vpack.c.bf16 %v85_v16, %v85_v16 }
  0xa6   :  { %90 = vst.msk [vmem:[%s172_s3 + $0x4] sm:$0xf] %vm88_vm2, %v87_v17 }

// kernel: _lambda_.17
= control target key start
LH: loop header
LB: loop body
LE: loop exit
PB: predicated region body
PF: predicated region fallthrough
CT: control target
= control target key end

     0   :  { %vm98_vm0 = vcmask 130048   ;;  %vm130_vm1 = vcmask 191488   ;;  %s239_s1 = inlined_call_operand.vmem [shape: bf16[144,24], index: 1, kind: input, shape index: {}]   ;;  %s240_s0 = inlined_call_operand.vmem [shape: bf16[8,144], index: 0, kind: input, shape index: {}]   ;;  %s241_s2 = inlined_call_operand.vmem [shape: f32[1,24], index: 2, kind: input, shape index: {}]   ;;  %s242_s3 = inlined_call_operand.vmem [shape: bf16[8,24], index: 3, kind: output, shape index: {}]  }
   0x1   :  { %v180_v0 = vld [vmem:[%s239_s1 + $0x38] sm:$0xff]  ;;  %v179_v1 = vld [vmem:[%s239_s1 + $0x30] sm:$0xff]  ;;  %v181_v2 = vld [vmem:[%s239_s1 + $0x40] sm:$0xff] }
   0x2   :  { %102 = vmatpush.bf16.msra.mxu0 %v180_v0  ;;  %v15_v3 = vld [vmem:[%s240_s0] sm:$0xff]  ;;  %122 = vmatpush.bf16.msra.mxu1 %v181_v2  ;;  %v178_v6 = vld [vmem:[%s239_s1 + $0x28] sm:$0xff]  ;;  %v176_v8 = vld [vmem:[%s239_s1 + $0x18] sm:$0xff] }
   0x3   :  { %v40_v4 = vunpack.c.h.b16 %v15_v3  ;;  %v177_v7 = vld [vmem:[%s239_s1 + $0x20] sm:$0xff]  ;;  %v175_v9 = vld [vmem:[%s239_s1 + $0x10] sm:$0xff]  ;;  %v174_v10 = vld [vmem:[%s239_s1 + $0x8] sm:$0xff]  ;;  %v39_v11 = vunpack.c.l.b16 %v15_v3 }
   0x4   :  { %v173_v12 = vld [vmem:[%s239_s1] sm:$0xff] }
   0x5   :  { %v42_v5 = vpack.c.b16 %v40_v4, %v40_v4  ;;  %v41_v13 = vpack.c.b16 %v39_v11, %v39_v11  ;;  %v182_v16 = vld [vmem:[%s241_s2] ss:$0 sm:$0xff] }
   0x6   :  { %103 = vmatpush.bf16.msra.mxu0 %v179_v1 }
   0x7   :  { %172 = vmatmul.msk.bf16.vlgmr.msra.gmra.mxu1 %vm98_vm0, %v42_v5 }
   0xa   :  { %104 = vmatpush.bf16.msra.mxu0 %v178_v6 }
   0xe   :  { %105 = vmatpush.bf16.msra.mxu0 %v177_v7 }
  0x12   :  { %106 = vmatpush.bf16.msra.mxu0 %v176_v8 }
  0x16   :  { %107 = vmatpush.bf16.msra.mxu0 %v175_v9 }
  0x1a   :  { %108 = vmatpush.bf16.msra.mxu0 %v174_v10 }
  0x1e   :  { %109 = vmatpush.bf16.msra.mxu0 %v173_v12 }
  0x21   :  { %110 = vmatmul.bf16.vlgmr.msra.gmra.mxu0 %v41_v13 }
  0x84   :  { %v124_v14 = vpop.f32.mrf.mxu1 }
  0x8c   :  { %v126_v15 = vpop.f32.mrf.mxu1 }
  0x9e   :  { %v111_v17 = vpop.f32.mrf.mxu0 }
  0x9f   :  { %v112_v18 = vadd.f32 %v182_v16, %v111_v17 }
  0xa1   :  { %v125_v19 = vadd.f32 %v124_v14, %v112_v18 }
  0xa3   :  { %v128_v20 = vmax.f32 %v125_v19, 0.0 }
  0xa5   :  { %v129_v21 = vpack.c.bf16 %v128_v20, %v128_v20 }
  0xa6   :  { %v113_v22 = vpop.f32.mrf.mxu0 }
  0xa7   :  { %131 = vst.msk [vmem:[%s242_s3] sm:$0xf] %vm130_vm1, %v129_v21 }

// kernel: _lambda_.18
= control target key start
LH: loop header
LB: loop body
LE: loop exit
PB: predicated region body
PF: predicated region fallthrough
CT: control target
= control target key end

     0   :  { %vm138_vm0 = vcmask 1043456   ;;  %vm134_vm1 = vcmask 719872   ;;  %vm170_vm2 = vcmask 257024   ;;  %s314_s1 = inlined_call_operand.vmem [shape: bf16[216,32], index: 1, kind: input, shape index: {}]   ;;  %s315_s0 = inlined_call_operand.vmem [shape: bf16[8,216], index: 0, kind: input, shape index: {}]   ;;  %s316_s2 = inlined_call_operand.vmem [shape: f32[1,32], index: 2, kind: input, shape index: {}]   ;;  %s317_s3 = inlined_call_operand.vmem [shape: bf16[8,32], index: 3, kind: output, shape index: {}]  }
   0x1   :  { %v236_v0 = vld [vmem:[%s314_s1 + $0x38] sm:$0xff]  ;;  %v42_v1 = vld [vmem:[%s314_s1 + $0x68] sm:$0xf]  ;;  %v235_v3 = vld [vmem:[%s314_s1 + $0x30] sm:$0xff] }
   0x2   :  { %v106_v2 = vunpack.c.l.b16 %v42_v1  ;;  %142 = vmatpush.bf16.msra.mxu0 %v236_v0  ;;  %v241_v6 = vld [vmem:[%s314_s1 + $0x60] sm:$0xff]  ;;  %v234_v7 = vld [vmem:[%s314_s1 + $0x28] sm:$0xff]  ;;  %v240_v8 = vld [vmem:[%s314_s1 + $0x58] sm:$0xff] }
   0x3   :  { %v233_v9 = vld [vmem:[%s314_s1 + $0x20] sm:$0xff]  ;;  %v239_v10 = vld [vmem:[%s314_s1 + $0x50] sm:$0xff]  ;;  %v232_v11 = vld [vmem:[%s314_s1 + $0x18] sm:$0xff] }
   0x4   :  { %v120_v4 = vpack.c.b16 %v106_v2, %v106_v2  ;;  %v238_v12 = vld [vmem:[%s314_s1 + $0x48] sm:$0xff]  ;;  %v231_v13 = vld [vmem:[%s314_s1 + $0x10] sm:$0xff]  ;;  %v15_v14 = vld [vmem:[%s315_s0] sm:$0xff] }
   0x5   :  { %v49_v15 = vunpack.c.h.b16 %v15_v14  ;;  %v237_v16 = vld [vmem:[%s314_s1 + $0x40] sm:$0xff]  ;;  %v230_v17 = vld [vmem:[%s314_s1 + $0x8] sm:$0xff]  ;;  %v48_v19 = vunpack.c.l.b16 %v15_v14 }
   0x6   :  { %v140_v5 = vsel %vm138_vm0, %v120_v4, 0  ;;  %143 = vmatpush.bf16.msra.mxu0 %v235_v3  ;;  %v229_v20 = vld [vmem:[%s314_s1] sm:$0xff] }
   0x7   :  { %157 = vmatpush.bf16.msra.mxu1 %v140_v5  ;;  %v51_v18 = vpack.c.b16 %v49_v15, %v49_v15  ;;  %v50_v21 = vpack.c.b16 %v48_v19, %v48_v19  ;;  %v242_v23 = vld [vmem:[%s316_s2] ss:$0 sm:$0xff] }
   0xa   :  { %144 = vmatpush.bf16.msra.mxu0 %v234_v7 }
   0xb   :  { %158 = vmatpush.bf16.msra.mxu1 %v241_v6 }
   0xe   :  { %145 = vmatpush.bf16.msra.mxu0 %v233_v9 }
   0xf   :  { %159 = vmatpush.bf16.msra.mxu1 %v240_v8 }
  0x12   :  { %146 = vmatpush.bf16.msra.mxu0 %v232_v11 }
  0x13   :  { %160 = vmatpush.bf16.msra.mxu1 %v239_v10 }
  0x16   :  { %147 = vmatpush.bf16.msra.mxu0 %v231_v13 }
  0x17   :  { %161 = vmatpush.bf16.msra.mxu1 %v238_v12 }
  0x1a   :  { %148 = vmatpush.bf16.msra.mxu0 %v230_v17 }
  0x1b   :  { %162 = vmatpush.bf16.msra.mxu1 %v237_v16 }
  0x1e   :  { %228 = vmatmul.msk.bf16.vlgmr.msra.gmra.mxu1 %vm134_vm1, %v51_v18  ;;  %149 = vmatpush.bf16.msra.mxu0 %v229_v20 }
  0x21   :  { %150 = vmatmul.bf16.vlgmr.msra.gmra.mxu0 %v50_v21 }
  0x9b   :  { %v164_v22 = vpop.f32.mrf.mxu1 }
  0x9e   :  { %v151_v24 = vpop.f32.mrf.mxu0 }
  0x9f   :  { %v152_v25 = vadd.f32 %v242_v23, %v151_v24 }
  0xa1   :  { %v165_v26 = vadd.f32 %v164_v22, %v152_v25 }
  0xa3   :  { %v166_v27 = vpop.f32.mrf.mxu1  ;;  %v168_v28 = vmax.f32 %v165_v26, 0.0 }
  0xa5   :  { %v169_v29 = vpack.c.bf16 %v168_v28, %v168_v28 }
  0xa6   :  { %v153_v30 = vpop.f32.mrf.mxu0 }
  0xa7   :  { %171 = vst.msk [vmem:[%s317_s3] sm:$0xf] %vm170_vm2, %v169_v29 }

// kernel: _lambda_.19
= control target key start
LH: loop header
LB: loop body
LE: loop exit
PB: predicated region body
PF: predicated region fallthrough
CT: control target
= control target key end

     0   :  { %vm36_vm0 = vcmask 261120   ;;  %s131_s1 = inlined_call_operand.vmem [shape: bf16[32,32], index: 1, kind: input, shape index: {}]   ;;  %s132_s2 = inlined_call_operand.vmem [shape: f32[1,32], index: 2, kind: input, shape index: {}]   ;;  %s133_s0 = inlined_call_operand.vmem [shape: bf16[8,32], index: 0, kind: input, shape index: {}]   ;;  %s134_s3 = inlined_call_operand.vmem [shape: f32[8,32], index: 3, kind: output, shape index: {}]  }
   0x1   :  { %v88_v0 = vld [vmem:[%s131_s1 + $0x8] sm:$0xff]  ;;  %v87_v1 = vld [vmem:[%s131_s1] sm:$0xff] }
   0x2   :  { %46 = vmatpush.bf16.msra.mxu0 %v88_v0  ;;  %v15_v2 = vld [vmem:[%s133_s0] sm:$0xf] }
   0x3   :  { %v89_v3 = vld [vmem:[%s132_s2] ss:$0 sm:$0xff] }
   0x6   :  { %47 = vmatpush.bf16.msra.mxu0 %v87_v1 }
   0x9   :  { %85 = vmatmul.msk.bf16.vlgmr.msra.gmra.mxu0 %vm36_vm0, %v15_v2 }
  0x86   :  { %v49_v4 = vpop.f32.mrf.mxu0 }
  0x87   :  { %v50_v5 = vadd.f32 %v89_v3, %v49_v4 }
  0x89   :  { %v86_v6 = vmul.f32 -1.442695, %v50_v5 }
  0x8b   :  { %90 = vpow2.f32 %v86_v6 }
  0x8e   :  { %v51_v7 = vpop.f32.mrf.mxu0 }
  0x91   :  { %v91_v8 = vpop.eup %90 }
  0x92   :  { %v56_v9 = vadd.f32 1.0, %v91_v8 }
  0x94   :  { %92 = vrcp.f32 %v56_v9  ;;  %v68_v13 = vand.u32 2147483648, %v56_v9  ;;  %v66_v15 = vand.u32 2147483647, %v56_v9  ;;  %vm62_vm2 = vweird.f32 %v56_v9 }
  0x96   :  { %v69_v17 = vor.u32 1.1754944e-38, %v68_v13  ;;  %vm67_vm4 = vcmp.eq.f32.partialorder %v66_v15, 8.507059e+37 }
  0x9a   :  { %v93_v10 = vpop.eup %92 }
  0x9b   :  { %v58_v11 = vmul.f32 %v93_v10, %v56_v9  ;;  %vm63_vm1 = vweird.f32 %v93_v10 }
  0x9c   :  { %vm64_vm3 = vmor %vm62_vm2, %vm63_vm1 }
  0x9d   :  { %v59_v12 = vsub.f32 1.0, %v58_v11 }
  0x9f   :  { %v60_v14 = vmul.f32 %v93_v10, %v59_v12 }
  0xa1   :  { %v61_v16 = vadd.f32 %v93_v10, %v60_v14 }
  0xa3   :  { %v65_v18 = vsel %vm64_vm3, %v93_v10, %v61_v16 }
  0xa4   :  { %v70_v19 = vsel %vm67_vm4, %v69_v17, %v65_v18 }
  0xa5   :  { %72 = vst.msk [vmem:[%s134_s3] sm:$0xff] %vm36_vm0, %v70_v19 }

// kernel: _lambda_.20
= control target key start
LH: loop header
LB: loop body
LE: loop exit
PB: predicated region body
PF: predicated region fallthrough
CT: control target
= control target key end

     0   :  { %vm39_vm0 = vcmask 261120   ;;  %vm63_vm1 = vcmask 257024   ;;  %s125_s1 = inlined_call_operand.vmem [shape: bf16[32,32], index: 1, kind: input, shape index: {}]   ;;  %s126_s2 = inlined_call_operand.vmem [shape: f32[1,32], index: 2, kind: input, shape index: {}]   ;;  %s127_s3 = inlined_call_operand.vmem [shape: f32[1,32], index: 3, kind: input, shape index: {}]   ;;  %s128_s0 = inlined_call_operand.vmem [shape: bf16[8,32], index: 0, kind: input, shape index: {}]   ;;  %s129_s4 = inlined_call_operand.vmem [shape: bf16[8,32], index: 4, kind: output, shape index: {}]  }
   0x1   :  { %v79_v0 = vld [vmem:[%s125_s1 + $0x8] sm:$0xff]  ;;  %v78_v1 = vld [vmem:[%s125_s1] sm:$0xff] }
   0x2   :  { %49 = vmatpush.bf16.msra.mxu0 %v79_v0  ;;  %v18_v2 = vld [vmem:[%s128_s0] sm:$0xf] }
   0x3   :  { %v80_v3 = vld [vmem:[%s126_s2] ss:$0 sm:$0xff] }
   0x4   :  { %v81_v6 = vld [vmem:[%s127_s3] ss:$0 sm:$0xff] }
   0x6   :  { %50 = vmatpush.bf16.msra.mxu0 %v78_v1 }
   0x9   :  { %77 = vmatmul.msk.bf16.vlgmr.msra.gmra.mxu0 %vm39_vm0, %v18_v2 }
  0x86   :  { %v52_v4 = vpop.f32.mrf.mxu0 }
  0x87   :  { %v53_v5 = vadd.f32 %v80_v3, %v52_v4 }
  0x89   :  { %v56_v7 = vmax.f32 %v53_v5, 0.0 }
  0x8b   :  { %v61_v8 = vmul.f32 %v81_v6, %v56_v7 }
  0x8d   :  { %v62_v9 = vpack.c.bf16 %v61_v8, %v61_v8 }
  0x8e   :  { %v54_v10 = vpop.f32.mrf.mxu0 }
  0x8f   :  { %64 = vst.msk [vmem:[%s129_s4] sm:$0xf] %vm63_vm1, %v62_v9 }

// kernel: _lambda_.21
= control target key start
LH: loop header
LB: loop body
LE: loop exit
PB: predicated region body
PF: predicated region fallthrough
CT: control target
= control target key end

     0   :  { %vm175_vm0 = vcmask 261120   ;;  %vm245_vm5 = vcmask 257024   ;;  %s438_s1 = inlined_call_operand.vmem [shape: bf16[288,64], index: 1, kind: input, shape index: {}]   ;;  %s439_s0 = inlined_call_operand.vmem [shape: bf16[8,288], index: 0, kind: input, shape index: {}]   ;;  %s440_s2 = inlined_call_operand.vmem [shape: f32[1,64], index: 2, kind: input, shape index: {}]   ;;  %s441_s3 = inlined_call_operand.vmem [shape: bf16[8,32], index: 3, kind: output, shape index: {}]  }
   0x1   :  { %v332_v0 = vld [vmem:[%s438_s1 + $0x38] sm:$0xff]  ;;  %v331_v2 = vld [vmem:[%s438_s1 + $0x30] sm:$0xff]  ;;  %v342_v4 = vld [vmem:[%s438_s1 + $0x88] sm:$0xff] }
   0x2   :  { %v340_v1 = vld [vmem:[%s438_s1 + $0x78] sm:$0xff]  ;;  %179 = vmatpush.bf16.msra.mxu0 %v332_v0  ;;  %v339_v3 = vld [vmem:[%s438_s1 + $0x70] sm:$0xff]  ;;  %211 = vmatpush.bf16.msra.mxu2 %v342_v4  ;;  %v341_v5 = vld [vmem:[%s438_s1 + $0x80] sm:$0xff] }
   0x3   :  { %192 = vmatpush.bf16.msra.mxu1 %v340_v1  ;;  %v16_v6 = vld [vmem:[%s439_s0 + $0x8] sm:$0xf]  ;;  %v329_v11 = vld [vmem:[%s438_s1 + $0x20] sm:$0xff]  ;;  %v328_v13 = vld [vmem:[%s438_s1 + $0x18] sm:$0xff] }
   0x4   :  { %v61_v7 = vunpack.c.l.b16 %v16_v6  ;;  %v330_v8 = vld [vmem:[%s438_s1 + $0x28] sm:$0xff]  ;;  %v337_v12 = vld [vmem:[%s438_s1 + $0x60] sm:$0xff]  ;;  %v336_v14 = vld [vmem:[%s438_s1 + $0x58] sm:$0xff] }
   0x5   :  { %v338_v9 = vld [vmem:[%s438_s1 + $0x68] sm:$0xff]  ;;  %v327_v15 = vld [vmem:[%s438_s1 + $0x10] sm:$0xff]  ;;  %v15_v19 = vld [vmem:[%s439_s0] sm:$0xff] }
   0x6   :  { %180 = vmatpush.bf16.msra.mxu0 %v331_v2  ;;  %v64_v10 = vpack.c.b16 %v61_v7, %v61_v7  ;;  %212 = vmatpush.bf16.msra.mxu2 %v341_v5  ;;  %v335_v16 = vld [vmem:[%s438_s1 + $0x50] sm:$0xff]  ;;  %v326_v17 = vld [vmem:[%s438_s1 + $0x8] sm:$0xff]  ;;  %v59_v20 = vunpack.c.l.b16 %v15_v19  ;;  %v60_v21 = vunpack.c.h.b16 %v15_v19  ;;  %v325_v22 = vld [vmem:[%s438_s1] sm:$0xff] }
   0x7   :  { %193 = vmatpush.bf16.msra.mxu1 %v339_v3  ;;  %v334_v18 = vld [vmem:[%s438_s1 + $0x48] sm:$0xff]  ;;  %v333_v23 = vld [vmem:[%s438_s1 + $0x40] sm:$0xff]  ;;  %s351_s1 = smov 96  }
   0x8   :  { %v62_v24 = vpack.c.b16 %v59_v20, %v59_v20  ;;  %v63_v25 = vpack.c.b16 %v60_v21, %v60_v21  ;;  %v344_v28 = vld [vmem:[%s440_s2] ss:$0 sm:$0xff] }
   0x9   :  { %323 = vmatmul.msk.bf16.vlgmr.msra.gmra.mxu2 %vm175_vm0, %v64_v10 }
   0xa   :  { %181 = vmatpush.bf16.msra.mxu0 %v330_v8 }
   0xb   :  { %194 = vmatpush.bf16.msra.mxu1 %v338_v9 }
   0xe   :  { %182 = vmatpush.bf16.msra.mxu0 %v329_v11 }
   0xf   :  { %195 = vmatpush.bf16.msra.mxu1 %v337_v12 }
  0x12   :  { %183 = vmatpush.bf16.msra.mxu0 %v328_v13 }
  0x13   :  { %196 = vmatpush.bf16.msra.mxu1 %v336_v14 }
  0x16   :  { %184 = vmatpush.bf16.msra.mxu0 %v327_v15 }
  0x17   :  { %197 = vmatpush.bf16.msra.mxu1 %v335_v16 }
  0x1a   :  { %185 = vmatpush.bf16.msra.mxu0 %v326_v17 }
  0x1b   :  { %198 = vmatpush.bf16.msra.mxu1 %v334_v18 }
  0x1e   :  { %186 = vmatpush.bf16.msra.mxu0 %v325_v22 }
  0x1f   :  { %199 = vmatpush.bf16.msra.mxu1 %v333_v23 }
  0x21   :  { %187 = vmatmul.bf16.vlgmr.msra.gmra.mxu0 %v62_v24 }
  0x22   :  { %200 = vmatmul.bf16.vlgmr.msra.gmra.mxu1 %v63_v25 }
  0x8c   :  { %v214_v26 = vpop.f32.mrf.mxu2 }
  0x94   :  { %v216_v27 = vpop.f32.mrf.mxu2 }
  0x9e   :  { %v188_v29 = vpop.f32.mrf.mxu0 }
  0x9f   :  { %v201_v30 = vpop.f32.mrf.mxu1  ;;  %v189_v31 = vadd.f32 %v344_v28, %v188_v29 }
  0xa1   :  { %v202_v32 = vadd.f32 %v201_v30, %v189_v31 }
  0xa3   :  { %v215_v33 = vadd.f32 %v214_v26, %v202_v32 }
  0xa5   :  { %345 = vtanh.f32 %v215_v33  ;;  %v324_v37 = vmul.f32 -1.442695, %v215_v33 }
  0xa6   :  { %v190_v34 = vpop.f32.mrf.mxu0 }
  0xa7   :  { %v203_v35 = vpop.f32.mrf.mxu1  ;;  %347 = vpow2.f32 %v324_v37 }
  0xab   :  { %v346_v36 = vpop.eup %345 }
  0xac   :  { %240 = vrot.lane.b32.xlu0 %v346_v36, %s351_s1 }
  0xad   :  { %v348_v38 = vpop.eup %347 }
  0xae   :  { %v221_v39 = vadd.f32 1.0, %v348_v38 }
  0xb0   :  { %349 = vrcp.f32 %v221_v39  ;;  %v233_v45 = vand.u32 2147483648, %v221_v39  ;;  %vm227_vm2 = vweird.f32 %v221_v39  ;;  %v231_v46 = vand.u32 2147483647, %v221_v39 }
  0xb2   :  { %v234_v48 = vor.u32 1.1754944e-38, %v233_v45  ;;  %vm232_vm4 = vcmp.eq.f32.partialorder %v231_v46, 8.507059e+37 }
  0xb6   :  { %v350_v40 = vpop.eup %349 }
  0xb7   :  { %v223_v41 = vmul.f32 %v350_v40, %v221_v39  ;;  %vm228_vm1 = vweird.f32 %v350_v40 }
  0xb8   :  { %vm229_vm3 = vmor %vm227_vm2, %vm228_vm1 }
  0xb9   :  { %v224_v42 = vsub.f32 1.0, %v223_v41 }
  0xbb   :  { %v225_v43 = vmul.f32 %v350_v40, %v224_v42 }
  0xbd   :  { %v226_v44 = vadd.f32 %v350_v40, %v225_v43 }
  0xbf   :  { %v230_v47 = vsel %vm229_vm3, %v350_v40, %v226_v44 }
  0xc0   :  { %v235_v49 = vsel %vm232_vm4, %v234_v48, %v230_v47 }
  0xc1   :  { %v238_v50 = vsub.f32 1.0, %v235_v49 }
 0x11e   :  { %v241_v51 = vpop.permute.xlu0 %240 }
 0x11f   :  { %v243_v52 = vmul.f32 %v241_v51, %v238_v50 }
 0x121   :  { %v244_v53 = vpack.c.bf16 %v243_v52, %v243_v52 }
 0x123   :  { %246 = vst.msk [vmem:[%s441_s3] sm:$0xf] %vm245_vm5, %v244_v53 }

// kernel: _lambda_.23
= control target key start
LH: loop header
LB: loop body
LE: loop exit
PB: predicated region body
PF: predicated region fallthrough
CT: control target
= control target key end

     0   :  { %vm138_vm0 = vcmask 1043456   ;;  %vm134_vm1 = vcmask 719872   ;;  %s276_s16 = smov 104   ;;  %vm195_vm6 = vcmask 191488   ;;  %s348_s1 = inlined_call_operand.vmem [shape: bf16[216,48], index: 1, kind: input, shape index: {}]   ;;  %s349_s0 = inlined_call_operand.vmem [shape: bf16[8,216], index: 0, kind: input, shape index: {}]   ;;  %s350_s2 = inlined_call_operand.vmem [shape: f32[1,48], index: 2, kind: input, shape index: {}]   ;;  %s351_s3 = inlined_call_operand.vmem [shape: bf16[8,24], index: 3, kind: output, shape index: {}]  }
   0x1   :  { %v262_v0 = vld [vmem:[%s348_s1 + $0x38] sm:$0xff]  ;;  %v42_v1 = vld [vmem:[%s348_s1 + $0x68] sm:$0xf]  ;;  %v261_v3 = vld [vmem:[%s348_s1 + $0x30] sm:$0xff] }
   0x2   :  { %v106_v2 = vunpack.c.l.b16 %v42_v1  ;;  %142 = vmatpush.bf16.msra.mxu0 %v262_v0  ;;  %v267_v6 = vld [vmem:[%s348_s1 + $0x60] sm:$0xff]  ;;  %v260_v7 = vld [vmem:[%s348_s1 + $0x28] sm:$0xff]  ;;  %v266_v8 = vld [vmem:[%s348_s1 + $0x58] sm:$0xff] }
   0x3   :  { %v259_v9 = vld [vmem:[%s348_s1 + $0x20] sm:$0xff]  ;;  %v265_v10 = vld [vmem:[%s348_s1 + $0x50] sm:$0xff]  ;;  %v258_v11 = vld [vmem:[%s348_s1 + $0x18] sm:$0xff] }
   0x4   :  { %v120_v4 = vpack.c.b16 %v106_v2, %v106_v2  ;;  %v264_v12 = vld [vmem:[%s348_s1 + $0x48] sm:$0xff]  ;;  %v257_v13 = vld [vmem:[%s348_s1 + $0x10] sm:$0xff]  ;;  %v15_v14 = vld [vmem:[%s349_s0] sm:$0xff] }
   0x5   :  { %v49_v15 = vunpack.c.h.b16 %v15_v14  ;;  %v263_v16 = vld [vmem:[%s348_s1 + $0x40] sm:$0xff]  ;;  %v256_v17 = vld [vmem:[%s348_s1 + $0x8] sm:$0xff]  ;;  %v48_v19 = vunpack.c.l.b16 %v15_v14 }
   0x6   :  { %v140_v5 = vsel %vm138_vm0, %v120_v4, 0  ;;  %143 = vmatpush.bf16.msra.mxu0 %v261_v3  ;;  %v255_v20 = vld [vmem:[%s348_s1] sm:$0xff] }
   0x7   :  { %157 = vmatpush.bf16.msra.mxu1 %v140_v5  ;;  %v51_v18 = vpack.c.b16 %v49_v15, %v49_v15  ;;  %v50_v21 = vpack.c.b16 %v48_v19, %v48_v19  ;;  %v269_v23 = vld [vmem:[%s350_s2] ss:$0 sm:$0xff] }
   0xa   :  { %144 = vmatpush.bf16.msra.mxu0 %v260_v7 }
   0xb   :  { %158 = vmatpush.bf16.msra.mxu1 %v267_v6 }
   0xe   :  { %145 = vmatpush.bf16.msra.mxu0 %v259_v9 }
   0xf   :  { %159 = vmatpush.bf16.msra.mxu1 %v266_v8 }
  0x12   :  { %146 = vmatpush.bf16.msra.mxu0 %v258_v11 }
  0x13   :  { %160 = vmatpush.bf16.msra.mxu1 %v265_v10 }
  0x16   :  { %147 = vmatpush.bf16.msra.mxu0 %v257_v13 }
  0x17   :  { %161 = vmatpush.bf16.msra.mxu1 %v264_v12 }
  0x1a   :  { %148 = vmatpush.bf16.msra.mxu0 %v256_v17 }
  0x1b   :  { %162 = vmatpush.bf16.msra.mxu1 %v263_v16 }
  0x1e   :  { %253 = vmatmul.msk.bf16.vlgmr.msra.gmra.mxu1 %vm134_vm1, %v51_v18  ;;  %149 = vmatpush.bf16.msra.mxu0 %v255_v20 }
  0x21   :  { %150 = vmatmul.bf16.vlgmr.msra.gmra.mxu0 %v50_v21 }
  0x9b   :  { %v164_v22 = vpop.f32.mrf.mxu1 }
  0x9e   :  { %v151_v24 = vpop.f32.mrf.mxu0 }
  0x9f   :  { %v152_v25 = vadd.f32 %v269_v23, %v151_v24 }
  0xa1   :  { %v165_v26 = vadd.f32 %v164_v22, %v152_v25 }
  0xa3   :  { %v166_v27 = vpop.f32.mrf.mxu1  ;;  %270 = vtanh.f32 %v165_v26  ;;  %v254_v30 = vmul.f32 -1.442695, %v165_v26 }
  0xa5   :  { %272 = vpow2.f32 %v254_v30 }
  0xa6   :  { %v153_v28 = vpop.f32.mrf.mxu0 }
  0xa9   :  { %v271_v29 = vpop.eup %270 }
  0xaa   :  { %190 = vrot.lane.b32.xlu0 %v271_v29, %s276_s16 }
  0xab   :  { %v273_v31 = vpop.eup %272 }
  0xac   :  { %v171_v32 = vadd.f32 1.0, %v273_v31 }
  0xae   :  { %274 = vrcp.f32 %v171_v32  ;;  %v183_v38 = vand.u32 2147483648, %v171_v32  ;;  %vm177_vm3 = vweird.f32 %v171_v32  ;;  %v181_v39 = vand.u32 2147483647, %v171_v32 }
  0xb0   :  { %v184_v41 = vor.u32 1.1754944e-38, %v183_v38  ;;  %vm182_vm5 = vcmp.eq.f32.partialorder %v181_v39, 8.507059e+37 }
  0xb4   :  { %v275_v33 = vpop.eup %274 }
  0xb5   :  { %v173_v34 = vmul.f32 %v275_v33, %v171_v32  ;;  %vm178_vm2 = vweird.f32 %v275_v33 }
  0xb6   :  { %vm179_vm4 = vmor %vm177_vm3, %vm178_vm2 }
  0xb7   :  { %v174_v35 = vsub.f32 1.0, %v173_v34 }
  0xb9   :  { %v175_v36 = vmul.f32 %v275_v33, %v174_v35 }
  0xbb   :  { %v176_v37 = vadd.f32 %v275_v33, %v175_v36 }
  0xbd   :  { %v180_v40 = vsel %vm179_vm4, %v275_v33, %v176_v37 }
  0xbe   :  { %v185_v42 = vsel %vm182_vm5, %v184_v41, %v180_v40 }
  0xbf   :  { %v188_v43 = vsub.f32 1.0, %v185_v42 }
 0x11c   :  { %v191_v44 = vpop.permute.xlu0 %190 }
 0x11d   :  { %v193_v45 = vmul.f32 %v191_v44, %v188_v43 }
 0x11f   :  { %v194_v46 = vpack.c.bf16 %v193_v45, %v193_v45 }
 0x121   :  { %196 = vst.msk [vmem:[%s351_s3] sm:$0xf] %vm195_vm6, %v194_v46 }

// kernel: _lambda_.22
= control target key start
LH: loop header
LB: loop body
LE: loop exit
PB: predicated region body
PF: predicated region fallthrough
CT: control target
= control target key end

     0   :  { %vm289_vm0 = vcmask 1043456   ;;  %vm285_vm1 = vcmask 982016   ;;  %vm347_vm2 = vcmask 191488   ;;  %s638_s1 = inlined_call_operand.vmem [shape: bf16[504,24], index: 1, kind: input, shape index: {}]   ;;  %s639_s2 = inlined_call_operand.vmem [shape: f32[1,24], index: 2, kind: input, shape index: {}]   ;;  %s640_s0 = inlined_call_operand.vmem [shape: bf16[8,504], index: 0, kind: input, shape index: {}]   ;;  %s641_s3 = inlined_call_operand.vmem [shape: bf16[8,24], index: 3, kind: output, shape index: {}]  }
   0x1   :  { %v485_v0 = vld [vmem:[%s638_s1 + $0x38] sm:$0xff]  ;;  %v484_v5 = vld [vmem:[%s638_s1 + $0x30] sm:$0xff]  ;;  %v483_v10 = vld [vmem:[%s638_s1 + $0x28] sm:$0xff] }
   0x2   :  { %v493_v1 = vld [vmem:[%s638_s1 + $0x78] sm:$0xff]  ;;  %293 = vmatpush.bf16.msra.mxu0 %v485_v0  ;;  %v492_v6 = vld [vmem:[%s638_s1 + $0x70] sm:$0xff]  ;;  %v491_v11 = vld [vmem:[%s638_s1 + $0x68] sm:$0xff] }
   0x3   :  { %v501_v2 = vld [vmem:[%s638_s1 + $0xb8] sm:$0xff]  ;;  %306 = vmatpush.bf16.msra.mxu1 %v493_v1  ;;  %v500_v7 = vld [vmem:[%s638_s1 + $0xb0] sm:$0xff]  ;;  %v499_v13 = vld [vmem:[%s638_s1 + $0xa8] sm:$0xff] }
   0x4   :  { %v78_v3 = vld [vmem:[%s638_s1 + $0xf8] sm:$0xf]  ;;  %319 = vmatpush.bf16.msra.mxu2 %v501_v2  ;;  %v508_v12 = vld [vmem:[%s638_s1 + $0xf0] sm:$0xff]  ;;  %v482_v14 = vld [vmem:[%s638_s1 + $0x20] sm:$0xff] }
   0x5   :  { %v221_v4 = vunpack.c.l.b16 %v78_v3  ;;  %v490_v15 = vld [vmem:[%s638_s1 + $0x60] sm:$0xff]  ;;  %v507_v16 = vld [vmem:[%s638_s1 + $0xe8] sm:$0xff]  ;;  %v481_v18 = vld [vmem:[%s638_s1 + $0x18] sm:$0xff] }
   0x6   :  { %294 = vmatpush.bf16.msra.mxu0 %v484_v5  ;;  %v498_v17 = vld [vmem:[%s638_s1 + $0xa0] sm:$0xff]  ;;  %v489_v19 = vld [vmem:[%s638_s1 + $0x58] sm:$0xff]  ;;  %v480_v22 = vld [vmem:[%s638_s1 + $0x10] sm:$0xff] }
   0x7   :  { %v253_v8 = vpack.c.b16 %v221_v4, %v221_v4  ;;  %307 = vmatpush.bf16.msra.mxu1 %v492_v6  ;;  %v506_v20 = vld [vmem:[%s638_s1 + $0xe0] sm:$0xff]  ;;  %v497_v21 = vld [vmem:[%s638_s1 + $0x98] sm:$0xff]  ;;  %v488_v23 = vld [vmem:[%s638_s1 + $0x50] sm:$0xff] }
   0x8   :  { %320 = vmatpush.bf16.msra.mxu2 %v500_v7  ;;  %v505_v24 = vld [vmem:[%s638_s1 + $0xd8] sm:$0xff]  ;;  %v496_v25 = vld [vmem:[%s638_s1 + $0x90] sm:$0xff]  ;;  %v479_v26 = vld [vmem:[%s638_s1 + $0x8] sm:$0xff] }
   0x9   :  { %v291_v9 = vsel %vm289_vm0, %v253_v8, 0  ;;  %v487_v27 = vld [vmem:[%s638_s1 + $0x48] sm:$0xff]  ;;  %v14_v28 = vld [vmem:[%s640_s0] sm:$0xff]  ;;  %v504_v29 = vld [vmem:[%s638_s1 + $0xd0] sm:$0xff] }
   0xa   :  { %332 = vmatpush.bf16.msra.mxu3 %v291_v9  ;;  %295 = vmatpush.bf16.msra.mxu0 %v483_v10  ;;  %v495_v30 = vld [vmem:[%s638_s1 + $0x88] sm:$0xff]  ;;  %v85_v32 = vunpack.c.l.b16 %v14_v28  ;;  %v86_v33 = vunpack.c.h.b16 %v14_v28  ;;  %v478_v34 = vld [vmem:[%s638_s1] sm:$0xff] }
   0xb   :  { %308 = vmatpush.bf16.msra.mxu1 %v491_v11  ;;  %v15_v31 = vld [vmem:[%s640_s0 + $0x8] sm:$0xff]  ;;  %v486_v35 = vld [vmem:[%s638_s1 + $0x40] sm:$0xff] }
   0xc   :  { %321 = vmatpush.bf16.msra.mxu2 %v499_v13  ;;  %v87_v36 = vunpack.c.l.b16 %v15_v31  ;;  %v503_v37 = vld [vmem:[%s638_s1 + $0xc8] sm:$0xff]  ;;  %v494_v38 = vld [vmem:[%s638_s1 + $0x80] sm:$0xff]  ;;  %v89_v39 = vpack.c.b16 %v85_v32, %v85_v32  ;;  %v90_v40 = vpack.c.b16 %v86_v33, %v86_v33  ;;  %v88_v41 = vunpack.c.h.b16 %v15_v31 }
   0xd   :  { %v502_v43 = vld [vmem:[%s638_s1 + $0xc0] sm:$0xff] }
   0xe   :  { %333 = vmatpush.bf16.msra.mxu3 %v508_v12  ;;  %296 = vmatpush.bf16.msra.mxu0 %v482_v14  ;;  %v91_v42 = vpack.c.b16 %v87_v36, %v87_v36  ;;  %v92_v44 = vpack.c.b16 %v88_v41, %v88_v41  ;;  %v509_v45 = vld [vmem:[%s639_s2] ss:$0 sm:$0xff] }
   0xf   :  { %309 = vmatpush.bf16.msra.mxu1 %v490_v15 }
  0x10   :  { %322 = vmatpush.bf16.msra.mxu2 %v498_v17 }
  0x12   :  { %334 = vmatpush.bf16.msra.mxu3 %v507_v16  ;;  %297 = vmatpush.bf16.msra.mxu0 %v481_v18 }
  0x13   :  { %310 = vmatpush.bf16.msra.mxu1 %v489_v19 }
  0x14   :  { %323 = vmatpush.bf16.msra.mxu2 %v497_v21 }
  0x16   :  { %335 = vmatpush.bf16.msra.mxu3 %v506_v20  ;;  %298 = vmatpush.bf16.msra.mxu0 %v480_v22 }
  0x17   :  { %311 = vmatpush.bf16.msra.mxu1 %v488_v23 }
  0x18   :  { %324 = vmatpush.bf16.msra.mxu2 %v496_v25 }
  0x1a   :  { %336 = vmatpush.bf16.msra.mxu3 %v505_v24  ;;  %299 = vmatpush.bf16.msra.mxu0 %v479_v26 }
  0x1b   :  { %312 = vmatpush.bf16.msra.mxu1 %v487_v27 }
  0x1c   :  { %325 = vmatpush.bf16.msra.mxu2 %v495_v30 }
  0x1e   :  { %337 = vmatpush.bf16.msra.mxu3 %v504_v29  ;;  %300 = vmatpush.bf16.msra.mxu0 %v478_v34 }
  0x1f   :  { %313 = vmatpush.bf16.msra.mxu1 %v486_v35 }
  0x20   :  { %326 = vmatpush.bf16.msra.mxu2 %v494_v38 }
  0x21   :  { %301 = vmatmul.bf16.vlgmr.msra.gmra.mxu0 %v89_v39 }
  0x22   :  { %338 = vmatpush.bf16.msra.mxu3 %v503_v37  ;;  %314 = vmatmul.bf16.vlgmr.msra.gmra.mxu1 %v90_v40 }
  0x23   :  { %327 = vmatmul.bf16.vlgmr.msra.gmra.mxu2 %v91_v42 }
  0x26   :  { %339 = vmatpush.bf16.msra.mxu3 %v502_v43 }
  0x29   :  { %477 = vmatmul.msk.bf16.vlgmr.msra.gmra.mxu3 %vm285_vm1, %v92_v44 }
  0x9e   :  { %v302_v46 = vpop.f32.mrf.mxu0 }
  0x9f   :  { %v315_v47 = vpop.f32.mrf.mxu1  ;;  %v303_v48 = vadd.f32 %v509_v45, %v302_v46 }
  0xa1   :  { %v316_v49 = vadd.f32 %v315_v47, %v303_v48 }
  0xa6   :  { %v328_v50 = vpop.f32.mrf.mxu2  ;;  %v304_v52 = vpop.f32.mrf.mxu0 }
  0xa7   :  { %v329_v51 = vadd.f32 %v328_v50, %v316_v49  ;;  %v317_v53 = vpop.f32.mrf.mxu1 }
  0xac   :  { %v341_v54 = vpop.f32.mrf.mxu3 }
  0xad   :  { %v342_v55 = vadd.f32 %v341_v54, %v329_v51 }
  0xae   :  { %v330_v57 = vpop.f32.mrf.mxu2 }
  0xaf   :  { %v345_v56 = vmax.f32 %v342_v55, 0.0 }
  0xb1   :  { %v346_v58 = vpack.c.bf16 %v345_v56, %v345_v56 }
  0xb3   :  { %348 = vst.msk [vmem:[%s641_s3] sm:$0xf] %vm347_vm2, %v346_v58 }
  0xb4   :  { %v343_v59 = vpop.f32.mrf.mxu3 }

// kernel: _lambda_.24
= control target key start
LH: loop header
LB: loop body
LE: loop exit
PB: predicated region body
PF: predicated region fallthrough
CT: control target
= control target key end

     0   :  { %vm222_vm0 = vcmask 1043456   ;;  %vm218_vm1 = vcmask 850944   ;;  %vm272_vm2 = vcmask 125952   ;;  %s522_s1 = inlined_call_operand.vmem [shape: bf16[360,16], index: 1, kind: input, shape index: {}]   ;;  %s523_s2 = inlined_call_operand.vmem [shape: f32[1,16], index: 2, kind: input, shape index: {}]   ;;  %s524_s0 = inlined_call_operand.vmem [shape: bf16[16,360], index: 0, kind: input, shape index: {}]   ;;  %s525_s3 = inlined_call_operand.vmem [shape: bf16[16,16], index: 3, kind: output, shape index: {}]  }
   0x1   :  { %v390_v0 = vld [vmem:[%s522_s1 + $0x38] sm:$0xff]  ;;  %v63_v2 = vld [vmem:[%s522_s1 + $0xb0] sm:$0xf]  ;;  %v404_v8 = vld [vmem:[%s522_s1 + $0xa8] sm:$0xff] }
   0x2   :  { %v398_v1 = vld [vmem:[%s522_s1 + $0x78] sm:$0xff]  ;;  %v172_v3 = vunpack.c.l.b16 %v63_v2  ;;  %226 = vmatpush.bf16.msra.mxu0 %v390_v0  ;;  %v389_v4 = vld [vmem:[%s522_s1 + $0x30] sm:$0xff]  ;;  %v388_v9 = vld [vmem:[%s522_s1 + $0x28] sm:$0xff] }
   0x3   :  { %240 = vmatpush.bf16.msra.mxu1 %v398_v1  ;;  %v397_v6 = vld [vmem:[%s522_s1 + $0x70] sm:$0xff]  ;;  %v396_v10 = vld [vmem:[%s522_s1 + $0x68] sm:$0xff]  ;;  %v403_v11 = vld [vmem:[%s522_s1 + $0xa0] sm:$0xff] }
   0x4   :  { %v195_v5 = vpack.c.b16 %v172_v3, %v172_v3  ;;  %v387_v12 = vld [vmem:[%s522_s1 + $0x20] sm:$0xff]  ;;  %v402_v14 = vld [vmem:[%s522_s1 + $0x98] sm:$0xff]  ;;  %v401_v17 = vld [vmem:[%s522_s1 + $0x90] sm:$0xff] }
   0x5   :  { %v395_v13 = vld [vmem:[%s522_s1 + $0x60] sm:$0xff]  ;;  %v386_v15 = vld [vmem:[%s522_s1 + $0x18] sm:$0xff]  ;;  %v385_v18 = vld [vmem:[%s522_s1 + $0x10] sm:$0xff] }
   0x6   :  { %v224_v7 = vsel %vm222_vm0, %v195_v5, 0  ;;  %227 = vmatpush.bf16.msra.mxu0 %v389_v4  ;;  %v394_v16 = vld [vmem:[%s522_s1 + $0x58] sm:$0xff]  ;;  %v393_v19 = vld [vmem:[%s522_s1 + $0x50] sm:$0xff]  ;;  %v400_v20 = vld [vmem:[%s522_s1 + $0x88] sm:$0xff] }
   0x7   :  { %255 = vmatpush.bf16.msra.mxu2 %v224_v7  ;;  %241 = vmatpush.bf16.msra.mxu1 %v397_v6  ;;  %v384_v21 = vld [vmem:[%s522_s1 + $0x8] sm:$0xff]  ;;  %v399_v23 = vld [vmem:[%s522_s1 + $0x80] sm:$0xff]  ;;  %v382_v26 = vld [vmem:[%s524_s0 + $0x10] sm:$0xf0] }
   0x8   :  { %v392_v22 = vld [vmem:[%s522_s1 + $0x48] sm:$0xff]  ;;  %v383_v24 = vld [vmem:[%s522_s1] sm:$0xff]  ;;  %v283_v31 = vld [vmem:[%s524_s0 + $0xc] sm:$0xf0] }
   0x9   :  { %v289_v25 = vld [vmem:[%s524_s0 + $0x8] sm:$0xf]  ;;  %v281_v27 = vld [vmem:[%s524_s0] sm:$0xf]  ;;  %v381_v28 = vld [vmem:[%s524_s0 + $0x8] sm:$0xf0] }
   0xa   :  { %228 = vmatpush.bf16.msra.mxu0 %v388_v9  ;;  %v391_v29 = vld [vmem:[%s522_s1 + $0x40] sm:$0xff]  ;;  %v290_v32 = vor.u32 %v382_v26, %v289_v25  ;;  %v282_v33 = vor.u32 %v381_v28, %v281_v27 }
   0xb   :  { %256 = vmatpush.bf16.msra.mxu2 %v404_v8  ;;  %242 = vmatpush.bf16.msra.mxu1 %v396_v10  ;;  %v380_v30 = vld [vmem:[%s524_s0 + $0x4] sm:$0xf]  ;;  %v405_v35 = vld [vmem:[%s523_s2] ss:$0 sm:$0xff] }
   0xc   :  { %v286_v34 = vor.u32 %v380_v30, %v283_v31 }
   0xe   :  { %229 = vmatpush.bf16.msra.mxu0 %v387_v12 }
   0xf   :  { %257 = vmatpush.bf16.msra.mxu2 %v403_v11  ;;  %243 = vmatpush.bf16.msra.mxu1 %v395_v13 }
  0x12   :  { %230 = vmatpush.bf16.msra.mxu0 %v386_v15 }
  0x13   :  { %258 = vmatpush.bf16.msra.mxu2 %v402_v14  ;;  %244 = vmatpush.bf16.msra.mxu1 %v394_v16 }
  0x16   :  { %231 = vmatpush.bf16.msra.mxu0 %v385_v18 }
  0x17   :  { %259 = vmatpush.bf16.msra.mxu2 %v401_v17  ;;  %245 = vmatpush.bf16.msra.mxu1 %v393_v19 }
  0x1a   :  { %232 = vmatpush.bf16.msra.mxu0 %v384_v21 }
  0x1b   :  { %260 = vmatpush.bf16.msra.mxu2 %v400_v20  ;;  %246 = vmatpush.bf16.msra.mxu1 %v392_v22 }
  0x1e   :  { %233 = vmatpush.bf16.msra.mxu0 %v383_v24 }
  0x1f   :  { %261 = vmatpush.bf16.msra.mxu2 %v399_v23  ;;  %247 = vmatpush.bf16.msra.mxu1 %v391_v29 }
  0x21   :  { %234 = vmatmul.bf16.vlgmr.msra.gmra.mxu0 %v282_v33 }
  0x22   :  { %379 = vmatmul.msk.bf16.vlgmr.msra.gmra.mxu2 %vm218_vm1, %v290_v32  ;;  %248 = vmatmul.bf16.vlgmr.msra.gmra.mxu1 %v286_v34 }
  0x9e   :  { %v235_v36 = vpop.f32.mrf.mxu0 }
  0x9f   :  { %v236_v37 = vadd.f32 %v405_v35, %v235_v36  ;;  %v249_v38 = vpop.f32.mrf.mxu1 }
  0xa1   :  { %v250_v39 = vadd.f32 %v249_v38, %v236_v37 }
  0xa5   :  { %v263_v40 = vpop.f32.mrf.mxu2 }
  0xa6   :  { %v264_v41 = vadd.f32 %v263_v40, %v250_v39  ;;  %v237_v42 = vpop.f32.mrf.mxu0 }
  0xa7   :  { %v238_v44 = vadd.f32 %v405_v35, %v237_v42  ;;  %v251_v46 = vpop.f32.mrf.mxu1 }
  0xa8   :  { %v268_v43 = vmax.f32 %v264_v41, 0.0 }
  0xa9   :  { %v252_v47 = vadd.f32 %v251_v46, %v238_v44 }
  0xaa   :  { %v270_v45 = vpack.c.bf16 %v268_v43, %v268_v43 }
  0xac   :  { %273 = vst.msk [vmem:[%s525_s3] sm:$0xf] %vm272_vm2, %v270_v45 }
  0xad   :  { %v265_v48 = vpop.f32.mrf.mxu2 }
  0xae   :  { %v266_v49 = vadd.f32 %v265_v48, %v252_v47 }
  0xb0   :  { %v269_v50 = vmax.f32 %v266_v49, 0.0 }
  0xb2   :  { %v271_v51 = vpack.c.bf16 %v269_v50, %v269_v50 }
  0xb4   :  { %274 = vst.msk [vmem:[%s525_s3 + $0x4] sm:$0xf] %vm272_vm2, %v271_v51 }

// kernel: _lambda_.25
= control target key start
LH: loop header
LB: loop body
LE: loop exit
PB: predicated region body
PF: predicated region fallthrough
CT: control target
= control target key end

     0   :  { %vm102_vm0 = vcmask 130048   ;;  %vm188_vm8 = vcmask 125952   ;;  %s336_s1 = inlined_call_operand.vmem [shape: bf16[144,32], index: 1, kind: input, shape index: {}]   ;;  %s337_s0 = inlined_call_operand.vmem [shape: bf16[16,144], index: 0, kind: input, shape index: {}]   ;;  %s338_s2 = inlined_call_operand.vmem [shape: f32[1,32], index: 2, kind: input, shape index: {}]   ;;  %s339_s3 = inlined_call_operand.vmem [shape: bf16[16,16], index: 3, kind: output, shape index: {}]  }
   0x1   :  { %v251_v0 = vld [vmem:[%s336_s1 + $0x38] sm:$0xff]  ;;  %v250_v1 = vld [vmem:[%s336_s1 + $0x30] sm:$0xff]  ;;  %v252_v2 = vld [vmem:[%s336_s1 + $0x40] sm:$0xff] }
   0x2   :  { %106 = vmatpush.bf16.msra.mxu0 %v251_v0  ;;  %v242_v3 = vld [vmem:[%s337_s0 + $0x4] sm:$0xf]  ;;  %v199_v4 = vld [vmem:[%s337_s0 + $0x8] sm:$0xf0]  ;;  %127 = vmatpush.bf16.msra.mxu1 %v252_v2  ;;  %v247_v8 = vld [vmem:[%s336_s1 + $0x18] sm:$0xff] }
   0x3   :  { %v202_v5 = vor.u32 %v242_v3, %v199_v4  ;;  %v249_v6 = vld [vmem:[%s336_s1 + $0x28] sm:$0xff]  ;;  %v248_v7 = vld [vmem:[%s336_s1 + $0x20] sm:$0xff]  ;;  %v246_v9 = vld [vmem:[%s336_s1 + $0x10] sm:$0xff] }
   0x4   :  { %v245_v10 = vld [vmem:[%s336_s1 + $0x8] sm:$0xff]  ;;  %v244_v11 = vld [vmem:[%s336_s1] sm:$0xff]  ;;  %s267_s1 = smov 112  }
   0x5   :  { %239 = vmatmul.msk.bf16.vlgmr.msra.gmra.mxu1 %vm102_vm0, %v202_v5  ;;  %v197_v12 = vld [vmem:[%s337_s0] sm:$0xf]  ;;  %v243_v13 = vld [vmem:[%s337_s0 + $0x4] sm:$0xf0] }
   0x6   :  { %107 = vmatpush.bf16.msra.mxu0 %v250_v1  ;;  %v198_v14 = vor.u32 %v243_v13, %v197_v12  ;;  %v254_v15 = vld [vmem:[%s338_s2] ss:$0 sm:$0xff] }
   0xa   :  { %108 = vmatpush.bf16.msra.mxu0 %v249_v6 }
   0xe   :  { %109 = vmatpush.bf16.msra.mxu0 %v248_v7 }
  0x12   :  { %110 = vmatpush.bf16.msra.mxu0 %v247_v8 }
  0x16   :  { %111 = vmatpush.bf16.msra.mxu0 %v246_v9 }
  0x1a   :  { %112 = vmatpush.bf16.msra.mxu0 %v245_v10 }
  0x1e   :  { %113 = vmatpush.bf16.msra.mxu0 %v244_v11 }
  0x21   :  { %114 = vmatmul.bf16.vlgmr.msra.gmra.mxu0 %v198_v14 }
  0x82   :  { %v129_v16 = vpop.f32.mrf.mxu1 }
  0x8a   :  { %v131_v22 = vpop.f32.mrf.mxu1 }
  0x9e   :  { %v115_v17 = vpop.f32.mrf.mxu0 }
  0x9f   :  { %v116_v18 = vadd.f32 %v254_v15, %v115_v17 }
  0xa1   :  { %v130_v19 = vadd.f32 %v129_v16, %v116_v18 }
  0xa3   :  { %255 = vtanh.f32 %v130_v19  ;;  %v240_v26 = vmul.f32 -1.442695, %v130_v19 }
  0xa6   :  { %v117_v20 = vpop.f32.mrf.mxu0 }
  0xa7   :  { %v118_v21 = vadd.f32 %v254_v15, %v117_v20 }
  0xa9   :  { %v256_v23 = vpop.eup %255  ;;  %v132_v24 = vadd.f32 %v131_v22, %v118_v21 }
  0xaa   :  { %178 = vrot.lane.b32.xlu0 %v256_v23, %s267_s1 }
  0xab   :  { %257 = vtanh.f32 %v132_v24  ;;  %v241_v27 = vmul.f32 -1.442695, %v132_v24 }
  0xac   :  { %259 = vpow2.f32 %v240_v26 }
  0xad   :  { %261 = vpow2.f32 %v241_v27 }
  0xb1   :  { %v258_v25 = vpop.eup %257 }
  0xb2   :  { %180 = vrot.lane.b32.xlu0 %v258_v25, %s267_s1  ;;  %v260_v28 = vpop.eup %259 }
  0xb3   :  { %v140_v29 = vadd.f32 1.0, %v260_v28  ;;  %v262_v30 = vpop.eup %261 }
  0xb4   :  { %v141_v31 = vadd.f32 1.0, %v262_v30 }
  0xb5   :  { %263 = vrcp.f32 %v140_v29  ;;  %v153_v40 = vand.u32 2147483648, %v140_v29  ;;  %vm147_vm2 = vweird.f32 %v140_v29  ;;  %v151_v41 = vand.u32 2147483647, %v140_v29 }
  0xb6   :  { %265 = vrcp.f32 %v141_v31  ;;  %v168_v47 = vand.u32 2147483648, %v141_v31  ;;  %vm162_vm6 = vweird.f32 %v141_v31  ;;  %v166_v49 = vand.u32 2147483647, %v141_v31 }
  0xb7   :  { %v154_v44 = vor.u32 1.1754944e-38, %v153_v40  ;;  %vm152_vm4 = vcmp.eq.f32.partialorder %v151_v41, 8.507059e+37 }
  0xb8   :  { %v169_v53 = vor.u32 1.1754944e-38, %v168_v47  ;;  %vm167_vm9 = vcmp.eq.f32.partialorder %v166_v49, 8.507059e+37 }
  0xbb   :  { %v264_v32 = vpop.eup %263 }
  0xbc   :  { %v143_v33 = vmul.f32 %v264_v32, %v140_v29  ;;  %v266_v35 = vpop.eup %265  ;;  %vm148_vm1 = vweird.f32 %v264_v32 }
  0xbd   :  { %v158_v37 = vmul.f32 %v266_v35, %v141_v31  ;;  %vm149_vm3 = vmor %vm147_vm2, %vm148_vm1  ;;  %vm163_vm5 = vweird.f32 %v266_v35 }
  0xbe   :  { %v144_v34 = vsub.f32 1.0, %v143_v33  ;;  %vm164_vm7 = vmor %vm162_vm6, %vm163_vm5 }
  0xbf   :  { %v159_v39 = vsub.f32 1.0, %v158_v37 }
  0xc0   :  { %v145_v36 = vmul.f32 %v264_v32, %v144_v34 }
  0xc1   :  { %v160_v43 = vmul.f32 %v266_v35, %v159_v39 }
  0xc2   :  { %v146_v38 = vadd.f32 %v264_v32, %v145_v36 }
  0xc3   :  { %v161_v46 = vadd.f32 %v266_v35, %v160_v43 }
  0xc4   :  { %v150_v42 = vsel %vm149_vm3, %v264_v32, %v146_v38 }
  0xc5   :  { %v155_v45 = vsel %vm152_vm4, %v154_v44, %v150_v42  ;;  %v165_v52 = vsel %vm164_vm7, %v266_v35, %v161_v46 }
  0xc6   :  { %v174_v48 = vsub.f32 1.0, %v155_v45  ;;  %v170_v55 = vsel %vm167_vm9, %v169_v53, %v165_v52 }
  0xc7   :  { %v175_v56 = vsub.f32 1.0, %v170_v55 }
 0x11c   :  { %v179_v50 = vpop.permute.xlu0 %178 }
 0x11d   :  { %v184_v51 = vmul.f32 %v179_v50, %v174_v48 }
 0x11f   :  { %v186_v54 = vpack.c.bf16 %v184_v51, %v184_v51 }
 0x121   :  { %189 = vst.msk [vmem:[%s339_s3] sm:$0xf] %vm188_vm8, %v186_v54 }
 0x124   :  { %v181_v57 = vpop.permute.xlu0 %180 }
 0x125   :  { %v185_v58 = vmul.f32 %v181_v57, %v175_v56 }
 0x127   :  { %v187_v59 = vpack.c.bf16 %v185_v58, %v185_v58 }
 0x129   :  { %190 = vst.msk [vmem:[%s339_s3 + $0x4] sm:$0xf] %vm188_vm8, %v187_v59 }

// kernel: _lambda_.26
= control target key start
LH: loop header
LB: loop body
LE: loop exit
PB: predicated region body
PF: predicated region fallthrough
CT: control target
= control target key end

     0   :  { %vm184_vm0 = vcmask 1043456   ;;  %vm171_vm1 = vcmask 719872   ;;  %vm262_vm2 = vcmask 60416   ;;  %s548_s1 = inlined_call_operand.vmem [shape: bf16[216,8], index: 1, kind: input, shape index: {}]   ;;  %s549_s2 = inlined_call_operand.vmem [shape: f32[1,8], index: 2, kind: input, shape index: {}]   ;;  %s550_s0 = inlined_call_operand.vmem [shape: bf16[64,216], index: 0, kind: input, shape index: {}]   ;;  %s551_s3 = inlined_call_operand.vmem [shape: bf16[64,8], index: 3, kind: output, shape index: {}]  }
   0x1   :  { %v378_v0 = vld [vmem:[%s548_s1 + $0x38] sm:$0xff]  ;;  %v49_v1 = vld [vmem:[%s548_s1 + $0x68] sm:$0xf]  ;;  %v377_v3 = vld [vmem:[%s548_s1 + $0x30] sm:$0xff] }
   0x2   :  { %v143_v2 = vunpack.c.l.b16 %v49_v1  ;;  %188 = vmatpush.bf16.msra.mxu0 %v378_v0  ;;  %384 = vmatpush.bf16.msra.mxu2 %v378_v0  ;;  %v383_v6 = vld [vmem:[%s548_s1 + $0x60] sm:$0xff]  ;;  %v376_v7 = vld [vmem:[%s548_s1 + $0x28] sm:$0xff]  ;;  %v382_v8 = vld [vmem:[%s548_s1 + $0x58] sm:$0xff] }
   0x3   :  { %v375_v9 = vld [vmem:[%s548_s1 + $0x20] sm:$0xff]  ;;  %v381_v10 = vld [vmem:[%s548_s1 + $0x50] sm:$0xff]  ;;  %v374_v11 = vld [vmem:[%s548_s1 + $0x18] sm:$0xff] }
   0x4   :  { %v157_v4 = vpack.c.b16 %v143_v2, %v143_v2  ;;  %v380_v12 = vld [vmem:[%s548_s1 + $0x48] sm:$0xff]  ;;  %v373_v13 = vld [vmem:[%s548_s1 + $0x10] sm:$0xff]  ;;  %v379_v14 = vld [vmem:[%s548_s1 + $0x40] sm:$0xff] }
   0x5   :  { %v372_v15 = vld [vmem:[%s548_s1 + $0x8] sm:$0xff]  ;;  %v365_v16 = vld [vmem:[%s550_s0 + $0x14] sm:$0xf]  ;;  %v287_v17 = vld [vmem:[%s550_s0 + $0x18] sm:$0xf0] }
   0x6   :  { %v186_v5 = vsel %vm184_vm0, %v157_v4, 0  ;;  %189 = vmatpush.bf16.msra.mxu0 %v377_v3  ;;  %385 = vmatpush.bf16.msra.mxu2 %v377_v3  ;;  %v363_v18 = vld [vmem:[%s550_s0 + $0x4] sm:$0xf]  ;;  %v279_v19 = vld [vmem:[%s550_s0 + $0x8] sm:$0xf0]  ;;  %v290_v20 = vor.u32 %v365_v16, %v287_v17 }
   0x7   :  { %392 = vmatpush.bf16.msra.mxu3 %v186_v5  ;;  %219 = vmatpush.bf16.msra.mxu1 %v186_v5  ;;  %v371_v21 = vld [vmem:[%s548_s1] sm:$0xff]  ;;  %v364_v23 = vld [vmem:[%s550_s0 + $0x4] sm:$0xf0]  ;;  %v282_v24 = vor.u32 %v363_v18, %v279_v19  ;;  %v295_v30 = vld [vmem:[%s550_s0 + $0x28] sm:$0xf0] }
   0x8   :  { %v277_v22 = vld [vmem:[%s550_s0] sm:$0xf]  ;;  %v368_v26 = vld [vmem:[%s550_s0 + $0x24] sm:$0xf0]  ;;  %v367_v29 = vld [vmem:[%s550_s0 + $0x24] sm:$0xf] }
   0x9   :  { %v293_v25 = vld [vmem:[%s550_s0 + $0x20] sm:$0xf]  ;;  %v278_v27 = vor.u32 %v364_v23, %v277_v22  ;;  %v298_v31 = vor.u32 %v367_v29, %v295_v30  ;;  %v285_v32 = vld [vmem:[%s550_s0 + $0x10] sm:$0xf]  ;;  %v366_v33 = vld [vmem:[%s550_s0 + $0x14] sm:$0xf0] }
   0xa   :  { %190 = vmatpush.bf16.msra.mxu0 %v376_v7  ;;  %386 = vmatpush.bf16.msra.mxu2 %v376_v7  ;;  %v294_v28 = vor.u32 %v368_v26, %v293_v25  ;;  %v301_v34 = vld [vmem:[%s550_s0 + $0x30] sm:$0xf]  ;;  %v370_v35 = vld [vmem:[%s550_s0 + $0x34] sm:$0xf0]  ;;  %v286_v36 = vor.u32 %v366_v33, %v285_v32  ;;  %v369_v38 = vld [vmem:[%s550_s0 + $0x34] sm:$0xf] }
   0xb   :  { %393 = vmatpush.bf16.msra.mxu3 %v383_v6  ;;  %220 = vmatpush.bf16.msra.mxu1 %v383_v6  ;;  %v302_v37 = vor.u32 %v370_v35, %v301_v34  ;;  %v303_v39 = vld [vmem:[%s550_s0 + $0x38] sm:$0xf0]  ;;  %v398_v41 = vld [vmem:[%s549_s2] ss:$0 sm:$0xff] }
   0xc   :  { %v306_v40 = vor.u32 %v369_v38, %v303_v39 }
   0xe   :  { %191 = vmatpush.bf16.msra.mxu0 %v375_v9  ;;  %387 = vmatpush.bf16.msra.mxu2 %v375_v9 }
   0xf   :  { %394 = vmatpush.bf16.msra.mxu3 %v382_v8  ;;  %221 = vmatpush.bf16.msra.mxu1 %v382_v8 }
  0x12   :  { %192 = vmatpush.bf16.msra.mxu0 %v374_v11  ;;  %388 = vmatpush.bf16.msra.mxu2 %v374_v11 }
  0x13   :  { %395 = vmatpush.bf16.msra.mxu3 %v381_v10  ;;  %222 = vmatpush.bf16.msra.mxu1 %v381_v10 }
  0x16   :  { %193 = vmatpush.bf16.msra.mxu0 %v373_v13  ;;  %389 = vmatpush.bf16.msra.mxu2 %v373_v13 }
  0x17   :  { %396 = vmatpush.bf16.msra.mxu3 %v380_v12  ;;  %223 = vmatpush.bf16.msra.mxu1 %v380_v12 }
  0x1a   :  { %194 = vmatpush.bf16.msra.mxu0 %v372_v15  ;;  %390 = vmatpush.bf16.msra.mxu2 %v372_v15 }
  0x1b   :  { %397 = vmatpush.bf16.msra.mxu3 %v379_v14  ;;  %224 = vmatpush.bf16.msra.mxu1 %v379_v14 }
  0x1e   :  { %360 = vmatmul.msk.bf16.vlgmr.msra.gmra.mxu3 %vm171_vm1, %v290_v20  ;;  %195 = vmatpush.bf16.msra.mxu0 %v371_v21 }
  0x1f   :  { %359 = vmatmul.msk.bf16.vlgmr.msra.gmra.mxu1 %vm171_vm1, %v282_v24  ;;  %391 = vmatpush.bf16.msra.mxu2 %v371_v21 }
  0x21   :  { %196 = vmatmul.bf16.vlgmr.msra.gmra.mxu0 %v278_v27 }
  0x22   :  { %206 = vmatmul.bf16.vlgmr.msra.gmra.mxu2 %v294_v28 }
  0x2e   :  { %361 = vmatmul.msk.bf16.gmra.mxu3 %vm171_vm1, %v298_v31 }
  0x31   :  { %201 = vmatmul.bf16.gmra.mxu0 %v286_v36 }
  0x32   :  { %211 = vmatmul.bf16.gmra.mxu2 %v302_v37 }
  0x3e   :  { %362 = vmatmul.msk.bf16.gmra.mxu3 %vm171_vm1, %v306_v40 }
  0x9c   :  { %v226_v42 = vpop.f32.mrf.mxu1 }
  0x9e   :  { %v197_v43 = vpop.f32.mrf.mxu0 }
  0x9f   :  { %v198_v44 = vadd.f32 %v398_v41, %v197_v43 }
  0xa1   :  { %v231_v45 = vpop.f32.mrf.mxu3  ;;  %v227_v46 = vadd.f32 %v226_v42, %v198_v44 }
  0xa3   :  { %v246_v47 = vmax.f32 %v227_v46, 0.0 }
  0xa4   :  { %v228_v49 = vpop.f32.mrf.mxu1 }
  0xa5   :  { %v254_v48 = vpack.c.bf16 %v246_v47, %v246_v47  ;;  %v207_v50 = vpop.f32.mrf.mxu2 }
  0xa6   :  { %v199_v51 = vpop.f32.mrf.mxu0  ;;  %v208_v56 = vadd.f32 %v398_v41, %v207_v50 }
  0xa7   :  { %v200_v52 = vadd.f32 %v398_v41, %v199_v51  ;;  %263 = vst.msk [vmem:[%s551_s3] sm:$0xf] %vm262_vm2, %v254_v48 }
  0xa9   :  { %v233_v53 = vpop.f32.mrf.mxu3  ;;  %v229_v54 = vadd.f32 %v228_v49, %v200_v52 }
  0xab   :  { %v247_v55 = vmax.f32 %v229_v54, 0.0 }
  0xad   :  { %v255_v57 = vpack.c.bf16 %v247_v55, %v247_v55  ;;  %v209_v60 = vpop.f32.mrf.mxu2 }
  0xae   :  { %v202_v58 = vpop.f32.mrf.mxu0  ;;  %v210_v5 = vadd.f32 %v398_v41, %v209_v60 }
  0xaf   :  { %v203_v59 = vadd.f32 %v398_v41, %v202_v58  ;;  %264 = vst.msk [vmem:[%s551_s3 + $0x4] sm:$0xf] %vm262_vm2, %v255_v57 }
  0xb1   :  { %v236_v61 = vpop.f32.mrf.mxu3  ;;  %v232_v62 = vadd.f32 %v231_v45, %v203_v59 }
  0xb2   :  { %v237_v63 = vadd.f32 %v236_v61, %v208_v56 }
  0xb3   :  { %v248_v0 = vmax.f32 %v232_v62, 0.0 }
  0xb4   :  { %v250_v1 = vmax.f32 %v237_v63, 0.0 }
  0xb5   :  { %v256_v2 = vpack.c.bf16 %v248_v0, %v248_v0  ;;  %v212_v10 = vpop.f32.mrf.mxu2 }
  0xb6   :  { %v258_v3 = vpack.c.bf16 %v250_v1, %v250_v1  ;;  %v204_v4 = vpop.f32.mrf.mxu0  ;;  %v213_v13 = vadd.f32 %v398_v41, %v212_v10 }
  0xb7   :  { %265 = vst.msk [vmem:[%s551_s3 + $0x8] sm:$0xf] %vm262_vm2, %v256_v2  ;;  %v205_v6 = vadd.f32 %v398_v41, %v204_v4 }
  0xb8   :  { %267 = vst.msk [vmem:[%s551_s3 + $0x10] sm:$0xf] %vm262_vm2, %v258_v3 }
  0xb9   :  { %v238_v7 = vpop.f32.mrf.mxu3  ;;  %v234_v8 = vadd.f32 %v233_v53, %v205_v6 }
  0xba   :  { %v239_v9 = vadd.f32 %v238_v7, %v210_v5 }
  0xbb   :  { %v249_v11 = vmax.f32 %v234_v8, 0.0 }
  0xbc   :  { %v251_v12 = vmax.f32 %v239_v9, 0.0 }
  0xbd   :  { %v257_v14 = vpack.c.bf16 %v249_v11, %v249_v11  ;;  %v214_v19 = vpop.f32.mrf.mxu2 }
  0xbe   :  { %v259_v15 = vpack.c.bf16 %v251_v12, %v251_v12  ;;  %v215_v21 = vadd.f32 %v398_v41, %v214_v19 }
  0xbf   :  { %266 = vst.msk [vmem:[%s551_s3 + $0xc] sm:$0xf] %vm262_vm2, %v257_v14 }
  0xc0   :  { %268 = vst.msk [vmem:[%s551_s3 + $0x14] sm:$0xf] %vm262_vm2, %v259_v15 }
  0xc1   :  { %v241_v16 = vpop.f32.mrf.mxu3 }
  0xc2   :  { %v242_v17 = vadd.f32 %v241_v16, %v213_v13 }
  0xc4   :  { %v252_v18 = vmax.f32 %v242_v17, 0.0 }
  0xc6   :  { %v260_v20 = vpack.c.bf16 %v252_v18, %v252_v18 }
  0xc8   :  { %269 = vst.msk [vmem:[%s551_s3 + $0x18] sm:$0xf] %vm262_vm2, %v260_v20 }
  0xc9   :  { %v243_v22 = vpop.f32.mrf.mxu3 }
  0xca   :  { %v244_v23 = vadd.f32 %v243_v22, %v215_v21 }
  0xcc   :  { %v253_v24 = vmax.f32 %v244_v23, 0.0 }
  0xce   :  { %v261_v25 = vpack.c.bf16 %v253_v24, %v253_v24 }
  0xd0   :  { %270 = vst.msk [vmem:[%s551_s3 + $0x1c] sm:$0xf] %vm262_vm2, %v261_v25 }

// kernel: _lambda_.27
= control target key start
LH: loop header
LB: loop body
LE: loop exit
PB: predicated region body
PF: predicated region fallthrough
CT: control target
= control target key end

     0   :  { %vm96_vm0 = vcmask 1043456   ;;  %vm83_vm1 = vcmask 588800   ;;  %vm345_vm8 = vcmask 60416   ;;  %s668_s1 = inlined_call_operand.vmem [shape: bf16[72,16], index: 1, kind: input, shape index: {}]   ;;  %s669_s2 = inlined_call_operand.vmem [shape: f32[1,16], index: 2, kind: input, shape index: {}]   ;;  %s670_s0 = inlined_call_operand.vmem [shape: bf16[64,72], index: 0, kind: input, shape index: {}]   ;;  %s671_s3 = inlined_call_operand.vmem [shape: bf16[64,8], index: 3, kind: output, shape index: {}]  }
   0x1   :  { %v31_v0 = vld [vmem:[%s668_s1 + $0x20] sm:$0xf]  ;;  %v409_v4 = vld [vmem:[%s668_s1 + $0x18] sm:$0xff]  ;;  %v408_v5 = vld [vmem:[%s668_s1 + $0x10] sm:$0xff] }
   0x2   :  { %v73_v1 = vunpack.c.l.b16 %v31_v0  ;;  %v407_v6 = vld [vmem:[%s668_s1 + $0x8] sm:$0xff]  ;;  %v406_v7 = vld [vmem:[%s668_s1] sm:$0xff]  ;;  %v404_v10 = vld [vmem:[%s670_s0 + $0x10] sm:$0xff] }
   0x3   :  { %v402_v8 = vld [vmem:[%s670_s0] sm:$0xff]  ;;  %v403_v9 = vld [vmem:[%s670_s0 + $0x8] sm:$0xff]  ;;  %v405_v11 = vld [vmem:[%s670_s0 + $0x18] sm:$0xff]  ;;  %s475_s0 = smov 120  }
   0x4   :  { %v78_v2 = vpack.c.b16 %v73_v1, %v73_v1  ;;  %v426_v12 = vld [vmem:[%s669_s2] ss:$0 sm:$0xff] }
   0x6   :  { %v98_v3 = vsel %vm96_vm0, %v78_v2, 0 }
   0x7   :  { %103 = vmatpush.bf16.msra.mxu0 %v98_v3  ;;  %410 = vmatpush.bf16.msra.mxu1 %v98_v3 }
   0x8   :  { %411 = vmatpush.bf16.msra.mxu2 %v98_v3  ;;  %412 = vmatpush.bf16.msra.mxu3 %v98_v3 }
   0xb   :  { %104 = vmatpush.bf16.msra.mxu0 %v409_v4  ;;  %413 = vmatpush.bf16.msra.mxu1 %v409_v4 }
   0xc   :  { %414 = vmatpush.bf16.msra.mxu2 %v409_v4  ;;  %415 = vmatpush.bf16.msra.mxu3 %v409_v4 }
   0xf   :  { %105 = vmatpush.bf16.msra.mxu0 %v408_v5  ;;  %416 = vmatpush.bf16.msra.mxu1 %v408_v5 }
  0x10   :  { %417 = vmatpush.bf16.msra.mxu2 %v408_v5  ;;  %418 = vmatpush.bf16.msra.mxu3 %v408_v5 }
  0x13   :  { %106 = vmatpush.bf16.msra.mxu0 %v407_v6  ;;  %419 = vmatpush.bf16.msra.mxu1 %v407_v6 }
  0x14   :  { %420 = vmatpush.bf16.msra.mxu2 %v407_v6  ;;  %421 = vmatpush.bf16.msra.mxu3 %v407_v6 }
  0x17   :  { %107 = vmatpush.bf16.msra.mxu0 %v406_v7  ;;  %422 = vmatpush.bf16.msra.mxu1 %v406_v7 }
  0x18   :  { %423 = vmatpush.bf16.msra.mxu2 %v406_v7  ;;  %424 = vmatpush.bf16.msra.mxu3 %v406_v7 }
  0x1a   :  { %390 = vmatmul.msk.bf16.vlgmr.msra.gmra.mxu0 %vm83_vm1, %v402_v8  ;;  %391 = vmatmul.msk.bf16.vlgmr.msra.gmra.mxu1 %vm83_vm1, %v403_v9 }
  0x1b   :  { %392 = vmatmul.msk.bf16.vlgmr.msra.gmra.mxu2 %vm83_vm1, %v404_v10  ;;  %393 = vmatmul.msk.bf16.vlgmr.msra.gmra.mxu3 %vm83_vm1, %v405_v11 }
  0x97   :  { %v109_v13 = vpop.f32.mrf.mxu0  ;;  %v114_v14 = vpop.f32.mrf.mxu1 }
  0x98   :  { %v110_v15 = vadd.f32 %v426_v12, %v109_v13  ;;  %v115_v16 = vadd.f32 %v426_v12, %v114_v14 }
  0x9a   :  { %427 = vtanh.f32 %v110_v15  ;;  %v394_v41 = vmul.f32 -1.442695, %v110_v15  ;;  %v396_v42 = vmul.f32 -1.442695, %v115_v16 }
  0x9b   :  { %429 = vtanh.f32 %v115_v16 }
  0x9e   :  { %v119_v17 = vpop.f32.mrf.mxu2  ;;  %v124_v21 = vpop.f32.mrf.mxu3 }
  0x9f   :  { %v120_v18 = vadd.f32 %v426_v12, %v119_v17  ;;  %v111_v22 = vpop.f32.mrf.mxu0  ;;  %v116_v23 = vpop.f32.mrf.mxu1  ;;  %v125_v31 = vadd.f32 %v426_v12, %v124_v21 }
  0xa0   :  { %v428_v19 = vpop.eup %427  ;;  %v112_v24 = vadd.f32 %v426_v12, %v111_v22  ;;  %v117_v25 = vadd.f32 %v426_v12, %v116_v23 }
  0xa1   :  { %v430_v20 = vpop.eup %429  ;;  %431 = vtanh.f32 %v120_v18  ;;  %305 = vrot.lane.b32.xlu0 %v428_v19, %s475_s0  ;;  %v398_v37 = vmul.f32 -1.442695, %v120_v18  ;;  %v400_v60 = vmul.f32 -1.442695, %v125_v31 }
  0xa2   :  { %309 = vrot.lane.b32.xlu1 %v430_v20, %s475_s0  ;;  %433 = vtanh.f32 %v112_v24  ;;  %v395_v52 = vmul.f32 -1.442695, %v112_v24  ;;  %v397_v53 = vmul.f32 -1.442695, %v117_v25 }
  0xa3   :  { %435 = vtanh.f32 %v117_v25 }
  0xa6   :  { %v121_v27 = vpop.f32.mrf.mxu2  ;;  %v126_v29 = vpop.f32.mrf.mxu3 }
  0xa7   :  { %v432_v26 = vpop.eup %431  ;;  %v122_v28 = vadd.f32 %v426_v12, %v121_v27  ;;  %v127_v32 = vadd.f32 %v426_v12, %v126_v29 }
  0xa8   :  { %313 = vrot.lane.b32.xlu2 %v432_v26, %s475_s0  ;;  %v434_v30 = vpop.eup %433 }
  0xa9   :  { %437 = vtanh.f32 %v122_v28  ;;  %307 = vrot.lane.b32.xlu0 %v434_v30, %s475_s0  ;;  %v436_v33 = vpop.eup %435  ;;  %v399_v39 = vmul.f32 -1.442695, %v122_v28  ;;  %v401_v1 = vmul.f32 -1.442695, %v127_v32 }
  0xaa   :  { %439 = vtanh.f32 %v125_v31  ;;  %311 = vrot.lane.b32.xlu1 %v436_v33, %s475_s0 }
  0xab   :  { %441 = vtanh.f32 %v127_v32 }
  0xac   :  { %443 = vpow2.f32 %v398_v37 }
  0xad   :  { %445 = vpow2.f32 %v399_v39 }
  0xaf   :  { %v438_v34 = vpop.eup %437 }
  0xb0   :  { %315 = vrot.lane.b32.xlu2 %v438_v34, %s475_s0  ;;  %v440_v35 = vpop.eup %439 }
  0xb1   :  { %317 = vrot.lane.b32.xlu0 %v440_v35, %s475_s0  ;;  %v442_v36 = vpop.eup %441 }
  0xb2   :  { %319 = vrot.lane.b32.xlu1 %v442_v36, %s475_s0  ;;  %v444_v38 = vpop.eup %443 }
  0xb3   :  { %v157_v40 = vadd.f32 1.0, %v444_v38  ;;  %v446_v43 = vpop.eup %445 }
  0xb4   :  { %v526_v46 = vadd.f32 1.0, %v446_v43 }
  0xb5   :  { %447 = vrcp.f32 %v157_v40  ;;  %vm226_vm2 = vweird.f32 %v157_v40  ;;  %v232_v56 = vand.u32 2147483648, %v157_v40  ;;  %v230_v58 = vand.u32 2147483647, %v157_v40 }
  0xb6   :  { %449 = vpow2.f32 %v394_v41  ;;  %vm241_vm6 = vweird.f32 %v526_v46  ;;  %v247_v18 = vand.u32 2147483648, %v526_v46  ;;  %v245_v21 = vand.u32 2147483647, %v526_v46 }
  0xb7   :  { %451 = vpow2.f32 %v396_v42  ;;  %v233_v2 = vor.u32 1.1754944e-38, %v232_v56  ;;  %vm231_vm5 = vcmp.eq.f32.partialorder %v230_v58, 8.507059e+37 }
  0xb8   :  { %453 = vrcp.f32 %v526_v46  ;;  %v248_v29 = vor.u32 1.1754944e-38, %v247_v18  ;;  %vm246_vm10 = vcmp.eq.f32.partialorder %v245_v21, 8.507059e+37 }
  0xbb   :  { %v448_v44 = vpop.eup %447 }
  0xbc   :  { %v450_v45 = vpop.eup %449  ;;  %v222_v47 = vmul.f32 %v448_v44, %v157_v40  ;;  %vm227_vm3 = vweird.f32 %v448_v44 }
  0xbd   :  { %v452_v48 = vpop.eup %451  ;;  %v528_v49 = vadd.f32 1.0, %v450_v45  ;;  %vm539_vm4 = vmor %vm226_vm2, %vm227_vm3 }
  0xbe   :  { %v530_v50 = vadd.f32 1.0, %v452_v48  ;;  %v223_v51 = vsub.f32 1.0, %v222_v47  ;;  %v535_v55 = vpop.eup %453 }
  0xbf   :  { %455 = vrcp.f32 %v528_v49  ;;  %v237_v62 = vmul.f32 %v535_v55, %v526_v46  ;;  %vm242_vm7 = vweird.f32 %v535_v55  ;;  %v172_v34 = vand.u32 2147483648, %v528_v49 }
  0xc0   :  { %457 = vrcp.f32 %v530_v50  ;;  %v224_v54 = vmul.f32 %v448_v44, %v223_v51  ;;  %vm568_vm9 = vmor %vm241_vm6, %vm242_vm7  ;;  %v202_v35 = vand.u32 2147483648, %v530_v50  ;;  %vm166_vm13 = vweird.f32 %v528_v49 }
  0xc1   :  { %459 = vpow2.f32 %v395_v52  ;;  %v238_v5 = vsub.f32 1.0, %v237_v62  ;;  %v170_v36 = vand.u32 2147483647, %v528_v49  ;;  %vm196_vm14 = vweird.f32 %v530_v50 }
  0xc2   :  { %461 = vpow2.f32 %v397_v53  ;;  %v225_v57 = vadd.f32 %v448_v44, %v224_v54  ;;  %v200_v39 = vand.u32 2147483647, %v530_v50  ;;  %v173_v43 = vor.u32 1.1754944e-38, %v172_v34 }
  0xc3   :  { %463 = vpow2.f32 %v400_v60  ;;  %v239_v11 = vmul.f32 %v535_v55, %v238_v5  ;;  %v203_v45 = vor.u32 1.1754944e-38, %v202_v35  ;;  %vm171_vm1 = vcmp.eq.f32.partialorder %v170_v36, 8.507059e+37 }
  0xc4   :  { %v229_v3 = vsel %vm539_vm4, %v448_v44, %v225_v57  ;;  %465 = vpow2.f32 %v401_v1  ;;  %vm201_vm2 = vcmp.eq.f32.partialorder %v200_v39, 8.507059e+37 }
  0xc5   :  { %v537_v59 = vpop.eup %455  ;;  %v234_v9 = vsel %vm231_vm5, %v233_v2, %v229_v3  ;;  %v240_v20 = vadd.f32 %v535_v55, %v239_v11 }
  0xc6   :  { %v545_v63 = vpop.eup %457  ;;  %v162_v6 = vmul.f32 %v537_v59, %v528_v49  ;;  %v293_v13 = vsub.f32 1.0, %v234_v9  ;;  %vm167_vm11 = vweird.f32 %v537_v59 }
  0xc7   :  { %v460_v0 = vpop.eup %459  ;;  %v192_v8 = vmul.f32 %v545_v63, %v530_v50  ;;  %v244_v30 = vsel %vm568_vm9, %v535_v55, %v240_v20  ;;  %vm197_vm12 = vweird.f32 %v545_v63  ;;  %vm168_vm15 = vmor %vm166_vm13, %vm167_vm11 }
  0xc8   :  { %v462_v4 = vpop.eup %461  ;;  %v551_v7 = vadd.f32 1.0, %v460_v0  ;;  %v163_v12 = vsub.f32 1.0, %v162_v6  ;;  %v249_v38 = vsel %vm246_vm10, %v248_v29, %v244_v30  ;;  %vm198_vm0 = vmor %vm196_vm14, %vm197_vm12 }
  0xc9   :  { %v555_v10 = vadd.f32 1.0, %v462_v4  ;;  %v193_v14 = vsub.f32 1.0, %v192_v8  ;;  %v464_v15 = vpop.eup %463  ;;  %v294_v44 = vsub.f32 1.0, %v249_v38 }
  0xca   :  { %467 = vrcp.f32 %v551_v7  ;;  %v466_v19 = vpop.eup %465  ;;  %v164_v22 = vmul.f32 %v537_v59, %v163_v12  ;;  %v566_v23 = vadd.f32 1.0, %v464_v15  ;;  %vm181_vm4 = vweird.f32 %v551_v7 }
  0xcb   :  { %469 = vrcp.f32 %v555_v10  ;;  %v194_v26 = vmul.f32 %v545_v63, %v193_v14  ;;  %v575_v28 = vadd.f32 1.0, %v466_v19  ;;  %v187_v5 = vand.u32 2147483648, %v551_v7 }
  0xcc   :  { %v165_v31 = vadd.f32 %v537_v59, %v164_v22  ;;  %471 = vrcp.f32 %v566_v23  ;;  %v185_v8 = vand.u32 2147483647, %v551_v7  ;;  %v217_v11 = vand.u32 2147483648, %v555_v10 }
  0xcd   :  { %v195_v33 = vadd.f32 %v545_v63, %v194_v26  ;;  %473 = vrcp.f32 %v575_v28  ;;  %vm211_vm7 = vweird.f32 %v555_v10  ;;  %v215_v12 = vand.u32 2147483647, %v555_v10 }
  0xce   :  { %v169_v40 = vsel %vm168_vm15, %v537_v59, %v165_v31  ;;  %v188_v15 = vor.u32 1.1754944e-38, %v187_v5  ;;  %vm186_vm10 = vcmp.eq.f32.partialorder %v185_v8, 8.507059e+37  ;;  %vm256_vm13 = vweird.f32 %v566_v23 }
  0xcf   :  { %v199_v42 = vsel %vm198_vm0, %v545_v63, %v195_v33  ;;  %v174_v49 = vsel %vm171_vm1, %v173_v43, %v169_v40  ;;  %vm216_vm11 = vcmp.eq.f32.partialorder %v215_v12, 8.507059e+37  ;;  %vm271_vm15 = vweird.f32 %v575_v28 }
  0xd0   :  { %v573_v27 = vpop.eup %467  ;;  %v204_v51 = vsel %vm201_vm2, %v203_v45, %v199_v42  ;;  %v289_v55 = vsub.f32 1.0, %v174_v49  ;;  %v277_v26 = vand.u32 2147483648, %v575_v28  ;;  %v275_v30 = vand.u32 2147483647, %v575_v28 }
  0xd1   :  { %v586_v32 = vpop.eup %469  ;;  %v177_v37 = vmul.f32 %v573_v27, %v551_v7  ;;  %v291_v58 = vsub.f32 1.0, %v204_v51  ;;  %vm182_vm3 = vweird.f32 %v573_v27 }
  0xd2   :  { %v207_v41 = vmul.f32 %v586_v32, %v555_v10  ;;  %v604_v47 = vpop.eup %471  ;;  %vm212_vm5 = vweird.f32 %v586_v32  ;;  %vm183_vm6 = vmor %vm181_vm4, %vm182_vm3  ;;  %v262_v10 = vand.u32 2147483648, %v566_v23  ;;  %vm276_vm3 = vcmp.eq.f32.partialorder %v275_v30, 8.507059e+37 }
  0xd3   :  { %v178_v46 = vsub.f32 1.0, %v177_v37  ;;  %v606_v53 = vpop.eup %473  ;;  %v252_v57 = vmul.f32 %v604_v47, %v566_v23  ;;  %vm213_vm9 = vmor %vm211_vm7, %vm212_vm5  ;;  %vm257_vm12 = vweird.f32 %v604_v47 }
  0xd4   :  { %v208_v52 = vsub.f32 1.0, %v207_v41  ;;  %v267_v63 = vmul.f32 %v606_v53, %v575_v28  ;;  %vm272_vm14 = vweird.f32 %v606_v53  ;;  %vm258_vm0 = vmor %vm256_vm13, %vm257_vm12  ;;  %v263_v33 = vor.u32 1.1754944e-38, %v262_v10 }
  0xd5   :  { %v179_v56 = vmul.f32 %v573_v27, %v178_v46  ;;  %v253_v3 = vsub.f32 1.0, %v252_v57  ;;  %vm273_vm1 = vmor %vm271_vm15, %vm272_vm14 }
  0xd6   :  { %v209_v62 = vmul.f32 %v586_v32, %v208_v52  ;;  %v268_v9 = vsub.f32 1.0, %v267_v63 }
  0xd7   :  { %v180_v2 = vadd.f32 %v573_v27, %v179_v56  ;;  %v254_v14 = vmul.f32 %v604_v47, %v253_v3 }
  0xd8   :  { %v210_v6 = vadd.f32 %v586_v32, %v209_v62 }
  0xd9   :  { %v255_v19 = vadd.f32 %v604_v47, %v254_v14 }
  0xda   :  { %v214_v7 = vsel %vm213_vm9, %v586_v32, %v210_v6 }
  0xdb   :  { %v259_v31 = vsel %vm258_vm0, %v604_v47, %v255_v19 }
 0x102   :  { %v314_v16 = vpop.permute.xlu2 %313 }
 0x103   :  { %v333_v17 = vmul.f32 %v314_v16, %v293_v13  ;;  %v184_v13 = vsel %vm183_vm6, %v573_v27, %v180_v2  ;;  %v269_v16 = vmul.f32 %v606_v53, %v268_v9 }
 0x104   :  { %v189_v18 = vsel %vm186_vm10, %v188_v15, %v184_v13 }
 0x105   :  { %v341_v24 = vpack.c.bf16 %v333_v17, %v333_v17  ;;  %v218_v17 = vor.u32 1.1754944e-38, %v217_v11  ;;  %v290_v21 = vsub.f32 1.0, %v189_v18  ;;  %v270_v22 = vadd.f32 %v606_v53, %v269_v16 }
 0x107   :  { %350 = vst.msk [vmem:[%s671_s3 + $0x10] sm:$0xf] %vm345_vm8, %v341_v24  ;;  %v219_v20 = vsel %vm216_vm11, %v218_v17, %v214_v7  ;;  %v260_v24 = vand.u32 2147483647, %v566_v23  ;;  %v274_v36 = vsel %vm273_vm1, %v606_v53, %v270_v22  ;;  %v278_v23 = vor.u32 1.1754944e-38, %v277_v26 }
 0x108   :  { %v292_v27 = vsub.f32 1.0, %v219_v20 }
 0x109   :  { %vm261_vm2 = vcmp.eq.f32.partialorder %v260_v24, 8.507059e+37  ;;  %v279_v28 = vsel %vm276_vm3, %v278_v23, %v274_v36 }
 0x10a   :  { %v316_v48 = vpop.permute.xlu2 %315  ;;  %v264_v37 = vsel %vm261_vm2, %v263_v33, %v259_v31  ;;  %v296_v41 = vsub.f32 1.0, %v279_v28 }
 0x10b   :  { %v334_v50 = vmul.f32 %v316_v48, %v294_v44  ;;  %v295_v39 = vsub.f32 1.0, %v264_v37 }
 0x10d   :  { %v342_v54 = vpack.c.bf16 %v334_v50, %v334_v50 }
 0x10f   :  { %351 = vst.msk [vmem:[%s671_s3 + $0x14] sm:$0xf] %vm345_vm8, %v342_v54 }
 0x113   :  { %v306_v59 = vpop.permute.xlu0 %305 }
 0x114   :  { %v310_v60 = vpop.permute.xlu1 %309  ;;  %v329_v61 = vmul.f32 %v306_v59, %v289_v55 }
 0x115   :  { %v331_v0 = vmul.f32 %v310_v60, %v291_v58 }
 0x116   :  { %v337_v1 = vpack.c.bf16 %v329_v61, %v329_v61 }
 0x117   :  { %v339_v4 = vpack.c.bf16 %v331_v0, %v331_v0 }
 0x118   :  { %346 = vst.msk [vmem:[%s671_s3] sm:$0xf] %vm345_vm8, %v337_v1 }
 0x119   :  { %348 = vst.msk [vmem:[%s671_s3 + $0x8] sm:$0xf] %vm345_vm8, %v339_v4 }
 0x11b   :  { %v308_v25 = vpop.permute.xlu0 %307 }
 0x11c   :  { %v330_v29 = vmul.f32 %v308_v25, %v290_v21  ;;  %v312_v32 = vpop.permute.xlu1 %311 }
 0x11d   :  { %v332_v34 = vmul.f32 %v312_v32, %v292_v27 }
 0x11e   :  { %v338_v35 = vpack.c.bf16 %v330_v29, %v330_v29 }
 0x11f   :  { %v340_v38 = vpack.c.bf16 %v332_v34, %v332_v34 }
 0x120   :  { %347 = vst.msk [vmem:[%s671_s3 + $0x4] sm:$0xf] %vm345_vm8, %v338_v35 }
 0x121   :  { %349 = vst.msk [vmem:[%s671_s3 + $0xc] sm:$0xf] %vm345_vm8, %v340_v38 }
 0x123   :  { %v318_v40 = vpop.permute.xlu0 %317 }
 0x124   :  { %v335_v42 = vmul.f32 %v318_v40, %v295_v39  ;;  %v320_v43 = vpop.permute.xlu1 %319 }
 0x125   :  { %v336_v44 = vmul.f32 %v320_v43, %v296_v41 }
 0x126   :  { %v343_v45 = vpack.c.bf16 %v335_v42, %v335_v42 }
 0x127   :  { %v344_v46 = vpack.c.bf16 %v336_v44, %v336_v44 }
 0x128   :  { %352 = vst.msk [vmem:[%s671_s3 + $0x18] sm:$0xf] %vm345_vm8, %v343_v45 }
 0x129   :  { %353 = vst.msk [vmem:[%s671_s3 + $0x1c] sm:$0xf] %vm345_vm8, %v344_v46 }

// kernel: _lambda_.28
= control target key start
LH: loop header
LB: loop body
LE: loop exit
PB: predicated region body
PF: predicated region fallthrough
CT: control target
= control target key end

     0   :  { %vm232_vm0 = vcmask 1040384   ;;  %vm233_vm1 = vcmask 1041408   ;;  %v578_v1 = vmov 65535   ;;  %vm183_vm2 = vcmask 809984   ;;  %s849_s1 = inlined_call_operand.vmem [shape: bf16[99,8], index: 1, kind: input, shape index: {}]   ;;  %s850_s2 = inlined_call_operand.vmem [shape: f32[1,8], index: 2, kind: input, shape index: {}]   ;;  %s851_s0 = inlined_call_operand.vmem [shape: bf16[256,99], index: 0, kind: input, shape index: {}]   ;;  %s852_s3 = inlined_call_operand.vmem [shape: bf16[256,8], index: 3, kind: output, shape index: {}]  }
   0x1   :  { %v59_v0 = vld [vmem:[%s849_s1 + $0x30] sm:$0x3]  ;;  %v234_v2 = vsel %vm232_vm0, 4294967295, %v578_v1  ;;  %v554_v7 = vld [vmem:[%s849_s1 + $0x28] sm:$0xff]  ;;  %v553_v8 = vld [vmem:[%s849_s1 + $0x20] sm:$0xff]  ;;  %vm392_vm3 = vcmask 60416  }
   0x2   :  { %v169_v3 = vunpack.c.l.b16 %v59_v0  ;;  %v235_v4 = vsel %vm233_vm1, %v234_v2, 0  ;;  %v552_v9 = vld [vmem:[%s849_s1 + $0x18] sm:$0xff]  ;;  %v551_v10 = vld [vmem:[%s849_s1 + $0x10] sm:$0xff]  ;;  %v550_v11 = vld [vmem:[%s849_s1 + $0x8] sm:$0xff] }
   0x3   :  { %v549_v12 = vld [vmem:[%s849_s1] sm:$0xff]  ;;  %v534_v17 = vld [vmem:[%s851_s0 + $0x8] sm:$0xff]  ;;  %v535_v21 = vld [vmem:[%s851_s0 + $0x10] sm:$0xff] }
   0x4   :  { %v176_v5 = vpack.c.b16 %v169_v3, %v169_v3  ;;  %v533_v13 = vld [vmem:[%s851_s0] sm:$0xff]  ;;  %v538_v18 = vld [vmem:[%s851_s0 + $0x28] sm:$0xff]  ;;  %v539_v22 = vld [vmem:[%s851_s0 + $0x30] sm:$0xff] }
   0x5   :  { %v537_v14 = vld [vmem:[%s851_s0 + $0x20] sm:$0xff]  ;;  %v542_v19 = vld [vmem:[%s851_s0 + $0x48] sm:$0xff]  ;;  %v543_v23 = vld [vmem:[%s851_s0 + $0x50] sm:$0xff] }
   0x6   :  { %v237_v6 = vand.u32 %v235_v4, %v176_v5  ;;  %v541_v15 = vld [vmem:[%s851_s0 + $0x40] sm:$0xff]  ;;  %v546_v20 = vld [vmem:[%s851_s0 + $0x68] sm:$0xff]  ;;  %v547_v24 = vld [vmem:[%s851_s0 + $0x70] sm:$0xff] }
   0x7   :  { %v545_v16 = vld [vmem:[%s851_s0 + $0x60] sm:$0xff]  ;;  %v536_v25 = vld [vmem:[%s851_s0 + $0x18] sm:$0xff] }
   0x8   :  { %240 = vmatpush.bf16.msra.mxu0 %v237_v6  ;;  %555 = vmatpush.bf16.msra.mxu1 %v237_v6  ;;  %v540_v26 = vld [vmem:[%s851_s0 + $0x38] sm:$0xff]  ;;  %v687_v29 = vld [vmem:[%s850_s2] ss:$0 sm:$0xff] }
   0x9   :  { %556 = vmatpush.bf16.msra.mxu2 %v237_v6  ;;  %557 = vmatpush.bf16.msra.mxu3 %v237_v6  ;;  %v544_v27 = vld [vmem:[%s851_s0 + $0x58] sm:$0xff] }
   0xa   :  { %v548_v28 = vld [vmem:[%s851_s0 + $0x78] sm:$0xff] }
   0xc   :  { %241 = vmatpush.bf16.msra.mxu0 %v554_v7  ;;  %558 = vmatpush.bf16.msra.mxu1 %v554_v7 }
   0xd   :  { %559 = vmatpush.bf16.msra.mxu2 %v554_v7  ;;  %560 = vmatpush.bf16.msra.mxu3 %v554_v7 }
  0x10   :  { %242 = vmatpush.bf16.msra.mxu0 %v553_v8  ;;  %561 = vmatpush.bf16.msra.mxu1 %v553_v8 }
  0x11   :  { %562 = vmatpush.bf16.msra.mxu2 %v553_v8  ;;  %563 = vmatpush.bf16.msra.mxu3 %v553_v8 }
  0x14   :  { %243 = vmatpush.bf16.msra.mxu0 %v552_v9  ;;  %564 = vmatpush.bf16.msra.mxu1 %v552_v9 }
  0x15   :  { %565 = vmatpush.bf16.msra.mxu2 %v552_v9  ;;  %566 = vmatpush.bf16.msra.mxu3 %v552_v9 }
  0x18   :  { %244 = vmatpush.bf16.msra.mxu0 %v551_v10  ;;  %567 = vmatpush.bf16.msra.mxu1 %v551_v10 }
  0x19   :  { %568 = vmatpush.bf16.msra.mxu2 %v551_v10  ;;  %569 = vmatpush.bf16.msra.mxu3 %v551_v10 }
  0x1c   :  { %245 = vmatpush.bf16.msra.mxu0 %v550_v11  ;;  %570 = vmatpush.bf16.msra.mxu1 %v550_v11 }
  0x1d   :  { %571 = vmatpush.bf16.msra.mxu2 %v550_v11  ;;  %572 = vmatpush.bf16.msra.mxu3 %v550_v11 }
  0x20   :  { %246 = vmatpush.bf16.msra.mxu0 %v549_v12  ;;  %573 = vmatpush.bf16.msra.mxu1 %v549_v12 }
  0x21   :  { %574 = vmatpush.bf16.msra.mxu2 %v549_v12  ;;  %575 = vmatpush.bf16.msra.mxu3 %v549_v12 }
  0x23   :  { %517 = vmatmul.msk.bf16.vlgmr.msra.gmra.mxu0 %vm183_vm2, %v533_v13  ;;  %521 = vmatmul.msk.bf16.vlgmr.msra.gmra.mxu1 %vm183_vm2, %v537_v14 }
  0x24   :  { %525 = vmatmul.msk.bf16.vlgmr.msra.gmra.mxu2 %vm183_vm2, %v541_v15  ;;  %529 = vmatmul.msk.bf16.vlgmr.msra.gmra.mxu3 %vm183_vm2, %v545_v16 }
  0x33   :  { %518 = vmatmul.msk.bf16.gmra.mxu0 %vm183_vm2, %v534_v17  ;;  %522 = vmatmul.msk.bf16.gmra.mxu1 %vm183_vm2, %v538_v18 }
  0x34   :  { %526 = vmatmul.msk.bf16.gmra.mxu2 %vm183_vm2, %v542_v19  ;;  %530 = vmatmul.msk.bf16.gmra.mxu3 %vm183_vm2, %v546_v20 }
  0x43   :  { %519 = vmatmul.msk.bf16.gmra.mxu0 %vm183_vm2, %v535_v21  ;;  %523 = vmatmul.msk.bf16.gmra.mxu1 %vm183_vm2, %v539_v22 }
  0x44   :  { %527 = vmatmul.msk.bf16.gmra.mxu2 %vm183_vm2, %v543_v23  ;;  %531 = vmatmul.msk.bf16.gmra.mxu3 %vm183_vm2, %v547_v24 }
  0x53   :  { %520 = vmatmul.msk.bf16.gmra.mxu0 %vm183_vm2, %v536_v25  ;;  %524 = vmatmul.msk.bf16.gmra.mxu1 %vm183_vm2, %v540_v26 }
  0x54   :  { %528 = vmatmul.msk.bf16.gmra.mxu2 %vm183_vm2, %v544_v27  ;;  %532 = vmatmul.msk.bf16.gmra.mxu3 %vm183_vm2, %v548_v28 }
  0xa0   :  { %v248_v30 = vpop.f32.mrf.mxu0  ;;  %v268_v31 = vpop.f32.mrf.mxu1 }
  0xa1   :  { %v249_v32 = vadd.f32 %v687_v29, %v248_v30  ;;  %v269_v33 = vadd.f32 %v687_v29, %v268_v31 }
  0xa3   :  { %v328_v34 = vmax.f32 %v249_v32, 0.0  ;;  %v336_v35 = vmax.f32 %v269_v33, 0.0 }
  0xa5   :  { %v360_v36 = vpack.c.bf16 %v328_v34, %v328_v34  ;;  %v368_v37 = vpack.c.bf16 %v336_v35, %v336_v35 }
  0xa7   :  { %393 = vst.msk [vmem:[%s852_s3] sm:$0xf] %vm392_vm3, %v360_v36  ;;  %v288_v38 = vpop.f32.mrf.mxu2  ;;  %v308_v39 = vpop.f32.mrf.mxu3 }
  0xa8   :  { %401 = vst.msk [vmem:[%s852_s3 + $0x20] sm:$0xf] %vm392_vm3, %v368_v37  ;;  %v289_v40 = vadd.f32 %v687_v29, %v288_v38  ;;  %v309_v41 = vadd.f32 %v687_v29, %v308_v39  ;;  %v250_v42 = vpop.f32.mrf.mxu0  ;;  %v270_v43 = vpop.f32.mrf.mxu1 }
  0xa9   :  { %v251_v44 = vadd.f32 %v687_v29, %v250_v42  ;;  %v271_v45 = vadd.f32 %v687_v29, %v270_v43 }
  0xaa   :  { %v344_v46 = vmax.f32 %v289_v40, 0.0  ;;  %v352_v47 = vmax.f32 %v309_v41, 0.0 }
  0xab   :  { %v329_v48 = vmax.f32 %v251_v44, 0.0  ;;  %v337_v49 = vmax.f32 %v271_v45, 0.0 }
  0xac   :  { %v376_v50 = vpack.c.bf16 %v344_v46, %v344_v46  ;;  %v384_v51 = vpack.c.bf16 %v352_v47, %v352_v47 }
  0xad   :  { %v361_v52 = vpack.c.bf16 %v329_v48, %v329_v48  ;;  %v369_v53 = vpack.c.bf16 %v337_v49, %v337_v49 }
  0xae   :  { %409 = vst.msk [vmem:[%s852_s3 + $0x40] sm:$0xf] %vm392_vm3, %v376_v50 }
  0xaf   :  { %417 = vst.msk [vmem:[%s852_s3 + $0x60] sm:$0xf] %vm392_vm3, %v384_v51  ;;  %v290_v54 = vpop.f32.mrf.mxu2  ;;  %v310_v55 = vpop.f32.mrf.mxu3 }
  0xb0   :  { %394 = vst.msk [vmem:[%s852_s3 + $0x4] sm:$0xf] %vm392_vm3, %v361_v52  ;;  %v291_v56 = vadd.f32 %v687_v29, %v290_v54  ;;  %v311_v57 = vadd.f32 %v687_v29, %v310_v55  ;;  %v253_v58 = vpop.f32.mrf.mxu0  ;;  %v273_v59 = vpop.f32.mrf.mxu1 }
  0xb1   :  { %402 = vst.msk [vmem:[%s852_s3 + $0x24] sm:$0xf] %vm392_vm3, %v369_v53  ;;  %v254_v60 = vadd.f32 %v687_v29, %v253_v58  ;;  %v274_v61 = vadd.f32 %v687_v29, %v273_v59 }
  0xb2   :  { %v345_v62 = vmax.f32 %v291_v56, 0.0  ;;  %v353_v63 = vmax.f32 %v311_v57, 0.0 }
  0xb3   :  { %v330_v0 = vmax.f32 %v254_v60, 0.0  ;;  %v338_v1 = vmax.f32 %v274_v61, 0.0 }
  0xb4   :  { %v377_v2 = vpack.c.bf16 %v345_v62, %v345_v62  ;;  %v385_v3 = vpack.c.bf16 %v353_v63, %v353_v63 }
  0xb5   :  { %v362_v4 = vpack.c.bf16 %v330_v0, %v330_v0  ;;  %v370_v5 = vpack.c.bf16 %v338_v1, %v338_v1 }
  0xb6   :  { %410 = vst.msk [vmem:[%s852_s3 + $0x44] sm:$0xf] %vm392_vm3, %v377_v2 }
  0xb7   :  { %418 = vst.msk [vmem:[%s852_s3 + $0x64] sm:$0xf] %vm392_vm3, %v385_v3  ;;  %v293_v6 = vpop.f32.mrf.mxu2  ;;  %v313_v7 = vpop.f32.mrf.mxu3 }
  0xb8   :  { %395 = vst.msk [vmem:[%s852_s3 + $0x8] sm:$0xf] %vm392_vm3, %v362_v4  ;;  %v294_v8 = vadd.f32 %v687_v29, %v293_v6  ;;  %v314_v9 = vadd.f32 %v687_v29, %v313_v7  ;;  %v255_v10 = vpop.f32.mrf.mxu0  ;;  %v275_v11 = vpop.f32.mrf.mxu1 }
  0xb9   :  { %403 = vst.msk [vmem:[%s852_s3 + $0x28] sm:$0xf] %vm392_vm3, %v370_v5  ;;  %v256_v12 = vadd.f32 %v687_v29, %v255_v10  ;;  %v276_v13 = vadd.f32 %v687_v29, %v275_v11 }
  0xba   :  { %v346_v14 = vmax.f32 %v294_v8, 0.0  ;;  %v354_v15 = vmax.f32 %v314_v9, 0.0 }
  0xbb   :  { %v331_v16 = vmax.f32 %v256_v12, 0.0  ;;  %v339_v17 = vmax.f32 %v276_v13, 0.0 }
  0xbc   :  { %v378_v18 = vpack.c.bf16 %v346_v14, %v346_v14  ;;  %v386_v19 = vpack.c.bf16 %v354_v15, %v354_v15 }
  0xbd   :  { %v363_v20 = vpack.c.bf16 %v331_v16, %v331_v16  ;;  %v371_v21 = vpack.c.bf16 %v339_v17, %v339_v17 }
  0xbe   :  { %411 = vst.msk [vmem:[%s852_s3 + $0x48] sm:$0xf] %vm392_vm3, %v378_v18 }
  0xbf   :  { %419 = vst.msk [vmem:[%s852_s3 + $0x68] sm:$0xf] %vm392_vm3, %v386_v19  ;;  %v295_v22 = vpop.f32.mrf.mxu2  ;;  %v315_v23 = vpop.f32.mrf.mxu3 }
  0xc0   :  { %396 = vst.msk [vmem:[%s852_s3 + $0xc] sm:$0xf] %vm392_vm3, %v363_v20  ;;  %v296_v24 = vadd.f32 %v687_v29, %v295_v22  ;;  %v316_v25 = vadd.f32 %v687_v29, %v315_v23  ;;  %v258_v26 = vpop.f32.mrf.mxu0  ;;  %v278_v27 = vpop.f32.mrf.mxu1 }
  0xc1   :  { %404 = vst.msk [vmem:[%s852_s3 + $0x2c] sm:$0xf] %vm392_vm3, %v371_v21  ;;  %v259_v28 = vadd.f32 %v687_v29, %v258_v26  ;;  %v279_v30 = vadd.f32 %v687_v29, %v278_v27 }
  0xc2   :  { %v347_v31 = vmax.f32 %v296_v24, 0.0  ;;  %v355_v32 = vmax.f32 %v316_v25, 0.0 }
  0xc3   :  { %v332_v33 = vmax.f32 %v259_v28, 0.0  ;;  %v340_v34 = vmax.f32 %v279_v30, 0.0 }
  0xc4   :  { %v379_v35 = vpack.c.bf16 %v347_v31, %v347_v31  ;;  %v387_v36 = vpack.c.bf16 %v355_v32, %v355_v32 }
  0xc5   :  { %v364_v37 = vpack.c.bf16 %v332_v33, %v332_v33  ;;  %v372_v38 = vpack.c.bf16 %v340_v34, %v340_v34 }
  0xc6   :  { %412 = vst.msk [vmem:[%s852_s3 + $0x4c] sm:$0xf] %vm392_vm3, %v379_v35 }
  0xc7   :  { %420 = vst.msk [vmem:[%s852_s3 + $0x6c] sm:$0xf] %vm392_vm3, %v387_v36  ;;  %v298_v39 = vpop.f32.mrf.mxu2  ;;  %v318_v40 = vpop.f32.mrf.mxu3 }
  0xc8   :  { %397 = vst.msk [vmem:[%s852_s3 + $0x10] sm:$0xf] %vm392_vm3, %v364_v37  ;;  %v299_v41 = vadd.f32 %v687_v29, %v298_v39  ;;  %v319_v42 = vadd.f32 %v687_v29, %v318_v40  ;;  %v260_v43 = vpop.f32.mrf.mxu0  ;;  %v280_v44 = vpop.f32.mrf.mxu1 }
  0xc9   :  { %405 = vst.msk [vmem:[%s852_s3 + $0x30] sm:$0xf] %vm392_vm3, %v372_v38  ;;  %v261_v45 = vadd.f32 %v687_v29, %v260_v43  ;;  %v281_v46 = vadd.f32 %v687_v29, %v280_v44 }
  0xca   :  { %v348_v47 = vmax.f32 %v299_v41, 0.0  ;;  %v356_v48 = vmax.f32 %v319_v42, 0.0 }
  0xcb   :  { %v333_v49 = vmax.f32 %v261_v45, 0.0  ;;  %v341_v50 = vmax.f32 %v281_v46, 0.0 }
  0xcc   :  { %v380_v51 = vpack.c.bf16 %v348_v47, %v348_v47  ;;  %v388_v52 = vpack.c.bf16 %v356_v48, %v356_v48 }
  0xcd   :  { %v365_v53 = vpack.c.bf16 %v333_v49, %v333_v49  ;;  %v373_v54 = vpack.c.bf16 %v341_v50, %v341_v50 }
  0xce   :  { %413 = vst.msk [vmem:[%s852_s3 + $0x50] sm:$0xf] %vm392_vm3, %v380_v51 }
  0xcf   :  { %421 = vst.msk [vmem:[%s852_s3 + $0x70] sm:$0xf] %vm392_vm3, %v388_v52  ;;  %v300_v55 = vpop.f32.mrf.mxu2  ;;  %v320_v56 = vpop.f32.mrf.mxu3 }
  0xd0   :  { %398 = vst.msk [vmem:[%s852_s3 + $0x14] sm:$0xf] %vm392_vm3, %v365_v53  ;;  %v301_v57 = vadd.f32 %v687_v29, %v300_v55  ;;  %v321_v58 = vadd.f32 %v687_v29, %v320_v56  ;;  %v263_v59 = vpop.f32.mrf.mxu0  ;;  %v283_v60 = vpop.f32.mrf.mxu1 }
  0xd1   :  { %406 = vst.msk [vmem:[%s852_s3 + $0x34] sm:$0xf] %vm392_vm3, %v373_v54  ;;  %v264_v61 = vadd.f32 %v687_v29, %v263_v59  ;;  %v284_v62 = vadd.f32 %v687_v29, %v283_v60 }
  0xd2   :  { %v349_v63 = vmax.f32 %v301_v57, 0.0  ;;  %v357_v0 = vmax.f32 %v321_v58, 0.0 }
  0xd3   :  { %v334_v1 = vmax.f32 %v264_v61, 0.0  ;;  %v342_v2 = vmax.f32 %v284_v62, 0.0 }
  0xd4   :  { %v381_v3 = vpack.c.bf16 %v349_v63, %v349_v63  ;;  %v389_v4 = vpack.c.bf16 %v357_v0, %v357_v0 }
  0xd5   :  { %v366_v5 = vpack.c.bf16 %v334_v1, %v334_v1  ;;  %v374_v6 = vpack.c.bf16 %v342_v2, %v342_v2 }
  0xd6   :  { %414 = vst.msk [vmem:[%s852_s3 + $0x54] sm:$0xf] %vm392_vm3, %v381_v3 }
  0xd7   :  { %422 = vst.msk [vmem:[%s852_s3 + $0x74] sm:$0xf] %vm392_vm3, %v389_v4  ;;  %v303_v7 = vpop.f32.mrf.mxu2  ;;  %v323_v8 = vpop.f32.mrf.mxu3 }
  0xd8   :  { %399 = vst.msk [vmem:[%s852_s3 + $0x18] sm:$0xf] %vm392_vm3, %v366_v5  ;;  %v304_v9 = vadd.f32 %v687_v29, %v303_v7  ;;  %v324_v10 = vadd.f32 %v687_v29, %v323_v8  ;;  %v265_v11 = vpop.f32.mrf.mxu0  ;;  %v285_v12 = vpop.f32.mrf.mxu1 }
  0xd9   :  { %407 = vst.msk [vmem:[%s852_s3 + $0x38] sm:$0xf] %vm392_vm3, %v374_v6  ;;  %v266_v13 = vadd.f32 %v687_v29, %v265_v11  ;;  %v286_v14 = vadd.f32 %v687_v29, %v285_v12 }
  0xda   :  { %v350_v15 = vmax.f32 %v304_v9, 0.0  ;;  %v358_v16 = vmax.f32 %v324_v10, 0.0 }
  0xdb   :  { %v335_v17 = vmax.f32 %v266_v13, 0.0  ;;  %v343_v18 = vmax.f32 %v286_v14, 0.0 }
  0xdc   :  { %v382_v19 = vpack.c.bf16 %v350_v15, %v350_v15  ;;  %v390_v20 = vpack.c.bf16 %v358_v16, %v358_v16 }
  0xdd   :  { %v367_v21 = vpack.c.bf16 %v335_v17, %v335_v17  ;;  %v375_v22 = vpack.c.bf16 %v343_v18, %v343_v18 }
  0xde   :  { %415 = vst.msk [vmem:[%s852_s3 + $0x58] sm:$0xf] %vm392_vm3, %v382_v19 }
  0xdf   :  { %423 = vst.msk [vmem:[%s852_s3 + $0x78] sm:$0xf] %vm392_vm3, %v390_v20  ;;  %v305_v23 = vpop.f32.mrf.mxu2  ;;  %v325_v24 = vpop.f32.mrf.mxu3 }
  0xe0   :  { %400 = vst.msk [vmem:[%s852_s3 + $0x1c] sm:$0xf] %vm392_vm3, %v367_v21  ;;  %v306_v25 = vadd.f32 %v687_v29, %v305_v23  ;;  %v326_v26 = vadd.f32 %v687_v29, %v325_v24 }
  0xe1   :  { %408 = vst.msk [vmem:[%s852_s3 + $0x3c] sm:$0xf] %vm392_vm3, %v375_v22 }
  0xe2   :  { %v351_v27 = vmax.f32 %v306_v25, 0.0  ;;  %v359_v28 = vmax.f32 %v326_v26, 0.0 }
  0xe4   :  { %v383_v30 = vpack.c.bf16 %v351_v27, %v351_v27  ;;  %v391_v31 = vpack.c.bf16 %v359_v28, %v359_v28 }
  0xe6   :  { %416 = vst.msk [vmem:[%s852_s3 + $0x5c] sm:$0xf] %vm392_vm3, %v383_v30 }
  0xe7   :  { %424 = vst.msk [vmem:[%s852_s3 + $0x7c] sm:$0xf] %vm392_vm3, %v391_v31 }

// kernel: _lambda_.29
= control target key start
LH: loop header
LB: loop body
LE: loop exit
PB: predicated region body
PF: predicated region fallthrough
CT: control target
= control target key end

     0   :  { %vm224_vm0 = vcmask 1043456   ;;  %vm175_vm1 = vcmask 588800   ;;  %vm370_vm2 = vcmask 64512   ;;  %vm575_vm3 = vcmask 7168   ;;  %s1087_s1 = inlined_call_operand.vmem [shape: bf16[72,8], index: 1, kind: input, shape index: {}]   ;;  %s1088_s2 = inlined_call_operand.vmem [shape: f32[1,8], index: 2, kind: input, shape index: {}]   ;;  %s1089_s0 = inlined_call_operand.vmem [shape: bf16[256,72], index: 0, kind: input, shape index: {}]   ;;  %s1090_s3 = inlined_call_operand.vmem [shape: bf16[8,1], index: 3, kind: input, shape index: {}]   ;;  %s1091_s4 = inlined_call_operand.<no memory space> [shape: f32[1,1], index: 4, kind: input, shape index: {}]   ;;  %s1092_s5 = inlined_call_operand.vmem [shape: f32[256,1], index: 5, kind: output, shape index: {}]  }
   0x1   :  { %v63_v0 = vld [vmem:[%s1087_s1 + $0x20] sm:$0xf]  ;;  %v743_v4 = vld [vmem:[%s1087_s1 + $0x18] sm:$0xff]  ;;  %v742_v5 = vld [vmem:[%s1087_s1 + $0x10] sm:$0xff] }
   0x2   :  { %v165_v1 = vunpack.c.l.b16 %v63_v0  ;;  %v741_v6 = vld [vmem:[%s1087_s1 + $0x8] sm:$0xff]  ;;  %v740_v7 = vld [vmem:[%s1087_s1] sm:$0xff]  ;;  %v726_v12 = vld [vmem:[%s1089_s0 + $0x10] sm:$0xff] }
   0x3   :  { %v724_v8 = vld [vmem:[%s1089_s0] sm:$0xff]  ;;  %v725_v10 = vld [vmem:[%s1089_s0 + $0x8] sm:$0xff]  ;;  %v734_v13 = vld [vmem:[%s1089_s0 + $0x50] sm:$0xff] }
   0x4   :  { %v170_v2 = vpack.c.b16 %v165_v1, %v165_v1  ;;  %v732_v9 = vld [vmem:[%s1089_s0 + $0x40] sm:$0xff]  ;;  %v733_v11 = vld [vmem:[%s1089_s0 + $0x48] sm:$0xff]  ;;  %v727_v14 = vld [vmem:[%s1089_s0 + $0x18] sm:$0xff] }
   0x5   :  { %v735_v15 = vld [vmem:[%s1089_s0 + $0x58] sm:$0xff]  ;;  %v728_v16 = vld [vmem:[%s1089_s0 + $0x20] sm:$0xff]  ;;  %v729_v18 = vld [vmem:[%s1089_s0 + $0x28] sm:$0xff] }
   0x6   :  { %v226_v3 = vsel %vm224_vm0, %v170_v2, 0  ;;  %v736_v17 = vld [vmem:[%s1089_s0 + $0x60] sm:$0xff]  ;;  %v737_v19 = vld [vmem:[%s1089_s0 + $0x68] sm:$0xff]  ;;  %v730_v20 = vld [vmem:[%s1089_s0 + $0x30] sm:$0xff] }
   0x7   :  { %231 = vmatpush.bf16.msra.mxu0 %v226_v3  ;;  %744 = vmatpush.bf16.msra.mxu2 %v226_v3  ;;  %v738_v21 = vld [vmem:[%s1089_s0 + $0x70] sm:$0xff]  ;;  %v365_v22 = vld [vmem:[%s1090_s3] sm:$0xf]  ;;  %v731_v24 = vld [vmem:[%s1089_s0 + $0x38] sm:$0xff] }
   0x8   :  { %v420_v23 = vsel %vm224_vm0, %v365_v22, 0  ;;  %v739_v25 = vld [vmem:[%s1089_s0 + $0x78] sm:$0xff]  ;;  %v869_v27 = vld [vmem:[%s1088_s2] ss:$0 sm:$0xff] }
   0x9   :  { %429 = vmatpush.bf16.msra.mxu1 %v420_v23  ;;  %749 = vmatpush.bf16.msra.mxu3 %v420_v23 }
   0xb   :  { %232 = vmatpush.bf16.msra.mxu0 %v743_v4  ;;  %745 = vmatpush.bf16.msra.mxu2 %v743_v4 }
   0xf   :  { %233 = vmatpush.bf16.msra.mxu0 %v742_v5  ;;  %746 = vmatpush.bf16.msra.mxu2 %v742_v5 }
  0x13   :  { %234 = vmatpush.bf16.msra.mxu0 %v741_v6  ;;  %747 = vmatpush.bf16.msra.mxu2 %v741_v6 }
  0x17   :  { %235 = vmatpush.bf16.msra.mxu0 %v740_v7  ;;  %748 = vmatpush.bf16.msra.mxu2 %v740_v7 }
  0x1a   :  { %692 = vmatmul.msk.bf16.vlgmr.msra.gmra.mxu0 %vm175_vm1, %v724_v8  ;;  %700 = vmatmul.msk.bf16.vlgmr.msra.gmra.mxu2 %vm175_vm1, %v732_v9 }
  0x2a   :  { %693 = vmatmul.msk.bf16.gmra.mxu0 %vm175_vm1, %v725_v10  ;;  %701 = vmatmul.msk.bf16.gmra.mxu2 %vm175_vm1, %v733_v11 }
  0x3a   :  { %694 = vmatmul.msk.bf16.gmra.mxu0 %vm175_vm1, %v726_v12  ;;  %702 = vmatmul.msk.bf16.gmra.mxu2 %vm175_vm1, %v734_v13 }
  0x4a   :  { %695 = vmatmul.msk.bf16.gmra.mxu0 %vm175_vm1, %v727_v14  ;;  %703 = vmatmul.msk.bf16.gmra.mxu2 %vm175_vm1, %v735_v15 }
  0x5a   :  { %696 = vmatmul.msk.bf16.gmra.mxu0 %vm175_vm1, %v728_v16  ;;  %704 = vmatmul.msk.bf16.gmra.mxu2 %vm175_vm1, %v736_v17 }
  0x6a   :  { %697 = vmatmul.msk.bf16.gmra.mxu0 %vm175_vm1, %v729_v18  ;;  %705 = vmatmul.msk.bf16.gmra.mxu2 %vm175_vm1, %v737_v19 }
  0x7a   :  { %698 = vmatmul.msk.bf16.gmra.mxu0 %vm175_vm1, %v730_v20  ;;  %706 = vmatmul.msk.bf16.gmra.mxu2 %vm175_vm1, %v738_v21 }
  0x8a   :  { %699 = vmatmul.msk.bf16.gmra.mxu0 %vm175_vm1, %v731_v24  ;;  %707 = vmatmul.msk.bf16.gmra.mxu2 %vm175_vm1, %v739_v25 }
  0x97   :  { %v237_v26 = vpop.f32.mrf.mxu0 }
  0x98   :  { %v238_v29 = vadd.f32 %v869_v27, %v237_v26 }
  0x9a   :  { %v317_v32 = vmax.f32 %v238_v29, 0.0 }
  0x9d   :  { %v277_v28 = vpop.f32.mrf.mxu2 }
  0x9e   :  { %v278_v34 = vadd.f32 %v869_v27, %v277_v28 }
  0x9f   :  { %v239_v30 = vpop.f32.mrf.mxu0 }
  0xa0   :  { %v240_v31 = vadd.f32 %v869_v27, %v239_v30  ;;  %v333_v39 = vmax.f32 %v278_v34, 0.0 }
  0xa2   :  { %v318_v33 = vmax.f32 %v240_v31, 0.0 }
  0xa4   :  { %v349_v35 = vpack.c.bf16 %v318_v33, %v317_v32 }
  0xa5   :  { %v279_v36 = vpop.f32.mrf.mxu2 }
  0xa6   :  { %v280_v37 = vadd.f32 %v869_v27, %v279_v36  ;;  %708 = vmatmul.msk.bf16.vlgmr.msra.gmra.mxu1 %vm370_vm2, %v349_v35 }
  0xa7   :  { %v242_v38 = vpop.f32.mrf.mxu0 }
  0xa8   :  { %v334_v40 = vmax.f32 %v280_v37, 0.0  ;;  %v243_v43 = vadd.f32 %v869_v27, %v242_v38 }
  0xaa   :  { %v876_v41 = vpack.c.bf16 %v334_v40, %v333_v39  ;;  %v319_v46 = vmax.f32 %v243_v43, 0.0 }
  0xad   :  { %v282_v42 = vpop.f32.mrf.mxu2 }
  0xae   :  { %v283_v48 = vadd.f32 %v869_v27, %v282_v42 }
  0xaf   :  { %v244_v44 = vpop.f32.mrf.mxu0 }
  0xb0   :  { %v245_v45 = vadd.f32 %v869_v27, %v244_v44  ;;  %v335_v53 = vmax.f32 %v283_v48, 0.0 }
  0xb2   :  { %v320_v47 = vmax.f32 %v245_v45, 0.0 }
  0xb4   :  { %v350_v49 = vpack.c.bf16 %v320_v47, %v319_v46 }
  0xb5   :  { %v284_v50 = vpop.f32.mrf.mxu2 }
  0xb6   :  { %v285_v51 = vadd.f32 %v869_v27, %v284_v50  ;;  %709 = vmatmul.msk.bf16.gmra.mxu1 %vm370_vm2, %v350_v49  ;;  %v10_v50 = vstv %s1091_s4 }
  0xb7   :  { %v247_v52 = vpop.f32.mrf.mxu0  ;;  %11 = vst [vmem:[#allocation2] sm:$0x1] %v10_v50 }
  0xb8   :  { %v336_v54 = vmax.f32 %v285_v51, 0.0  ;;  %v248_v57 = vadd.f32 %v869_v27, %v247_v52 }
  0xba   :  { %v358_v55 = vpack.c.bf16 %v336_v54, %v335_v53  ;;  %v321_v60 = vmax.f32 %v248_v57, 0.0 }
  0xbc   :  { %717 = vmatmul.msk.bf16.vlgmr.msra.gmra.mxu3 %vm370_vm2, %v358_v55 }
  0xbd   :  { %v287_v56 = vpop.f32.mrf.mxu2 }
  0xbe   :  { %v288_v62 = vadd.f32 %v869_v27, %v287_v56 }
  0xbf   :  { %v249_v58 = vpop.f32.mrf.mxu0 }
  0xc0   :  { %v250_v59 = vadd.f32 %v869_v27, %v249_v58  ;;  %v337_v3 = vmax.f32 %v288_v62, 0.0 }
  0xc2   :  { %v322_v61 = vmax.f32 %v250_v59, 0.0 }
  0xc4   :  { %v351_v63 = vpack.c.bf16 %v322_v61, %v321_v60 }
  0xc5   :  { %v289_v0 = vpop.f32.mrf.mxu2 }
  0xc6   :  { %v290_v1 = vadd.f32 %v869_v27, %v289_v0  ;;  %710 = vmatmul.msk.bf16.gmra.mxu1 %vm370_vm2, %v351_v63 }
  0xc7   :  { %v252_v2 = vpop.f32.mrf.mxu0 }
  0xc8   :  { %v338_v4 = vmax.f32 %v290_v1, 0.0  ;;  %v253_v7 = vadd.f32 %v869_v27, %v252_v2 }
  0xca   :  { %v359_v5 = vpack.c.bf16 %v338_v4, %v337_v3  ;;  %v323_v10 = vmax.f32 %v253_v7, 0.0 }
  0xcc   :  { %718 = vmatmul.msk.bf16.gmra.mxu3 %vm370_vm2, %v359_v5 }
  0xcd   :  { %v292_v6 = vpop.f32.mrf.mxu2 }
  0xce   :  { %v293_v12 = vadd.f32 %v869_v27, %v292_v6 }
  0xcf   :  { %v254_v8 = vpop.f32.mrf.mxu0 }
  0xd0   :  { %v255_v9 = vadd.f32 %v869_v27, %v254_v8  ;;  %v339_v17 = vmax.f32 %v293_v12, 0.0 }
  0xd2   :  { %v324_v11 = vmax.f32 %v255_v9, 0.0 }
  0xd4   :  { %v352_v13 = vpack.c.bf16 %v324_v11, %v323_v10 }
  0xd5   :  { %v294_v14 = vpop.f32.mrf.mxu2 }
  0xd6   :  { %v295_v15 = vadd.f32 %v869_v27, %v294_v14  ;;  %711 = vmatmul.msk.bf16.gmra.mxu1 %vm370_vm2, %v352_v13  ;;  %v923_v14 = vld [vmem:[#allocation2] ss:$0 sm:$0xff] }
  0xd7   :  { %v257_v16 = vpop.f32.mrf.mxu0 }
  0xd8   :  { %v340_v18 = vmax.f32 %v295_v15, 0.0  ;;  %v258_v21 = vadd.f32 %v869_v27, %v257_v16 }
  0xda   :  { %v360_v19 = vpack.c.bf16 %v340_v18, %v339_v17  ;;  %v325_v24 = vmax.f32 %v258_v21, 0.0 }
  0xdc   :  { %719 = vmatmul.msk.bf16.gmra.mxu3 %vm370_vm2, %v360_v19 }
  0xdd   :  { %v297_v20 = vpop.f32.mrf.mxu2 }
  0xde   :  { %v298_v26 = vadd.f32 %v869_v27, %v297_v20 }
  0xdf   :  { %v259_v22 = vpop.f32.mrf.mxu0 }
  0xe0   :  { %v260_v23 = vadd.f32 %v869_v27, %v259_v22  ;;  %v341_v32 = vmax.f32 %v298_v26, 0.0 }
  0xe2   :  { %v326_v25 = vmax.f32 %v260_v23, 0.0 }
  0xe4   :  { %v353_v28 = vpack.c.bf16 %v326_v25, %v325_v24 }
  0xe5   :  { %v299_v29 = vpop.f32.mrf.mxu2 }
  0xe6   :  { %v300_v30 = vadd.f32 %v869_v27, %v299_v29  ;;  %712 = vmatmul.msk.bf16.gmra.mxu1 %vm370_vm2, %v353_v28 }
  0xe7   :  { %v262_v31 = vpop.f32.mrf.mxu0 }
  0xe8   :  { %v342_v33 = vmax.f32 %v300_v30, 0.0  ;;  %v263_v36 = vadd.f32 %v869_v27, %v262_v31 }
  0xea   :  { %v361_v34 = vpack.c.bf16 %v342_v33, %v341_v32  ;;  %v327_v39 = vmax.f32 %v263_v36, 0.0 }
  0xec   :  { %720 = vmatmul.msk.bf16.gmra.mxu3 %vm370_vm2, %v361_v34 }
  0xed   :  { %v302_v35 = vpop.f32.mrf.mxu2 }
  0xee   :  { %v303_v42 = vadd.f32 %v869_v27, %v302_v35 }
  0xef   :  { %v264_v37 = vpop.f32.mrf.mxu0 }
  0xf0   :  { %v265_v38 = vadd.f32 %v869_v27, %v264_v37  ;;  %v343_v47 = vmax.f32 %v303_v42, 0.0 }
  0xf2   :  { %v328_v40 = vmax.f32 %v265_v38, 0.0 }
  0xf4   :  { %v354_v43 = vpack.c.bf16 %v328_v40, %v327_v39 }
  0xf5   :  { %v304_v44 = vpop.f32.mrf.mxu2 }
  0xf6   :  { %v305_v45 = vadd.f32 %v869_v27, %v304_v44  ;;  %713 = vmatmul.msk.bf16.gmra.mxu1 %vm370_vm2, %v354_v43 }
  0xf7   :  { %v267_v46 = vpop.f32.mrf.mxu0 }
  0xf8   :  { %v344_v48 = vmax.f32 %v305_v45, 0.0  ;;  %v268_v52 = vadd.f32 %v869_v27, %v267_v46 }
  0xfa   :  { %v362_v49 = vpack.c.bf16 %v344_v48, %v343_v47  ;;  %v329_v55 = vmax.f32 %v268_v52, 0.0 }
  0xfc   :  { %721 = vmatmul.msk.bf16.gmra.mxu3 %vm370_vm2, %v362_v49 }
  0xfd   :  { %v307_v51 = vpop.f32.mrf.mxu2 }
  0xfe   :  { %v308_v57 = vadd.f32 %v869_v27, %v307_v51 }
  0xff   :  { %v269_v53 = vpop.f32.mrf.mxu0 }
 0x100   :  { %v270_v54 = vadd.f32 %v869_v27, %v269_v53  ;;  %v345_v62 = vmax.f32 %v308_v57, 0.0 }
 0x102   :  { %v330_v56 = vmax.f32 %v270_v54, 0.0 }
 0x104   :  { %v355_v58 = vpack.c.bf16 %v330_v56, %v329_v55 }
 0x105   :  { %v309_v59 = vpop.f32.mrf.mxu2 }
 0x106   :  { %v310_v60 = vadd.f32 %v869_v27, %v309_v59  ;;  %714 = vmatmul.msk.bf16.gmra.mxu1 %vm370_vm2, %v355_v58 }
 0x107   :  { %v272_v61 = vpop.f32.mrf.mxu0 }
 0x108   :  { %v346_v63 = vmax.f32 %v310_v60, 0.0  ;;  %v273_v2 = vadd.f32 %v869_v27, %v272_v61 }
 0x10a   :  { %v363_v0 = vpack.c.bf16 %v346_v63, %v345_v62  ;;  %v331_v5 = vmax.f32 %v273_v2, 0.0 }
 0x10c   :  { %722 = vmatmul.msk.bf16.gmra.mxu3 %vm370_vm2, %v363_v0 }
 0x10d   :  { %v312_v1 = vpop.f32.mrf.mxu2 }
 0x10e   :  { %v313_v7 = vadd.f32 %v869_v27, %v312_v1 }
 0x10f   :  { %v274_v3 = vpop.f32.mrf.mxu0 }
 0x110   :  { %v275_v4 = vadd.f32 %v869_v27, %v274_v3  ;;  %v347_v11 = vmax.f32 %v313_v7, 0.0 }
 0x112   :  { %v332_v6 = vmax.f32 %v275_v4, 0.0 }
 0x114   :  { %v356_v8 = vpack.c.bf16 %v332_v6, %v331_v5 }
 0x115   :  { %v314_v9 = vpop.f32.mrf.mxu2 }
 0x116   :  { %v315_v10 = vadd.f32 %v869_v27, %v314_v9  ;;  %715 = vmatmul.msk.bf16.gmra.mxu1 %vm370_vm2, %v356_v8 }
 0x118   :  { %v348_v12 = vmax.f32 %v315_v10, 0.0 }
 0x11a   :  { %v364_v13 = vpack.c.bf16 %v348_v12, %v347_v11 }
 0x11c   :  { %723 = vmatmul.msk.bf16.gmra.mxu3 %vm370_vm2, %v364_v13 }
 0x123   :  { %v431_v15 = vpop.f32.mrf.mxu1 }
 0x124   :  { %v432_v16 = vadd.f32 %v923_v14, %v431_v15 }
 0x126   :  { %v511_v17 = vmax.f32 %v432_v16, 0.0  ;;  %716 = vmatmul.msk.bf16.gmra.mxu1 %vm370_vm2, %v876_v41 }
 0x128   :  { %v543_v18 = vmin.f32 %v511_v17, 1.0 }
 0x12a   :  { %576 = vst.msk [vmem:[%s1092_s5] sm:$0xff] %vm575_vm3, %v543_v18 }
 0x12b   :  { %v433_v27 = vpop.f32.mrf.mxu1 }
 0x12c   :  { %v434_v19 = vadd.f32 %v923_v14, %v433_v27 }
 0x12e   :  { %v512_v20 = vmax.f32 %v434_v19, 0.0 }
 0x130   :  { %v544_v21 = vmin.f32 %v512_v20, 1.0 }
 0x132   :  { %577 = vst.msk [vmem:[%s1092_s5 + $0x8] sm:$0xff] %vm575_vm3, %v544_v21 }
 0x133   :  { %v436_v22 = vpop.f32.mrf.mxu1 }
 0x134   :  { %v437_v41 = vadd.f32 %v923_v14, %v436_v22 }
 0x136   :  { %v513_v23 = vmax.f32 %v437_v41, 0.0 }
 0x138   :  { %v545_v24 = vmin.f32 %v513_v23, 1.0 }
 0x13a   :  { %578 = vst.msk [vmem:[%s1092_s5 + $0x10] sm:$0xff] %vm575_vm3, %v545_v24 }
 0x13b   :  { %v438_v25 = vpop.f32.mrf.mxu1 }
 0x13c   :  { %v439_v26 = vadd.f32 %v923_v14, %v438_v25 }
 0x13e   :  { %v514_v28 = vmax.f32 %v439_v26, 0.0 }
 0x13f   :  { %v476_v29 = vpop.f32.mrf.mxu3 }
 0x140   :  { %v546_v30 = vmin.f32 %v514_v28, 1.0  ;;  %v477_v31 = vadd.f32 %v923_v14, %v476_v29 }
 0x142   :  { %579 = vst.msk [vmem:[%s1092_s5 + $0x18] sm:$0xff] %vm575_vm3, %v546_v30  ;;  %v529_v32 = vmax.f32 %v477_v31, 0.0 }
 0x143   :  { %v441_v33 = vpop.f32.mrf.mxu1 }
 0x144   :  { %v561_v34 = vmin.f32 %v529_v32, 1.0  ;;  %v442_v35 = vadd.f32 %v923_v14, %v441_v33 }
 0x146   :  { %594 = vst.msk [vmem:[%s1092_s5 + $0x90] sm:$0xff] %vm575_vm3, %v561_v34  ;;  %v515_v36 = vmax.f32 %v442_v35, 0.0 }
 0x147   :  { %v478_v37 = vpop.f32.mrf.mxu3 }
 0x148   :  { %v547_v38 = vmin.f32 %v515_v36, 1.0  ;;  %v479_v39 = vadd.f32 %v923_v14, %v478_v37 }
 0x14a   :  { %580 = vst.msk [vmem:[%s1092_s5 + $0x20] sm:$0xff] %vm575_vm3, %v547_v38  ;;  %v530_v40 = vmax.f32 %v479_v39, 0.0 }
 0x14b   :  { %v443_v42 = vpop.f32.mrf.mxu1 }
 0x14c   :  { %v562_v43 = vmin.f32 %v530_v40, 1.0  ;;  %v444_v44 = vadd.f32 %v923_v14, %v443_v42 }
 0x14e   :  { %595 = vst.msk [vmem:[%s1092_s5 + $0x98] sm:$0xff] %vm575_vm3, %v562_v43  ;;  %v516_v45 = vmax.f32 %v444_v44, 0.0 }
 0x14f   :  { %v481_v46 = vpop.f32.mrf.mxu3 }
 0x150   :  { %v548_v47 = vmin.f32 %v516_v45, 1.0  ;;  %v482_v48 = vadd.f32 %v923_v14, %v481_v46 }
 0x152   :  { %581 = vst.msk [vmem:[%s1092_s5 + $0x28] sm:$0xff] %vm575_vm3, %v548_v47  ;;  %v531_v49 = vmax.f32 %v482_v48, 0.0 }
 0x153   :  { %v446_v50 = vpop.f32.mrf.mxu1 }
 0x154   :  { %v563_v51 = vmin.f32 %v531_v49, 1.0  ;;  %v447_v52 = vadd.f32 %v923_v14, %v446_v50 }
 0x156   :  { %596 = vst.msk [vmem:[%s1092_s5 + $0xa0] sm:$0xff] %vm575_vm3, %v563_v51  ;;  %v517_v53 = vmax.f32 %v447_v52, 0.0 }
 0x157   :  { %v483_v54 = vpop.f32.mrf.mxu3 }
 0x158   :  { %v549_v55 = vmin.f32 %v517_v53, 1.0  ;;  %v484_v56 = vadd.f32 %v923_v14, %v483_v54 }
 0x15a   :  { %582 = vst.msk [vmem:[%s1092_s5 + $0x30] sm:$0xff] %vm575_vm3, %v549_v55  ;;  %v532_v57 = vmax.f32 %v484_v56, 0.0 }
 0x15b   :  { %v448_v58 = vpop.f32.mrf.mxu1 }
 0x15c   :  { %v564_v59 = vmin.f32 %v532_v57, 1.0  ;;  %v449_v60 = vadd.f32 %v923_v14, %v448_v58 }
 0x15e   :  { %597 = vst.msk [vmem:[%s1092_s5 + $0xa8] sm:$0xff] %vm575_vm3, %v564_v59  ;;  %v518_v61 = vmax.f32 %v449_v60, 0.0 }
 0x15f   :  { %v486_v62 = vpop.f32.mrf.mxu3 }
 0x160   :  { %v550_v63 = vmin.f32 %v518_v61, 1.0  ;;  %v487_v0 = vadd.f32 %v923_v14, %v486_v62 }
 0x162   :  { %583 = vst.msk [vmem:[%s1092_s5 + $0x38] sm:$0xff] %vm575_vm3, %v550_v63  ;;  %v533_v1 = vmax.f32 %v487_v0, 0.0 }
 0x163   :  { %v451_v2 = vpop.f32.mrf.mxu1 }
 0x164   :  { %v565_v3 = vmin.f32 %v533_v1, 1.0  ;;  %v452_v4 = vadd.f32 %v923_v14, %v451_v2 }
 0x166   :  { %598 = vst.msk [vmem:[%s1092_s5 + $0xb0] sm:$0xff] %vm575_vm3, %v565_v3  ;;  %v519_v5 = vmax.f32 %v452_v4, 0.0 }
 0x167   :  { %v488_v6 = vpop.f32.mrf.mxu3 }
 0x168   :  { %v551_v7 = vmin.f32 %v519_v5, 1.0  ;;  %v489_v8 = vadd.f32 %v923_v14, %v488_v6 }
 0x16a   :  { %584 = vst.msk [vmem:[%s1092_s5 + $0x40] sm:$0xff] %vm575_vm3, %v551_v7  ;;  %v534_v9 = vmax.f32 %v489_v8, 0.0 }
 0x16b   :  { %v453_v10 = vpop.f32.mrf.mxu1 }
 0x16c   :  { %v566_v11 = vmin.f32 %v534_v9, 1.0  ;;  %v454_v12 = vadd.f32 %v923_v14, %v453_v10 }
 0x16e   :  { %599 = vst.msk [vmem:[%s1092_s5 + $0xb8] sm:$0xff] %vm575_vm3, %v566_v11  ;;  %v520_v13 = vmax.f32 %v454_v12, 0.0 }
 0x16f   :  { %v491_v15 = vpop.f32.mrf.mxu3 }
 0x170   :  { %v552_v16 = vmin.f32 %v520_v13, 1.0  ;;  %v492_v17 = vadd.f32 %v923_v14, %v491_v15 }
 0x172   :  { %585 = vst.msk [vmem:[%s1092_s5 + $0x48] sm:$0xff] %vm575_vm3, %v552_v16  ;;  %v535_v18 = vmax.f32 %v492_v17, 0.0 }
 0x173   :  { %v456_v27 = vpop.f32.mrf.mxu1 }
 0x174   :  { %v567_v19 = vmin.f32 %v535_v18, 1.0  ;;  %v457_v20 = vadd.f32 %v923_v14, %v456_v27 }
 0x176   :  { %600 = vst.msk [vmem:[%s1092_s5 + $0xc0] sm:$0xff] %vm575_vm3, %v567_v19  ;;  %v521_v21 = vmax.f32 %v457_v20, 0.0 }
 0x177   :  { %v493_v22 = vpop.f32.mrf.mxu3 }
 0x178   :  { %v553_v41 = vmin.f32 %v521_v21, 1.0  ;;  %v494_v23 = vadd.f32 %v923_v14, %v493_v22 }
 0x17a   :  { %586 = vst.msk [vmem:[%s1092_s5 + $0x50] sm:$0xff] %vm575_vm3, %v553_v41  ;;  %v536_v24 = vmax.f32 %v494_v23, 0.0 }
 0x17b   :  { %v458_v25 = vpop.f32.mrf.mxu1 }
 0x17c   :  { %v568_v26 = vmin.f32 %v536_v24, 1.0  ;;  %v459_v28 = vadd.f32 %v923_v14, %v458_v25 }
 0x17e   :  { %601 = vst.msk [vmem:[%s1092_s5 + $0xc8] sm:$0xff] %vm575_vm3, %v568_v26  ;;  %v522_v29 = vmax.f32 %v459_v28, 0.0 }
 0x17f   :  { %v496_v30 = vpop.f32.mrf.mxu3 }
 0x180   :  { %v554_v31 = vmin.f32 %v522_v29, 1.0  ;;  %v497_v32 = vadd.f32 %v923_v14, %v496_v30 }
 0x182   :  { %587 = vst.msk [vmem:[%s1092_s5 + $0x58] sm:$0xff] %vm575_vm3, %v554_v31  ;;  %v537_v33 = vmax.f32 %v497_v32, 0.0 }
 0x183   :  { %v461_v34 = vpop.f32.mrf.mxu1 }
 0x184   :  { %v569_v35 = vmin.f32 %v537_v33, 1.0  ;;  %v462_v36 = vadd.f32 %v923_v14, %v461_v34 }
 0x186   :  { %602 = vst.msk [vmem:[%s1092_s5 + $0xd0] sm:$0xff] %vm575_vm3, %v569_v35  ;;  %v523_v37 = vmax.f32 %v462_v36, 0.0 }
 0x187   :  { %v498_v38 = vpop.f32.mrf.mxu3 }
 0x188   :  { %v555_v39 = vmin.f32 %v523_v37, 1.0  ;;  %v499_v40 = vadd.f32 %v923_v14, %v498_v38 }
 0x18a   :  { %588 = vst.msk [vmem:[%s1092_s5 + $0x60] sm:$0xff] %vm575_vm3, %v555_v39  ;;  %v538_v42 = vmax.f32 %v499_v40, 0.0 }
 0x18b   :  { %v463_v43 = vpop.f32.mrf.mxu1 }
 0x18c   :  { %v570_v44 = vmin.f32 %v538_v42, 1.0  ;;  %v464_v45 = vadd.f32 %v923_v14, %v463_v43 }
 0x18e   :  { %603 = vst.msk [vmem:[%s1092_s5 + $0xd8] sm:$0xff] %vm575_vm3, %v570_v44  ;;  %v524_v46 = vmax.f32 %v464_v45, 0.0 }
 0x18f   :  { %v501_v47 = vpop.f32.mrf.mxu3 }
 0x190   :  { %v556_v48 = vmin.f32 %v524_v46, 1.0  ;;  %v502_v49 = vadd.f32 %v923_v14, %v501_v47 }
 0x192   :  { %589 = vst.msk [vmem:[%s1092_s5 + $0x68] sm:$0xff] %vm575_vm3, %v556_v48  ;;  %v539_v50 = vmax.f32 %v502_v49, 0.0 }
 0x193   :  { %v466_v51 = vpop.f32.mrf.mxu1 }
 0x194   :  { %v571_v52 = vmin.f32 %v539_v50, 1.0  ;;  %v467_v53 = vadd.f32 %v923_v14, %v466_v51 }
 0x196   :  { %604 = vst.msk [vmem:[%s1092_s5 + $0xe0] sm:$0xff] %vm575_vm3, %v571_v52  ;;  %v525_v54 = vmax.f32 %v467_v53, 0.0 }
 0x197   :  { %v503_v55 = vpop.f32.mrf.mxu3 }
 0x198   :  { %v557_v56 = vmin.f32 %v525_v54, 1.0  ;;  %v504_v57 = vadd.f32 %v923_v14, %v503_v55 }
 0x19a   :  { %590 = vst.msk [vmem:[%s1092_s5 + $0x70] sm:$0xff] %vm575_vm3, %v557_v56  ;;  %v540_v58 = vmax.f32 %v504_v57, 0.0 }
 0x19b   :  { %v468_v59 = vpop.f32.mrf.mxu1 }
 0x19c   :  { %v572_v60 = vmin.f32 %v540_v58, 1.0  ;;  %v469_v61 = vadd.f32 %v923_v14, %v468_v59 }
 0x19e   :  { %605 = vst.msk [vmem:[%s1092_s5 + $0xe8] sm:$0xff] %vm575_vm3, %v572_v60  ;;  %v526_v62 = vmax.f32 %v469_v61, 0.0 }
 0x19f   :  { %v506_v63 = vpop.f32.mrf.mxu3 }
 0x1a0   :  { %v558_v0 = vmin.f32 %v526_v62, 1.0  ;;  %v507_v1 = vadd.f32 %v923_v14, %v506_v63 }
 0x1a2   :  { %591 = vst.msk [vmem:[%s1092_s5 + $0x78] sm:$0xff] %vm575_vm3, %v558_v0  ;;  %v541_v2 = vmax.f32 %v507_v1, 0.0 }
 0x1a3   :  { %v471_v3 = vpop.f32.mrf.mxu1 }
 0x1a4   :  { %v573_v4 = vmin.f32 %v541_v2, 1.0  ;;  %v472_v5 = vadd.f32 %v923_v14, %v471_v3 }
 0x1a6   :  { %606 = vst.msk [vmem:[%s1092_s5 + $0xf0] sm:$0xff] %vm575_vm3, %v573_v4  ;;  %v527_v6 = vmax.f32 %v472_v5, 0.0 }
 0x1a7   :  { %v508_v7 = vpop.f32.mrf.mxu3 }
 0x1a8   :  { %v559_v8 = vmin.f32 %v527_v6, 1.0  ;;  %v509_v9 = vadd.f32 %v923_v14, %v508_v7 }
 0x1aa   :  { %592 = vst.msk [vmem:[%s1092_s5 + $0x80] sm:$0xff] %vm575_vm3, %v559_v8  ;;  %v542_v10 = vmax.f32 %v509_v9, 0.0 }
 0x1ab   :  { %v473_v11 = vpop.f32.mrf.mxu1 }
 0x1ac   :  { %v574_v12 = vmin.f32 %v542_v10, 1.0  ;;  %v474_v13 = vadd.f32 %v923_v14, %v473_v11 }
 0x1ae   :  { %607 = vst.msk [vmem:[%s1092_s5 + $0xf8] sm:$0xff] %vm575_vm3, %v574_v12  ;;  %v528_v15 = vmax.f32 %v474_v13, 0.0 }
 0x1b0   :  { %v560_v16 = vmin.f32 %v528_v15, 1.0 }
 0x1b2   :  { %593 = vst.msk [vmem:[%s1092_s5 + $0x88] sm:$0xff] %vm575_vm3, %v560_v16 }

</bundles_post_ra>
